<compile_context>
chip_gen: v7x
topology: tpu7x:2x2x1
jax: 0.10.0
libtpu: 0.0.40
codegen_flags: <defaults>
</compile_context>

<pallas_src>
import functools

import jax
import jax.numpy as jnp
from jax import lax
from jax.experimental import pallas as pl
from jax.experimental.pallas import tpu as pltpu

# ----------------------------- configuration -------------------------------
B = 2              # batch
LT = 16            # text sequence length
VOCAB = 100        # toy vocab for the text stub
VOCAB_PAD = 128    # vocab padded to a full lane width (one-hot matmul gather)
D = 128            # hidden size (module hardcodes 768; scaled down for demo)
N_HEAD = 8         # MultiHeadAttention(8, D, D, D)
D_K = D            # per-head key dim (constructor passes hidden_size)
D_V = D            # per-head value dim
NUM_LABELS = 5     # text_num_labels
C_PAD = 128        # classifier logits padded to a full lane width
IMG = 16           # image spatial size
PATCH = 4          # ViT patch size
N_PATCH = (IMG // PATCH) * (IMG // PATCH)
LI = N_PATCH + 1   # true image sequence length (CLS + patches) = 17
LI_PAD = 32        # image sequence padded so f32 AND bf16 tiles are clean
PATCH_K = 3 * PATCH * PATCH       # 48
PATCH_K_PAD = 128                 # patch contraction padded to full lane width
ALPHA = 0.5
BETA = 0.1


# ============================ fused Pallas kernel ===========================

def _asp_fused_kernel(ids_ref, lab_ref, tp_ref,
                      embt_ref, tew_ref, teb_ref, w1_ref, b1_ref,
                      p_ref, pw_ref, pb_ref, add_ref, vew_ref, veb_ref,
                      wq_ref, wkv_ref, wfc_ref, lng_ref, lnb_ref,
                      w0_ref, b0_ref,
                      logits1_ref, logits0_ref, cost_ref, stats_ref,
                      q_scr, kv_scr, oh_scr, *,
                      n_head, d_k, d_v, li_valid, num_labels,
                      eps_ln, eps_cos):
    """One batch element: text stub + classifier1 + token-CE partials,
    ViT stub, fused 8-head cross attention + residual/LayerNorm + classifier0,
    and the masked cosine cost matrix of the OT alignment loss."""
    lt = ids_ref.shape[0]
    vocab_pad = embt_ref.shape[0]
    lp = p_ref.shape[0]

    # ---------------- text encoder stub (gather == one-hot matmul) ---------
    ids = ids_ref[...]                                            # (Lt, 1) i32
    vcol = lax.broadcasted_iota(jnp.int32, (lt, vocab_pad), 1)
    onehot = (vcol == ids).astype(jnp.bfloat16)
    emb = jnp.dot(onehot, embt_ref[...],
                  preferred_element_type=jnp.float32)             # (Lt, D)
    txt = jnp.tanh(jnp.dot(emb.astype(jnp.bfloat16), tew_ref[...],
                           preferred_element_type=jnp.float32) + teb_ref[...])

    # ---------------- classifier1 + token cross-entropy partials -----------
    logits1 = jnp.dot(txt.astype(jnp.bfloat16), w1_ref[...],
                      preferred_element_type=jnp.float32) + b1_ref[...]
    logits1_ref[...] = logits1                                    # (Lt, C_PAD)

    lab = lab_ref[...]                                            # (Lt, 1) i32
    ccol = lax.broadcasted_iota(jnp.int32, (lt, logits1.shape[1]), 1)
    z = jnp.where(ccol < num_labels, logits1, -1e30)              # ignore pad lanes
    m = jnp.max(z, axis=-1, keepdims=True)
    lse = m + jnp.log(jnp.sum(jnp.exp(z - m), axis=-1, keepdims=True))
    picked = jnp.sum(jnp.where(ccol == lab, logits1, 0.0), axis=-1, keepdims=True)
    valid = (lab != -100).astype(jnp.float32)
    ce_sum = jnp.sum((lse - picked) * valid, axis=0, keepdims=True)   # (1, 1)
    ce_cnt = jnp.sum(valid, axis=0, keepdims=True)                    # (1, 1)
    lane = lax.broadcasted_iota(jnp.int32, (1, logits1.shape[1]), 1)
    stats_ref[...] = jnp.where(lane == 0, ce_sum,
                               jnp.where(lane == 1, ce_cnt, 0.0))     # (1, C_PAD)

    # ---------------- ViT stub: patch embed + CLS/pos + dense+tanh ---------
    tok = jnp.dot(p_ref[...].astype(jnp.bfloat16), pw_ref[...],
                  preferred_element_type=jnp.float32) + pb_ref[...] + add_ref[...]
    img = jnp.tanh(jnp.dot(tok.astype(jnp.bfloat16), vew_ref[...],
                           preferred_element_type=jnp.float32) + veb_ref[...])

    # ---------------- 8-head image->text cross attention -------------------
    # q / kv cast to bf16 once and staged in VMEM scratch; padded image key
    # positions are masked so results equal the unpadded LI=17 computation.
    q_scr[...] = jnp.dot(txt.astype(jnp.bfloat16), wq_ref[...],
                         preferred_element_type=jnp.float32).astype(jnp.bfloat16)
    kv_scr[...] = jnp.dot(img.astype(jnp.bfloat16), wkv_ref[...],
                          preferred_element_type=jnp.float32).astype(jnp.bfloat16)
    inv_temp = 1.0 / (float(d_k) ** 0.5)
    icol = lax.broadcasted_iota(jnp.int32, (lt, lp), 1)
    kv_valid = icol < li_valid
    for h in range(n_head):
        qh = q_scr[:, h * d_k:(h + 1) * d_k]
        kh = kv_scr[:, h * d_k:(h + 1) * d_k]
        vh = kv_scr[:, n_head * d_k + h * d_v:n_head * d_k + (h + 1) * d_v]
        s = lax.dot_general(qh, kh, (((1,), (1,)), ((), ())),
                            preferred_element_type=jnp.float32) * inv_temp
        s = jnp.where(kv_valid, s, -1e30)
        s = s - jnp.max(s, axis=-1, keepdims=True)
        p = jnp.exp(s)
        p = p * pl.reciprocal(jnp.sum(p, axis=-1, keepdims=True), approx=True)
        oh = jnp.dot(p.astype(jnp.bfloat16), vh,
                     preferred_element_type=jnp.float32)          # (Lt, dv)
        oh_scr[:, h * d_v:(h + 1) * d_v] = oh.astype(jnp.bfloat16)
    # single K = n_head*d_v fc projection instead of 8 tiny matmuls
    fc = jnp.dot(oh_scr[...], wfc_ref[...], preferred_element_type=jnp.float32)

    # dropout (eval) -> identity; residual + post-LayerNorm(eps=1e-6)
    x = fc + txt
    mu = jnp.mean(x, axis=-1, keepdims=True)
    var = jnp.mean((x - mu) ** 2, axis=-1, keepdims=True)
    ln = (x - mu) * lax.rsqrt(var + eps_ln) * lng_ref[...] + lnb_ref[...]
    logits0_ref[...] = jnp.dot(ln.astype(jnp.bfloat16), w0_ref[...],
                               preferred_element_type=jnp.float32) + b0_ref[...]

    # ---------------- masked cosine cost matrix (OT alignment loss) --------
    inv_eps = 1.0 / eps_cos
    tn = (txt * jnp.minimum(
        lax.rsqrt(jnp.sum(txt * txt, axis=-1, keepdims=True)),
        inv_eps)).astype(jnp.bfloat16)
    imn = (img * jnp.minimum(
        lax.rsqrt(jnp.sum(img * img, axis=-1, keepdims=True)),
        inv_eps)).astype(jnp.bfloat16)
    sim = lax.dot_general(tn, imn, (((1,), (1,)), ((), ())),
                          preferred_element_type=jnp.float32)     # (Lt, Lp)
    joint = jnp.maximum(tp_ref[...], (icol >= li_valid).astype(jnp.float32))
    cost_ref[...] = (1.0 - sim) * (1.0 - joint)   # == masked_fill(joint_pad, 0)


def asp_fused(params, input_ids, patches, labels, text_pad):
    """One fused pallas_call; grid over batch, 'parallel' for v7x's two TCs."""
    Bx = input_ids.shape[0]
    ids = input_ids.reshape(Bx, LT, 1).astype(jnp.int32)
    lab = labels.reshape(Bx, LT, 1).astype(jnp.int32)
    tp = text_pad.astype(jnp.float32).reshape(Bx, LT, 1)
    t = params["text"]
    v = params["vit"]
    m = params["mha"]
    kern = functools.partial(_asp_fused_kernel, n_head=N_HEAD, d_k=D_K,
                             d_v=D_V, li_valid=LI, num_labels=NUM_LABELS,
                             eps_ln=1e-6, eps_cos=1e-5)
    bc = lambda b: (0, 0)          # broadcast (grid-invariant) operands
    per = lambda b: (b, 0, 0)      # per-batch operands
    return pl.pallas_call(
        kern,
        out_shape=(jax.ShapeDtypeStruct((Bx, LT, C_PAD), jnp.float32),
                   jax.ShapeDtypeStruct((Bx, LT, C_PAD), jnp.float32),
                   jax.ShapeDtypeStruct((Bx, LT, LI_PAD), jnp.float32),
                   jax.ShapeDtypeStruct((Bx, 1, C_PAD), jnp.float32)),
        grid=(Bx,),
        in_specs=[
            pl.BlockSpec((None, LT, 1), per),                 # input ids
            pl.BlockSpec((None, LT, 1), per),                 # labels
            pl.BlockSpec((None, LT, 1), per),                 # text_pad
            pl.BlockSpec((VOCAB_PAD, D), bc),                 # embedding table
            pl.BlockSpec((D, D), bc),                         # text enc W^T
            pl.BlockSpec((1, D), bc),                         # text enc b
            pl.BlockSpec((D, C_PAD), bc),                     # classifier1 W^T
            pl.BlockSpec((1, C_PAD), bc),                     # classifier1 b
            pl.BlockSpec((None, LI_PAD, PATCH_K_PAD), per),   # patches
            pl.BlockSpec((PATCH_K_PAD, D), bc),               # patch W^T
            pl.BlockSpec((1, D), bc),                         # patch b
            pl.BlockSpec((LI_PAD, D), bc),                    # CLS + pos add
            pl.BlockSpec((D, D), bc),                         # vit enc W^T
            pl.BlockSpec((1, D), bc),                         # vit enc b
            pl.BlockSpec((D, N_HEAD * D_K), bc),              # W_q^T
            pl.BlockSpec((D, 2 * N_HEAD * D_K), bc),          # [W_k^T | W_v^T]
            pl.BlockSpec((N_HEAD * D_V, D), bc),              # W_fc^T
            pl.BlockSpec((1, D), bc),                         # LN gamma
            pl.BlockSpec((1, D), bc),                         # LN beta
            pl.BlockSpec((D, C_PAD), bc),                     # classifier0 W^T
            pl.BlockSpec((1, C_PAD), bc),                     # classifier0 b
        ],
        out_specs=[
            pl.BlockSpec((None, LT, C_PAD), per),             # text logits
            pl.BlockSpec((None, LT, C_PAD), per),             # cross logits
            pl.BlockSpec((None, LT, LI_PAD), per),            # OT cost matrix
            pl.BlockSpec((None, 1, C_PAD), per),              # [ce_sum, ce_cnt]
        ],
        scratch_shapes=[
            pltpu.VMEM((LT, N_HEAD * D_K), jnp.bfloat16),           # q
            pltpu.VMEM((LI_PAD, 2 * N_HEAD * D_K), jnp.bfloat16),   # k | v
            pltpu.VMEM((LT, N_HEAD * D_V), jnp.bfloat16),           # per-head out
        ],
        compiler_params=pltpu.CompilerParams(dimension_semantics=("parallel",)),
    )(ids, lab, tp,
      t["emb_t"], t["enc_wt"], t["enc_b"], params["cls1_wt"], params["cls1_b"],
      patches, v["patch_wt"], v["patch_b"], v["add_tok"], v["enc_wt"], v["enc_b"],
      m["w_qt"], m["w_kvt"], m["w_fct"], m["ln_g"], m["ln_b"],
      params["cls0_wt"], params["cls0_b"])


# ======================= plain-JAX pieces (glue) ============================

def make_patches(pixel_values):
    """Conv2d(kernel=stride=P) operand layout: NCHW -> (B, LI_PAD, 128)."""
    Bx, Cc, H, W = pixel_values.shape
    P = PATCH
    nh, nw = H // P, W // P
    patches = pixel_values.reshape(Bx, Cc, nh, P, nw, P)
    patches = patches.transpose(0, 2, 4, 1, 3, 5).reshape(Bx, nh * nw, Cc * P * P)
    # Row 0 reserved for CLS, rows LI..LI_PAD-1 are sequence padding; the
    # contraction dim is zero-padded 48 -> 128 so the in-kernel matmul is
    # lane-dense.
    return jnp.pad(patches, ((0, 0), (1, LI_PAD - 1 - nh * nw),
                             (0, PATCH_K_PAD - Cc * P * P)))


def crf_log_likelihood(emissions, tags, mask, start, end, trans):
    """torchcrf.CRF(batch_first=True).forward semantics, reduction='sum'."""
    # TODO(synk): tiny sequential DP over NUM_LABELS kept in plain JAX lax.scan.
    Bx, L, C = emissions.shape
    em = jnp.transpose(emissions, (1, 0, 2))                 # (L, B, C)
    tg = jnp.transpose(tags, (1, 0)).astype(jnp.int32)       # (L, B)
    mk = jnp.transpose(mask, (1, 0)).astype(jnp.float32)     # (L, B)
    barange = jnp.arange(Bx)

    score = start[tg[0]] + em[0, barange, tg[0]]             # numerator (B,)
    alpha = start[None, :] + em[0]                           # denominator (B, C)

    def step(carry, xs):
        score, alpha, prev = carry
        em_t, tg_t, mk_t = xs
        score = score + (trans[prev, tg_t] + em_t[barange, tg_t]) * mk_t
        nxt = jax.nn.logsumexp(
            alpha[:, :, None] + trans[None, :, :] + em_t[:, None, :], axis=1)
        alpha = jnp.where(mk_t[:, None] > 0, nxt, alpha)
        return (score, alpha, tg_t), None

    (score, alpha, _), _ = lax.scan(step, (score, alpha, tg[0]),
                                    (em[1:], tg[1:], mk[1:]))
    seq_ends = jnp.sum(mk, axis=0).astype(jnp.int32) - 1
    last_tags = tg[seq_ends, barange]
    score = score + end[last_tags]
    denom = jax.nn.logsumexp(alpha + end[None, :], axis=1)
    return jnp.sum(score - denom)


def ipot(C, x_len, x_pad, y_len, y_pad, joint_pad, beta, iteration, k):
    # TODO(synk): optimal_transport_dist/ipot helpers are not in the module
    # source; this follows the UNITER reference (beta=0.5, 50 iters, k=1) in
    # plain JAX (T is detached upstream in the original).
    b, m, n = C.shape
    sigma = jnp.ones((b, m), C.dtype) / x_len[:, None]
    sigma = jnp.where(x_pad, 0.0, sigma)
    T = jnp.ones((b, n, m), C.dtype)
    A = jnp.exp(-jnp.transpose(C, (0, 2, 1)) / beta)
    jp = jnp.transpose(joint_pad, (0, 2, 1))                 # (b, n, m)
    T = jnp.where(jp, 0.0, T)
    A = jnp.where(jp, 0.0, A)
    x_len_b = x_len[:, None, None]
    y_len_b = y_len[:, None, None]
    x_mask = (x_pad.astype(C.dtype) * 1e4)[:, None, :]       # (b, 1, m)
    y_mask = (y_pad.astype(C.dtype) * 1e4)[:, None, :]       # (b, 1, n)

    def outer(_, carry):
        T, sigma = carry
        Q = A * T                                            # (b, n, m)
        sig = sigma.reshape(b, m, 1)

        def inner(_, carry2):
            sig, _ = carry2
            delta = 1.0 / (y_len_b * jnp.matmul(Q, sig).reshape(b, 1, n) + y_mask)
            a = jnp.matmul(jnp.transpose(Q, (0, 2, 1)),
                           delta.reshape(b, n, 1)).reshape(b, 1, m)
            sig = (1.0 / (x_len_b * a + x_mask)).reshape(b, m, 1)
            return (sig, delta)

        sig, delta = lax.fori_loop(
            0, k, inner, (sig, jnp.zeros((b, 1, n), C.dtype)))
        T = delta.reshape(b, n, 1) * Q * sig.reshape(b, 1, m)
        return (T, sig.reshape(b, m))

    T, _ = lax.fori_loop(0, iteration, outer, (T, sigma))
    return jnp.where(jp, 0.0, T)


# ============================== full forward ================================

def asp_forward(params, input_ids, pixel_values, attention_mask, labels,
                cross_labels, alpha, beta):
    Bx = input_ids.shape[0]
    # TODO(synk): DeBERTa / ViT backbones replaced by embedding / patch-embed
    # + dense+tanh stand-ins inside the fused kernel.
    patches = make_patches(pixel_values)
    text_pad = (attention_mask == 1)   # NOTE: replicates the module's polarity

    logits1_pad, logits0_pad, cost, stats = asp_fused(
        params, input_ids, patches, labels, text_pad)
    text_token_logits = logits1_pad[:, :, :NUM_LABELS]
    cross_logits = logits0_pad[:, :, :NUM_LABELS]

    # CrossEntropyLoss reduction='mean' over non-ignored tokens.
    text_loss = jnp.sum(stats[:, 0, 0]) / jnp.sum(stats[:, 0, 1])

    # ---- CRF loss (sequential DP in plain JAX)
    mask = (labels != -100)
    mask = mask.at[:, 0].set(True)
    crf_llh = crf_log_likelihood(cross_logits, cross_labels,
                                 mask.astype(jnp.float32),
                                 params["crf_start"], params["crf_end"],
                                 params["crf_trans"])
    cross_crf_loss = -crf_llh / 10.0

    # ---- optimal transport (word-region alignment).  Padded image positions
    # (LI..LI_PAD-1) are flagged as padding, making the result identical to the
    # unpadded LI=17 computation with image_pad == zeros (as in the module).
    image_pad = jnp.broadcast_to(jnp.arange(LI_PAD) >= LI, (Bx, LI_PAD))
    txt_len = (LT - jnp.sum(text_pad, axis=1)).astype(jnp.float32)
    img_len = (LI_PAD - jnp.sum(image_pad, axis=1)).astype(jnp.float32)   # == 17
    joint_pad = text_pad[:, :, None] | image_pad[:, None, :]
    T = ipot(lax.stop_gradient(cost), txt_len, text_pad, img_len, image_pad,
             joint_pad, 0.5, 50, 1)
    ot_dist = jnp.einsum("bij,bji->b", cost, lax.stop_gradient(T))   # trace(cost @ T)
    word_region_align_loss = jnp.mean(ot_dist)

    loss = alpha * text_loss + cross_crf_loss + beta * word_region_align_loss
    return {"loss": loss, "logits": text_token_logits, "cross_logits": cross_logits}


# ============================ parameter init ================================

def init_params(key):
    ks = jax.random.split(key, 16)

    def norm(k, shape, scale=0.02):
        return (scale * jax.random.normal(k, shape)).astype(jnp.float32)

    def unif(k, shape):
        return jax.random.uniform(k, shape, minval=-0.1, maxval=0.1,
                                  dtype=jnp.float32)

    # PyTorch-layout weights (out, in), then stored pre-transposed / fused /
    # padded in the layouts the fused kernel consumes (matmul operands bf16).
    word_emb = norm(ks[0], (VOCAB, D))
    text_enc_w = norm(ks[1], (D, D))
    patch_w = norm(ks[2], (D, PATCH_K))      # Conv2d(kernel=stride=P) flattened
    patch_b = jnp.zeros((D,), jnp.float32)
    cls_tok = norm(ks[3], (1, D))
    pos = norm(ks[4], (LI, D))
    vit_enc_w = norm(ks[5], (D, D))
    w_qs = norm(ks[6], (N_HEAD * D_K, D))
    w_ks = norm(ks[7], (N_HEAD * D_K, D))
    w_vs = norm(ks[8], (N_HEAD * D_V, D))
    w_fc = norm(ks[9], (D, N_HEAD * D_V))
    cls1_w = norm(ks[10], (NUM_LABELS, D))
    cls0_w = norm(ks[11], (NUM_LABELS, D))

    # additive token array: row 0 -> CLS + pos[0] (minus the patch bias that the
    # fused matmul adds to every row), rows 1..LI-1 -> pos, padded rows -> 0.
    add_tok = jnp.zeros((LI_PAD, D), jnp.float32)
    add_tok = add_tok.at[0].set(cls_tok[0] + pos[0] - patch_b)
    add_tok = add_tok.at[1:LI].set(pos[1:])
    add_tok = add_tok.at[LI:].set(-patch_b)

    def pad_cls(w):
        wt = jnp.pad(jnp.transpose(w), ((0, 0), (0, C_PAD - NUM_LABELS)))
        bp = jnp.zeros((1, C_PAD), jnp.float32)
        return wt.astype(jnp.bfloat16), bp

    cls1_wt, cls1_b = pad_cls(cls1_w)
    cls0_wt, cls0_b = pad_cls(cls0_w)

    return {
        "text": {
            "emb_t": jnp.pad(word_emb, ((0, VOCAB_PAD - VOCAB), (0, 0))
                             ).astype(jnp.bfloat16),
            "enc_wt": jnp.transpose(text_enc_w).astype(jnp.bfloat16),
            "enc_b": jnp.zeros((1, D), jnp.float32),
        },
        "vit": {
            "patch_wt": jnp.pad(jnp.transpose(patch_w),
                                ((0, PATCH_K_PAD - PATCH_K), (0, 0))
                                ).astype(jnp.bfloat16),
            "patch_b": patch_b.reshape(1, D),
            "add_tok": add_tok,
            "enc_wt": jnp.transpose(vit_enc_w).astype(jnp.bfloat16),
            "enc_b": jnp.zeros((1, D), jnp.float32),
        },
        "mha": {
            "w_qt": jnp.transpose(w_qs).astype(jnp.bfloat16),
            "w_kvt": jnp.concatenate([jnp.transpose(w_ks), jnp.transpose(w_vs)],
                                     axis=1).astype(jnp.bfloat16),
            "w_fct": jnp.transpose(w_fc).astype(jnp.bfloat16),
            "ln_g": jnp.ones((1, D), jnp.float32),
            "ln_b": jnp.zeros((1, D), jnp.float32),
        },
        "cls1_wt": cls1_wt, "cls1_b": cls1_b,
        "cls0_wt": cls0_wt, "cls0_b": cls0_b,
        "crf_start": unif(ks[12], (NUM_LABELS,)),
        "crf_end": unif(ks[13], (NUM_LABELS,)),
        "crf_trans": unif(ks[14], (NUM_LABELS, NUM_LABELS)),
    }


# ================================== main ====================================

if __name__ == "__main__":
    key = jax.random.PRNGKey(0)
    pk, k_ids, k_px, k_lab, k_cross = jax.random.split(key, 5)
    params = init_params(pk)

    input_ids = jax.random.randint(k_ids, (B, LT), 0, VOCAB)
    pixel_values = jax.random.normal(k_px, (B, 3, IMG, IMG), dtype=jnp.float32)
    valid_lens = jnp.array([12, 10], dtype=jnp.int32)
    attention_mask = (jnp.arange(LT)[None, :] < valid_lens[:, None]).astype(jnp.int32)
    labels = jax.random.randint(k_lab, (B, LT), 0, NUM_LABELS)
    labels = jnp.where(attention_mask == 1, labels, -100)
    cross_labels = jax.random.randint(k_cross, (B, LT), 0, NUM_LABELS)

    fwd = jax.jit(functools.partial(asp_forward, alpha=ALPHA, beta=BETA))
    out = fwd(params, input_ids, pixel_values, attention_mask, labels, cross_labels)
    out = jax.block_until_ready(out)

    assert out["logits"].shape == (B, LT, NUM_LABELS)
    assert out["cross_logits"].shape == (B, LT, NUM_LABELS)
    assert out["loss"].shape == ()
    assert bool(jnp.isfinite(out["loss"]))
    print("KERNEL_OK")
</pallas_src>

<mosaic_0001>
module attributes {stable_mosaic.version = 11 : i64} {
  func.func @_asp_fused_kernel(%arg0: i32, %arg1: memref<1x16x1xi32, #tpu.memory_space<vmem>>, %arg2: memref<1x16x1xi32, #tpu.memory_space<vmem>>, %arg3: memref<1x16x1xf32, #tpu.memory_space<vmem>>, %arg4: memref<128x128xbf16, #tpu.memory_space<vmem>>, %arg5: memref<128x128xbf16, #tpu.memory_space<vmem>>, %arg6: memref<1x128xf32, #tpu.memory_space<vmem>>, %arg7: memref<128x128xbf16, #tpu.memory_space<vmem>>, %arg8: memref<1x128xf32, #tpu.memory_space<vmem>>, %arg9: memref<1x32x128xf32, #tpu.memory_space<vmem>>, %arg10: memref<128x128xbf16, #tpu.memory_space<vmem>>, %arg11: memref<1x128xf32, #tpu.memory_space<vmem>>, %arg12: memref<32x128xf32, #tpu.memory_space<vmem>>, %arg13: memref<128x128xbf16, #tpu.memory_space<vmem>>, %arg14: memref<1x128xf32, #tpu.memory_space<vmem>>, %arg15: memref<128x1024xbf16, #tpu.memory_space<vmem>>, %arg16: memref<128x2048xbf16, #tpu.memory_space<vmem>>, %arg17: memref<1024x128xbf16, #tpu.memory_space<vmem>>, %arg18: memref<1x128xf32, #tpu.memory_space<vmem>>, %arg19: memref<1x128xf32, #tpu.memory_space<vmem>>, %arg20: memref<128x128xbf16, #tpu.memory_space<vmem>>, %arg21: memref<1x128xf32, #tpu.memory_space<vmem>>, %arg22: memref<1x16x128xf32, #tpu.memory_space<vmem>>, %arg23: memref<1x16x128xf32, #tpu.memory_space<vmem>>, %arg24: memref<1x16x32xf32, #tpu.memory_space<vmem>>, %arg25: memref<1x1x128xf32, #tpu.memory_space<vmem>>, %arg26: memref<16x1024xbf16, #tpu.memory_space<vmem>>, %arg27: memref<32x2048xbf16, #tpu.memory_space<vmem>>, %arg28: memref<16x1024xbf16, #tpu.memory_space<vmem>>) attributes {dimension_semantics = [#tpu.dimension_semantics<parallel>], iteration_bounds = array<i64: 2>, scalar_prefetch = 0 : i64, scratch_operands = 3 : i64, tpu.core_type = #tpu.core_type<tc>, window_params = [{transform_indices = @transform_0, window_bounds = array<i64: 1, 16, 1>}, {transform_indices = @transform_1, window_bounds = array<i64: 1, 16, 1>}, {transform_indices = @transform_2, window_bounds = array<i64: 1, 16, 1>}, {pipeline_mode = #tpu.pipeline_mode<synchronous>, transform_indices = @transform_3, window_bounds = array<i64: 128, 128>}, {pipeline_mode = #tpu.pipeline_mode<synchronous>, transform_indices = @transform_4, window_bounds = array<i64: 128, 128>}, {pipeline_mode = #tpu.pipeline_mode<synchronous>, transform_indices = @transform_5, window_bounds = array<i64: 1, 128>}, {pipeline_mode = #tpu.pipeline_mode<synchronous>, transform_indices = @transform_6, window_bounds = array<i64: 128, 128>}, {pipeline_mode = #tpu.pipeline_mode<synchronous>, transform_indices = @transform_7, window_bounds = array<i64: 1, 128>}, {transform_indices = @transform_8, window_bounds = array<i64: 1, 32, 128>}, {pipeline_mode = #tpu.pipeline_mode<synchronous>, transform_indices = @transform_9, window_bounds = array<i64: 128, 128>}, {pipeline_mode = #tpu.pipeline_mode<synchronous>, transform_indices = @transform_10, window_bounds = array<i64: 1, 128>}, {pipeline_mode = #tpu.pipeline_mode<synchronous>, transform_indices = @transform_11, window_bounds = array<i64: 32, 128>}, {pipeline_mode = #tpu.pipeline_mode<synchronous>, transform_indices = @transform_12, window_bounds = array<i64: 128, 128>}, {pipeline_mode = #tpu.pipeline_mode<synchronous>, transform_indices = @transform_13, window_bounds = array<i64: 1, 128>}, {pipeline_mode = #tpu.pipeline_mode<synchronous>, transform_indices = @transform_14, window_bounds = array<i64: 128, 1024>}, {pipeline_mode = #tpu.pipeline_mode<synchronous>, transform_indices = @transform_15, window_bounds = array<i64: 128, 2048>}, {pipeline_mode = #tpu.pipeline_mode<synchronous>, transform_indices = @transform_16, window_bounds = array<i64: 1024, 128>}, {pipeline_mode = #tpu.pipeline_mode<synchronous>, transform_indices = @transform_17, window_bounds = array<i64: 1, 128>}, {pipeline_mode = #tpu.pipeline_mode<synchronous>, transform_indices = @transform_18, window_bounds = array<i64: 1, 128>}, {pipeline_mode = #tpu.pipeline_mode<synchronous>, transform_indices = @transform_19, window_bounds = array<i64: 128, 128>}, {pipeline_mode = #tpu.pipeline_mode<synchronous>, transform_indices = @transform_20, window_bounds = array<i64: 1, 128>}, {transform_indices = @transform_21, window_bounds = array<i64: 1, 16, 128>}, {transform_indices = @transform_22, window_bounds = array<i64: 1, 16, 128>}, {transform_indices = @transform_23, window_bounds = array<i64: 1, 16, 32>}, {transform_indices = @transform_24, window_bounds = array<i64: 1, 1, 128>}]} {
    %c0 = arith.constant 0 : index
    %c0_0 = arith.constant 0 : index
    %c0_1 = arith.constant 0 : index
    %0 = vector.load %arg1[%c0, %c0_0, %c0_1] : memref<1x16x1xi32, #tpu.memory_space<vmem>>, vector<1x16x1xi32>
    %1 = vector.shape_cast %0 : vector<1x16x1xi32> to vector<16x1xi32>
    %2 = tpu.iota {dimensions = array<i32: 1>} : vector<16x128xi32>
    %3 = vector.broadcast %1 : vector<16x1xi32> to vector<16x128xi32>
    %4 = arith.cmpi eq, %2, %3 : vector<16x128xi32>
    %5 = arith.extui %4 : vector<16x128xi1> to vector<16x128xi32>
    %6 = arith.sitofp %5 : vector<16x128xi32> to vector<16x128xf32>
    %7 = arith.truncf %6 : vector<16x128xf32> to vector<16x128xbf16>
    %c0_2 = arith.constant 0 : index
    %c0_3 = arith.constant 0 : index
    %8 = vector.load %arg4[%c0_2, %c0_3] : memref<128x128xbf16, #tpu.memory_space<vmem>>, vector<128x128xbf16>
    %cst = arith.constant dense<0.000000e+00> : vector<16x128xf32>
    %9 = tpu.matmul %7, %8, %cst {dimension_numbers = #tpu.dot_dimension_numbers<[1], [0], [0], [1], [0, 0, 1, 1], [], []>} : vector<16x128xbf16>, vector<128x128xbf16>, vector<16x128xf32> -> vector<16x128xf32>
    %10 = arith.truncf %9 : vector<16x128xf32> to vector<16x128xbf16>
    %c0_4 = arith.constant 0 : index
    %c0_5 = arith.constant 0 : index
    %11 = vector.load %arg5[%c0_4, %c0_5] : memref<128x128xbf16, #tpu.memory_space<vmem>>, vector<128x128xbf16>
    %cst_6 = arith.constant dense<0.000000e+00> : vector<16x128xf32>
    %12 = tpu.matmul %10, %11, %cst_6 {dimension_numbers = #tpu.dot_dimension_numbers<[1], [0], [0], [1], [0, 0, 1, 1], [], []>} : vector<16x128xbf16>, vector<128x128xbf16>, vector<16x128xf32> -> vector<16x128xf32>
    %c0_7 = arith.constant 0 : index
    %c0_8 = arith.constant 0 : index
    %13 = vector.load %arg6[%c0_7, %c0_8] : memref<1x128xf32, #tpu.memory_space<vmem>>, vector<1x128xf32>
    %14 = vector.broadcast %13 : vector<1x128xf32> to vector<16x128xf32>
    %15 = arith.addf %12, %14 : vector<16x128xf32>
    %16 = math.tanh %15 : vector<16x128xf32>
    %17 = arith.truncf %16 : vector<16x128xf32> to vector<16x128xbf16>
    %c0_9 = arith.constant 0 : index
    %c0_10 = arith.constant 0 : index
    %18 = vector.load %arg7[%c0_9, %c0_10] : memref<128x128xbf16, #tpu.memory_space<vmem>>, vector<128x128xbf16>
    %cst_11 = arith.constant dense<0.000000e+00> : vector<16x128xf32>
    %19 = tpu.matmul %17, %18, %cst_11 {dimension_numbers = #tpu.dot_dimension_numbers<[1], [0], [0], [1], [0, 0, 1, 1], [], []>} : vector<16x128xbf16>, vector<128x128xbf16>, vector<16x128xf32> -> vector<16x128xf32>
    %c0_12 = arith.constant 0 : index
    %c0_13 = arith.constant 0 : index
    %20 = vector.load %arg8[%c0_12, %c0_13] : memref<1x128xf32, #tpu.memory_space<vmem>>, vector<1x128xf32>
    %21 = vector.broadcast %20 : vector<1x128xf32> to vector<16x128xf32>
    %22 = arith.addf %19, %21 : vector<16x128xf32>
    %c0_14 = arith.constant 0 : index
    %c0_15 = arith.constant 0 : index
    %c0_16 = arith.constant 0 : index
    %23 = vector.load %arg22[%c0_14, %c0_15, %c0_16] : memref<1x16x128xf32, #tpu.memory_space<vmem>>, vector<1x16x128xf32>
    %24 = vector.shape_cast %23 : vector<1x16x128xf32> to vector<16x128xf32>
    %25 = vector.shape_cast %22 : vector<16x128xf32> to vector<1x16x128xf32>
    tpu.vector_store %arg22[%c0_14, %c0_15, %c0_16], %25 {strides = array<i32>} : memref<1x16x128xf32, #tpu.memory_space<vmem>>, vector<1x16x128xf32>,
    %c0_17 = arith.constant 0 : index
    %c0_18 = arith.constant 0 : index
    %c0_19 = arith.constant 0 : index
    %26 = vector.load %arg2[%c0_17, %c0_18, %c0_19] : memref<1x16x1xi32, #tpu.memory_space<vmem>>, vector<1x16x1xi32>
    %27 = vector.shape_cast %26 : vector<1x16x1xi32> to vector<16x1xi32>
    %28 = tpu.iota {dimensions = array<i32: 1>} : vector<16x128xi32>
    %c5_i32 = arith.constant 5 : i32
    %29 = vector.broadcast %c5_i32 : i32 to vector<16x128xi32>
    %30 = arith.cmpi slt, %28, %29 : vector<16x128xi32>
    %cst_20 = arith.constant -1.000000e+30 : f32
    %31 = vector.broadcast %cst_20 : f32 to vector<16x128xf32>
    %32 = arith.select %30, %22, %31 : vector<16x128xi1>, vector<16x128xf32>
    %cst_21 = arith.constant dense<0xFF800000> : vector<16xf32>
    %33 = vector.multi_reduction <maximumf>, %32, %cst_21 [1] : vector<16x128xf32> to vector<16xf32>
    %34 = vector.shape_cast %33 : vector<16xf32> to vector<16x1xf32>
    %35 = vector.broadcast %34 : vector<16x1xf32> to vector<16x128xf32>
    %36 = arith.subf %32, %35 : vector<16x128xf32>
    %37 = math.exp %36 : vector<16x128xf32>
    %cst_22 = arith.constant dense<0.000000e+00> : vector<16xf32>
    %38 = vector.multi_reduction <add>, %37, %cst_22 [1] : vector<16x128xf32> to vector<16xf32>
    %39 = vector.shape_cast %38 : vector<16xf32> to vector<16x1xf32>
    %40 = math.log %39 : vector<16x1xf32>
    %41 = arith.addf %34, %40 : vector<16x1xf32>
    %42 = vector.broadcast %27 : vector<16x1xi32> to vector<16x128xi32>
    %43 = arith.cmpi eq, %28, %42 : vector<16x128xi32>
    %cst_23 = arith.constant 0.000000e+00 : f32
    %44 = vector.broadcast %cst_23 : f32 to vector<16x128xf32>
    %45 = arith.select %43, %22, %44 : vector<16x128xi1>, vector<16x128xf32>
    %cst_24 = arith.constant dense<0.000000e+00> : vector<16xf32>
    %46 = vector.multi_reduction <add>, %45, %cst_24 [1] : vector<16x128xf32> to vector<16xf32>
    %47 = vector.shape_cast %46 : vector<16xf32> to vector<16x1xf32>
    %c-100_i32 = arith.constant -100 : i32
    %48 = vector.broadcast %c-100_i32 : i32 to vector<16x1xi32>
    %49 = arith.cmpi ne, %27, %48 : vector<16x1xi32>
    %50 = arith.extui %49 : vector<16x1xi1> to vector<16x1xi32>
    %51 = arith.sitofp %50 : vector<16x1xi32> to vector<16x1xf32>
    %52 = arith.subf %41, %47 : vector<16x1xf32>
    %53 = arith.mulf %52, %51 : vector<16x1xf32>
    %cst_25 = arith.constant dense<0.000000e+00> : vector<1xf32>
    %54 = vector.multi_reduction <add>, %53, %cst_25 [0] : vector<16x1xf32> to vector<1xf32>
    %55 = vector.shape_cast %54 : vector<1xf32> to vector<1x1xf32>
    %cst_26 = arith.constant dense<0.000000e+00> : vector<1xf32>
    %56 = vector.multi_reduction <add>, %51, %cst_26 [0] : vector<16x1xf32> to vector<1xf32>
    %57 = vector.shape_cast %56 : vector<1xf32> to vector<1x1xf32>
    %58 = tpu.iota {dimensions = array<i32: 1>} : vector<1x128xi32>
    %c0_i32 = arith.constant 0 : i32
    %59 = vector.broadcast %c0_i32 : i32 to vector<1x128xi32>
    %60 = arith.cmpi eq, %58, %59 : vector<1x128xi32>
    %c1_i32 = arith.constant 1 : i32
    %61 = vector.broadcast %c1_i32 : i32 to vector<1x128xi32>
    %62 = arith.cmpi eq, %58, %61 : vector<1x128xi32>
    %cst_27 = arith.constant 0.000000e+00 : f32
    %63 = vector.shape_cast %57 : vector<1x1xf32> to vector<1x1xf32>
    %64 = vector.broadcast %63 : vector<1x1xf32> to vector<1x128xf32>
    %65 = vector.broadcast %cst_27 : f32 to vector<1x128xf32>
    %66 = arith.select %62, %64, %65 : vector<1x128xi1>, vector<1x128xf32>
    %67 = vector.shape_cast %55 : vector<1x1xf32> to vector<1x1xf32>
    %68 = vector.broadcast %67 : vector<1x1xf32> to vector<1x128xf32>
    %69 = arith.select %60, %68, %66 : vector<1x128xi1>, vector<1x128xf32>
    %c0_28 = arith.constant 0 : index
    %c0_29 = arith.constant 0 : index
    %c0_30 = arith.constant 0 : index
    %70 = vector.load %arg25[%c0_28, %c0_29, %c0_30] : memref<1x1x128xf32, #tpu.memory_space<vmem>>, vector<1x1x128xf32>
    %71 = vector.shape_cast %70 : vector<1x1x128xf32> to vector<1x128xf32>
    %72 = vector.shape_cast %69 : vector<1x128xf32> to vector<1x1x128xf32>
    tpu.vector_store %arg25[%c0_28, %c0_29, %c0_30], %72 {strides = array<i32>} : memref<1x1x128xf32, #tpu.memory_space<vmem>>, vector<1x1x128xf32>,
    %c0_31 = arith.constant 0 : index
    %c0_32 = arith.constant 0 : index
    %c0_33 = arith.constant 0 : index
    %73 = vector.load %arg9[%c0_31, %c0_32, %c0_33] : memref<1x32x128xf32, #tpu.memory_space<vmem>>, vector<1x32x128xf32>
    %74 = vector.shape_cast %73 : vector<1x32x128xf32> to vector<32x128xf32>
    %75 = arith.truncf %74 : vector<32x128xf32> to vector<32x128xbf16>
    %c0_34 = arith.constant 0 : index
    %c0_35 = arith.constant 0 : index
    %76 = vector.load %arg10[%c0_34, %c0_35] : memref<128x128xbf16, #tpu.memory_space<vmem>>, vector<128x128xbf16>
    %cst_36 = arith.constant dense<0.000000e+00> : vector<32x128xf32>
    %77 = tpu.matmul %75, %76, %cst_36 {dimension_numbers = #tpu.dot_dimension_numbers<[1], [0], [0], [1], [0, 0, 1, 1], [], []>} : vector<32x128xbf16>, vector<128x128xbf16>, vector<32x128xf32> -> vector<32x128xf32>
    %c0_37 = arith.constant 0 : index
    %c0_38 = arith.constant 0 : index
    %78 = vector.load %arg11[%c0_37, %c0_38] : memref<1x128xf32, #tpu.memory_space<vmem>>, vector<1x128xf32>
    %79 = vector.broadcast %78 : vector<1x128xf32> to vector<32x128xf32>
    %80 = arith.addf %77, %79 : vector<32x128xf32>
    %c0_39 = arith.constant 0 : index
    %c0_40 = arith.constant 0 : index
    %81 = vector.load %arg12[%c0_39, %c0_40] : memref<32x128xf32, #tpu.memory_space<vmem>>, vector<32x128xf32>
    %82 = arith.addf %80, %81 : vector<32x128xf32>
    %83 = arith.truncf %82 : vector<32x128xf32> to vector<32x128xbf16>
    %c0_41 = arith.constant 0 : index
    %c0_42 = arith.constant 0 : index
    %84 = vector.load %arg13[%c0_41, %c0_42] : memref<128x128xbf16, #tpu.memory_space<vmem>>, vector<128x128xbf16>
    %cst_43 = arith.constant dense<0.000000e+00> : vector<32x128xf32>
    %85 = tpu.matmul %83, %84, %cst_43 {dimension_numbers = #tpu.dot_dimension_numbers<[1], [0], [0], [1], [0, 0, 1, 1], [], []>} : vector<32x128xbf16>, vector<128x128xbf16>, vector<32x128xf32> -> vector<32x128xf32>
    %c0_44 = arith.constant 0 : index
    %c0_45 = arith.constant 0 : index
    %86 = vector.load %arg14[%c0_44, %c0_45] : memref<1x128xf32, #tpu.memory_space<vmem>>, vector<1x128xf32>
    %87 = vector.broadcast %86 : vector<1x128xf32> to vector<32x128xf32>
    %88 = arith.addf %85, %87 : vector<32x128xf32>
    %89 = math.tanh %88 : vector<32x128xf32>
    %90 = arith.truncf %16 : vector<16x128xf32> to vector<16x128xbf16>
    %c0_46 = arith.constant 0 : index
    %c0_47 = arith.constant 0 : index
    %91 = vector.load %arg15[%c0_46, %c0_47] : memref<128x1024xbf16, #tpu.memory_space<vmem>>, vector<128x1024xbf16>
    %cst_48 = arith.constant dense<0.000000e+00> : vector<16x1024xf32>
    %92 = tpu.matmul %90, %91, %cst_48 {dimension_numbers = #tpu.dot_dimension_numbers<[1], [0], [0], [1], [0, 0, 1, 1], [], []>} : vector<16x128xbf16>, vector<128x1024xbf16>, vector<16x1024xf32> -> vector<16x1024xf32>
    %93 = arith.truncf %92 : vector<16x1024xf32> to vector<16x1024xbf16>
    %c0_49 = arith.constant 0 : index
    %c0_50 = arith.constant 0 : index
    %94 = vector.load %arg26[%c0_49, %c0_50] : memref<16x1024xbf16, #tpu.memory_space<vmem>>, vector<16x1024xbf16>
    tpu.vector_store %arg26[%c0_49, %c0_50], %93 {strides = array<i32>} : memref<16x1024xbf16, #tpu.memory_space<vmem>>, vector<16x1024xbf16>,
    %95 = arith.truncf %89 : vector<32x128xf32> to vector<32x128xbf16>
    %c0_51 = arith.constant 0 : index
    %c0_52 = arith.constant 0 : index
    %96 = vector.load %arg16[%c0_51, %c0_52] : memref<128x2048xbf16, #tpu.memory_space<vmem>>, vector<128x2048xbf16>
    %cst_53 = arith.constant dense<0.000000e+00> : vector<32x2048xf32>
    %97 = tpu.matmul %95, %96, %cst_53 {dimension_numbers = #tpu.dot_dimension_numbers<[1], [0], [0], [1], [0, 0, 1, 1], [], []>} : vector<32x128xbf16>, vector<128x2048xbf16>, vector<32x2048xf32> -> vector<32x2048xf32>
    %98 = arith.truncf %97 : vector<32x2048xf32> to vector<32x2048xbf16>
    %c0_54 = arith.constant 0 : index
    %c0_55 = arith.constant 0 : index
    %99 = vector.load %arg27[%c0_54, %c0_55] : memref<32x2048xbf16, #tpu.memory_space<vmem>>, vector<32x2048xbf16>
    tpu.vector_store %arg27[%c0_54, %c0_55], %98 {strides = array<i32>} : memref<32x2048xbf16, #tpu.memory_space<vmem>>, vector<32x2048xbf16>,
    %100 = tpu.iota {dimensions = array<i32: 1>} : vector<16x32xi32>
    %c17_i32 = arith.constant 17 : i32
    %101 = vector.broadcast %c17_i32 : i32 to vector<16x32xi32>
    %102 = arith.cmpi slt, %100, %101 : vector<16x32xi32>
    %c0_56 = arith.constant 0 : index
    %c0_57 = arith.constant 0 : index
    %103 = vector.load %arg26[%c0_56, %c0_57] : memref<16x1024xbf16, #tpu.memory_space<vmem>>, vector<16x128xbf16>
    %c0_58 = arith.constant 0 : index
    %c0_59 = arith.constant 0 : index
    %104 = vector.load %arg27[%c0_58, %c0_59] : memref<32x2048xbf16, #tpu.memory_space<vmem>>, vector<32x128xbf16>
    %c0_60 = arith.constant 0 : index
    %c1024 = arith.constant 1024 : index
    %105 = vector.load %arg27[%c0_60, %c1024] : memref<32x2048xbf16, #tpu.memory_space<vmem>>, vector<32x128xbf16>
    %cst_61 = arith.constant dense<0.000000e+00> : vector<16x32xf32>
    %106 = tpu.matmul %103, %104, %cst_61 {dimension_numbers = #tpu.dot_dimension_numbers<[1], [1], [0], [0], [0, 0, 1, 0], [], []>} : vector<16x128xbf16>, vector<32x128xbf16>, vector<16x32xf32> -> vector<16x32xf32>
    %cst_62 = arith.constant 0.0883883461 : f32
    %107 = vector.broadcast %cst_62 : f32 to vector<16x32xf32>
    %108 = arith.mulf %106, %107 : vector<16x32xf32>
    %cst_63 = arith.constant -1.000000e+30 : f32
    %109 = vector.broadcast %cst_63 : f32 to vector<16x32xf32>
    %110 = arith.select %102, %108, %109 : vector<16x32xi1>, vector<16x32xf32>
    %cst_64 = arith.constant dense<0xFF800000> : vector<16xf32>
    %111 = vector.multi_reduction <maximumf>, %110, %cst_64 [1] : vector<16x32xf32> to vector<16xf32>
    %112 = vector.shape_cast %111 : vector<16xf32> to vector<16x1xf32>
    %113 = vector.broadcast %112 : vector<16x1xf32> to vector<16x32xf32>
    %114 = arith.subf %110, %113 : vector<16x32xf32>
    %115 = math.exp %114 : vector<16x32xf32>
    %cst_65 = arith.constant dense<0.000000e+00> : vector<16xf32>
    %116 = vector.multi_reduction <add>, %115, %cst_65 [1] : vector<16x32xf32> to vector<16xf32>
    %117 = vector.shape_cast %116 : vector<16xf32> to vector<16x1xf32>
    %118 = tpu.reciprocal %117 {approx = true} : vector<16x1xf32> -> vector<16x1xf32>
    %119 = vector.broadcast %118 : vector<16x1xf32> to vector<16x32xf32>
    %120 = arith.mulf %115, %119 : vector<16x32xf32>
    %121 = arith.truncf %120 : vector<16x32xf32> to vector<16x32xbf16>
    %cst_66 = arith.constant dense<0.000000e+00> : vector<16x128xf32>
    %122 = tpu.matmul %121, %105, %cst_66 {dimension_numbers = #tpu.dot_dimension_numbers<[1], [0], [0], [1], [0, 0, 1, 1], [], []>} : vector<16x32xbf16>, vector<32x128xbf16>, vector<16x128xf32> -> vector<16x128xf32>
    %123 = arith.truncf %122 : vector<16x128xf32> to vector<16x128xbf16>
    %c0_67 = arith.constant 0 : index
    %c0_68 = arith.constant 0 : index
    %124 = vector.load %arg28[%c0_67, %c0_68] : memref<16x1024xbf16, #tpu.memory_space<vmem>>, vector<16x128xbf16>
    tpu.vector_store %arg28[%c0_67, %c0_68], %123 {strides = array<i32>} : memref<16x1024xbf16, #tpu.memory_space<vmem>>, vector<16x128xbf16>,
    %c0_69 = arith.constant 0 : index
    %c128 = arith.constant 128 : index
    %125 = vector.load %arg26[%c0_69, %c128] : memref<16x1024xbf16, #tpu.memory_space<vmem>>, vector<16x128xbf16>
    %c0_70 = arith.constant 0 : index
    %c128_71 = arith.constant 128 : index
    %126 = vector.load %arg27[%c0_70, %c128_71] : memref<32x2048xbf16, #tpu.memory_space<vmem>>, vector<32x128xbf16>
    %c0_72 = arith.constant 0 : index
    %c1152 = arith.constant 1152 : index
    %127 = vector.load %arg27[%c0_72, %c1152] : memref<32x2048xbf16, #tpu.memory_space<vmem>>, vector<32x128xbf16>
    %cst_73 = arith.constant dense<0.000000e+00> : vector<16x32xf32>
    %128 = tpu.matmul %125, %126, %cst_73 {dimension_numbers = #tpu.dot_dimension_numbers<[1], [1], [0], [0], [0, 0, 1, 0], [], []>} : vector<16x128xbf16>, vector<32x128xbf16>, vector<16x32xf32> -> vector<16x32xf32>
    %cst_74 = arith.constant 0.0883883461 : f32
    %129 = vector.broadcast %cst_74 : f32 to vector<16x32xf32>
    %130 = arith.mulf %128, %129 : vector<16x32xf32>
    %cst_75 = arith.constant -1.000000e+30 : f32
    %131 = vector.broadcast %cst_75 : f32 to vector<16x32xf32>
    %132 = arith.select %102, %130, %131 : vector<16x32xi1>, vector<16x32xf32>
    %cst_76 = arith.constant dense<0xFF800000> : vector<16xf32>
    %133 = vector.multi_reduction <maximumf>, %132, %cst_76 [1] : vector<16x32xf32> to vector<16xf32>
    %134 = vector.shape_cast %133 : vector<16xf32> to vector<16x1xf32>
    %135 = vector.broadcast %134 : vector<16x1xf32> to vector<16x32xf32>
    %136 = arith.subf %132, %135 : vector<16x32xf32>
    %137 = math.exp %136 : vector<16x32xf32>
    %cst_77 = arith.constant dense<0.000000e+00> : vector<16xf32>
    %138 = vector.multi_reduction <add>, %137, %cst_77 [1] : vector<16x32xf32> to vector<16xf32>
    %139 = vector.shape_cast %138 : vector<16xf32> to vector<16x1xf32>
    %140 = tpu.reciprocal %139 {approx = true} : vector<16x1xf32> -> vector<16x1xf32>
    %141 = vector.broadcast %140 : vector<16x1xf32> to vector<16x32xf32>
    %142 = arith.mulf %137, %141 : vector<16x32xf32>
    %143 = arith.truncf %142 : vector<16x32xf32> to vector<16x32xbf16>
    %cst_78 = arith.constant dense<0.000000e+00> : vector<16x128xf32>
    %144 = tpu.matmul %143, %127, %cst_78 {dimension_numbers = #tpu.dot_dimension_numbers<[1], [0], [0], [1], [0, 0, 1, 1], [], []>} : vector<16x32xbf16>, vector<32x128xbf16>, vector<16x128xf32> -> vector<16x128xf32>
    %145 = arith.truncf %144 : vector<16x128xf32> to vector<16x128xbf16>
    %c0_79 = arith.constant 0 : index
    %c128_80 = arith.constant 128 : index
    %146 = vector.load %arg28[%c0_79, %c128_80] : memref<16x1024xbf16, #tpu.memory_space<vmem>>, vector<16x128xbf16>
    tpu.vector_store %arg28[%c0_79, %c128_80], %145 {strides = array<i32>} : memref<16x1024xbf16, #tpu.memory_space<vmem>>, vector<16x128xbf16>,
    %c0_81 = arith.constant 0 : index
    %c256 = arith.constant 256 : index
    %147 = vector.load %arg26[%c0_81, %c256] : memref<16x1024xbf16, #tpu.memory_space<vmem>>, vector<16x128xbf16>
    %c0_82 = arith.constant 0 : index
    %c256_83 = arith.constant 256 : index
    %148 = vector.load %arg27[%c0_82, %c256_83] : memref<32x2048xbf16, #tpu.memory_space<vmem>>, vector<32x128xbf16>
    %c0_84 = arith.constant 0 : index
    %c1280 = arith.constant 1280 : index
    %149 = vector.load %arg27[%c0_84, %c1280] : memref<32x2048xbf16, #tpu.memory_space<vmem>>, vector<32x128xbf16>
    %cst_85 = arith.constant dense<0.000000e+00> : vector<16x32xf32>
    %150 = tpu.matmul %147, %148, %cst_85 {dimension_numbers = #tpu.dot_dimension_numbers<[1], [1], [0], [0], [0, 0, 1, 0], [], []>} : vector<16x128xbf16>, vector<32x128xbf16>, vector<16x32xf32> -> vector<16x32xf32>
    %cst_86 = arith.constant 0.0883883461 : f32
    %151 = vector.broadcast %cst_86 : f32 to vector<16x32xf32>
    %152 = arith.mulf %150, %151 : vector<16x32xf32>
    %cst_87 = arith.constant -1.000000e+30 : f32
    %153 = vector.broadcast %cst_87 : f32 to vector<16x32xf32>
    %154 = arith.select %102, %152, %153 : vector<16x32xi1>, vector<16x32xf32>
    %cst_88 = arith.constant dense<0xFF800000> : vector<16xf32>
    %155 = vector.multi_reduction <maximumf>, %154, %cst_88 [1] : vector<16x32xf32> to vector<16xf32>
    %156 = vector.shape_cast %155 : vector<16xf32> to vector<16x1xf32>
    %157 = vector.broadcast %156 : vector<16x1xf32> to vector<16x32xf32>
    %158 = arith.subf %154, %157 : vector<16x32xf32>
    %159 = math.exp %158 : vector<16x32xf32>
    %cst_89 = arith.constant dense<0.000000e+00> : vector<16xf32>
    %160 = vector.multi_reduction <add>, %159, %cst_89 [1] : vector<16x32xf32> to vector<16xf32>
    %161 = vector.shape_cast %160 : vector<16xf32> to vector<16x1xf32>
    %162 = tpu.reciprocal %161 {approx = true} : vector<16x1xf32> -> vector<16x1xf32>
    %163 = vector.broadcast %162 : vector<16x1xf32> to vector<16x32xf32>
    %164 = arith.mulf %159, %163 : vector<16x32xf32>
    %165 = arith.truncf %164 : vector<16x32xf32> to vector<16x32xbf16>
    %cst_90 = arith.constant dense<0.000000e+00> : vector<16x128xf32>
    %166 = tpu.matmul %165, %149, %cst_90 {dimension_numbers = #tpu.dot_dimension_numbers<[1], [0], [0], [1], [0, 0, 1, 1], [], []>} : vector<16x32xbf16>, vector<32x128xbf16>, vector<16x128xf32> -> vector<16x128xf32>
    %167 = arith.truncf %166 : vector<16x128xf32> to vector<16x128xbf16>
    %c0_91 = arith.constant 0 : index
    %c256_92 = arith.constant 256 : index
    %168 = vector.load %arg28[%c0_91, %c256_92] : memref<16x1024xbf16, #tpu.memory_space<vmem>>, vector<16x128xbf16>
    tpu.vector_store %arg28[%c0_91, %c256_92], %167 {strides = array<i32>} : memref<16x1024xbf16, #tpu.memory_space<vmem>>, vector<16x128xbf16>,
    %c0_93 = arith.constant 0 : index
    %c384 = arith.constant 384 : index
    %169 = vector.load %arg26[%c0_93, %c384] : memref<16x1024xbf16, #tpu.memory_space<vmem>>, vector<16x128xbf16>
    %c0_94 = arith.constant 0 : index
    %c384_95 = arith.constant 384 : index
    %170 = vector.load %arg27[%c0_94, %c384_95] : memref<32x2048xbf16, #tpu.memory_space<vmem>>, vector<32x128xbf16>
    %c0_96 = arith.constant 0 : index
    %c1408 = arith.constant 1408 : index
    %171 = vector.load %arg27[%c0_96, %c1408] : memref<32x2048xbf16, #tpu.memory_space<vmem>>, vector<32x128xbf16>
    %cst_97 = arith.constant dense<0.000000e+00> : vector<16x32xf32>
    %172 = tpu.matmul %169, %170, %cst_97 {dimension_numbers = #tpu.dot_dimension_numbers<[1], [1], [0], [0], [0, 0, 1, 0], [], []>} : vector<16x128xbf16>, vector<32x128xbf16>, vector<16x32xf32> -> vector<16x32xf32>
    %cst_98 = arith.constant 0.0883883461 : f32
    %173 = vector.broadcast %cst_98 : f32 to vector<16x32xf32>
    %174 = arith.mulf %172, %173 : vector<16x32xf32>
    %cst_99 = arith.constant -1.000000e+30 : f32
    %175 = vector.broadcast %cst_99 : f32 to vector<16x32xf32>
    %176 = arith.select %102, %174, %175 : vector<16x32xi1>, vector<16x32xf32>
    %cst_100 = arith.constant dense<0xFF800000> : vector<16xf32>
    %177 = vector.multi_reduction <maximumf>, %176, %cst_100 [1] : vector<16x32xf32> to vector<16xf32>
    %178 = vector.shape_cast %177 : vector<16xf32> to vector<16x1xf32>
    %179 = vector.broadcast %178 : vector<16x1xf32> to vector<16x32xf32>
    %180 = arith.subf %176, %179 : vector<16x32xf32>
    %181 = math.exp %180 : vector<16x32xf32>
    %cst_101 = arith.constant dense<0.000000e+00> : vector<16xf32>
    %182 = vector.multi_reduction <add>, %181, %cst_101 [1] : vector<16x32xf32> to vector<16xf32>
    %183 = vector.shape_cast %182 : vector<16xf32> to vector<16x1xf32>
    %184 = tpu.reciprocal %183 {approx = true} : vector<16x1xf32> -> vector<16x1xf32>
    %185 = vector.broadcast %184 : vector<16x1xf32> to vector<16x32xf32>
    %186 = arith.mulf %181, %185 : vector<16x32xf32>
    %187 = arith.truncf %186 : vector<16x32xf32> to vector<16x32xbf16>
    %cst_102 = arith.constant dense<0.000000e+00> : vector<16x128xf32>
    %188 = tpu.matmul %187, %171, %cst_102 {dimension_numbers = #tpu.dot_dimension_numbers<[1], [0], [0], [1], [0, 0, 1, 1], [], []>} : vector<16x32xbf16>, vector<32x128xbf16>, vector<16x128xf32> -> vector<16x128xf32>
    %189 = arith.truncf %188 : vector<16x128xf32> to vector<16x128xbf16>
    %c0_103 = arith.constant 0 : index
    %c384_104 = arith.constant 384 : index
    %190 = vector.load %arg28[%c0_103, %c384_104] : memref<16x1024xbf16, #tpu.memory_space<vmem>>, vector<16x128xbf16>
    tpu.vector_store %arg28[%c0_103, %c384_104], %189 {strides = array<i32>} : memref<16x1024xbf16, #tpu.memory_space<vmem>>, vector<16x128xbf16>,
    %c0_105 = arith.constant 0 : index
    %c512 = arith.constant 512 : index
    %191 = vector.load %arg26[%c0_105, %c512] : memref<16x1024xbf16, #tpu.memory_space<vmem>>, vector<16x128xbf16>
    %c0_106 = arith.constant 0 : index
    %c512_107 = arith.constant 512 : index
    %192 = vector.load %arg27[%c0_106, %c512_107] : memref<32x2048xbf16, #tpu.memory_space<vmem>>, vector<32x128xbf16>
    %c0_108 = arith.constant 0 : index
    %c1536 = arith.constant 1536 : index
    %193 = vector.load %arg27[%c0_108, %c1536] : memref<32x2048xbf16, #tpu.memory_space<vmem>>, vector<32x128xbf16>
    %cst_109 = arith.constant dense<0.000000e+00> : vector<16x32xf32>
    %194 = tpu.matmul %191, %192, %cst_109 {dimension_numbers = #tpu.dot_dimension_numbers<[1], [1], [0], [0], [0, 0, 1, 0], [], []>} : vector<16x128xbf16>, vector<32x128xbf16>, vector<16x32xf32> -> vector<16x32xf32>
    %cst_110 = arith.constant 0.0883883461 : f32
    %195 = vector.broadcast %cst_110 : f32 to vector<16x32xf32>
    %196 = arith.mulf %194, %195 : vector<16x32xf32>
    %cst_111 = arith.constant -1.000000e+30 : f32
    %197 = vector.broadcast %cst_111 : f32 to vector<16x32xf32>
    %198 = arith.select %102, %196, %197 : vector<16x32xi1>, vector<16x32xf32>
    %cst_112 = arith.constant dense<0xFF800000> : vector<16xf32>
    %199 = vector.multi_reduction <maximumf>, %198, %cst_112 [1] : vector<16x32xf32> to vector<16xf32>
    %200 = vector.shape_cast %199 : vector<16xf32> to vector<16x1xf32>
    %201 = vector.broadcast %200 : vector<16x1xf32> to vector<16x32xf32>
    %202 = arith.subf %198, %201 : vector<16x32xf32>
    %203 = math.exp %202 : vector<16x32xf32>
    %cst_113 = arith.constant dense<0.000000e+00> : vector<16xf32>
    %204 = vector.multi_reduction <add>, %203, %cst_113 [1] : vector<16x32xf32> to vector<16xf32>
    %205 = vector.shape_cast %204 : vector<16xf32> to vector<16x1xf32>
    %206 = tpu.reciprocal %205 {approx = true} : vector<16x1xf32> -> vector<16x1xf32>
    %207 = vector.broadcast %206 : vector<16x1xf32> to vector<16x32xf32>
    %208 = arith.mulf %203, %207 : vector<16x32xf32>
    %209 = arith.truncf %208 : vector<16x32xf32> to vector<16x32xbf16>
    %cst_114 = arith.constant dense<0.000000e+00> : vector<16x128xf32>
    %210 = tpu.matmul %209, %193, %cst_114 {dimension_numbers = #tpu.dot_dimension_numbers<[1], [0], [0], [1], [0, 0, 1, 1], [], []>} : vector<16x32xbf16>, vector<32x128xbf16>, vector<16x128xf32> -> vector<16x128xf32>
    %211 = arith.truncf %210 : vector<16x128xf32> to vector<16x128xbf16>
    %c0_115 = arith.constant 0 : index
    %c512_116 = arith.constant 512 : index
    %212 = vector.load %arg28[%c0_115, %c512_116] : memref<16x1024xbf16, #tpu.memory_space<vmem>>, vector<16x128xbf16>
    tpu.vector_store %arg28[%c0_115, %c512_116], %211 {strides = array<i32>} : memref<16x1024xbf16, #tpu.memory_space<vmem>>, vector<16x128xbf16>,
    %c0_117 = arith.constant 0 : index
    %c640 = arith.constant 640 : index
    %213 = vector.load %arg26[%c0_117, %c640] : memref<16x1024xbf16, #tpu.memory_space<vmem>>, vector<16x128xbf16>
    %c0_118 = arith.constant 0 : index
    %c640_119 = arith.constant 640 : index
    %214 = vector.load %arg27[%c0_118, %c640_119] : memref<32x2048xbf16, #tpu.memory_space<vmem>>, vector<32x128xbf16>
    %c0_120 = arith.constant 0 : index
    %c1664 = arith.constant 1664 : index
    %215 = vector.load %arg27[%c0_120, %c1664] : memref<32x2048xbf16, #tpu.memory_space<vmem>>, vector<32x128xbf16>
    %cst_121 = arith.constant dense<0.000000e+00> : vector<16x32xf32>
    %216 = tpu.matmul %213, %214, %cst_121 {dimension_numbers = #tpu.dot_dimension_numbers<[1], [1], [0], [0], [0, 0, 1, 0], [], []>} : vector<16x128xbf16>, vector<32x128xbf16>, vector<16x32xf32> -> vector<16x32xf32>
    %cst_122 = arith.constant 0.0883883461 : f32
    %217 = vector.broadcast %cst_122 : f32 to vector<16x32xf32>
    %218 = arith.mulf %216, %217 : vector<16x32xf32>
    %cst_123 = arith.constant -1.000000e+30 : f32
    %219 = vector.broadcast %cst_123 : f32 to vector<16x32xf32>
    %220 = arith.select %102, %218, %219 : vector<16x32xi1>, vector<16x32xf32>
    %cst_124 = arith.constant dense<0xFF800000> : vector<16xf32>
    %221 = vector.multi_reduction <maximumf>, %220, %cst_124 [1] : vector<16x32xf32> to vector<16xf32>
    %222 = vector.shape_cast %221 : vector<16xf32> to vector<16x1xf32>
    %223 = vector.broadcast %222 : vector<16x1xf32> to vector<16x32xf32>
    %224 = arith.subf %220, %223 : vector<16x32xf32>
    %225 = math.exp %224 : vector<16x32xf32>
    %cst_125 = arith.constant dense<0.000000e+00> : vector<16xf32>
    %226 = vector.multi_reduction <add>, %225, %cst_125 [1] : vector<16x32xf32> to vector<16xf32>
    %227 = vector.shape_cast %226 : vector<16xf32> to vector<16x1xf32>
    %228 = tpu.reciprocal %227 {approx = true} : vector<16x1xf32> -> vector<16x1xf32>
    %229 = vector.broadcast %228 : vector<16x1xf32> to vector<16x32xf32>
    %230 = arith.mulf %225, %229 : vector<16x32xf32>
    %231 = arith.truncf %230 : vector<16x32xf32> to vector<16x32xbf16>
    %cst_126 = arith.constant dense<0.000000e+00> : vector<16x128xf32>
    %232 = tpu.matmul %231, %215, %cst_126 {dimension_numbers = #tpu.dot_dimension_numbers<[1], [0], [0], [1], [0, 0, 1, 1], [], []>} : vector<16x32xbf16>, vector<32x128xbf16>, vector<16x128xf32> -> vector<16x128xf32>
    %233 = arith.truncf %232 : vector<16x128xf32> to vector<16x128xbf16>
    %c0_127 = arith.constant 0 : index
    %c640_128 = arith.constant 640 : index
    %234 = vector.load %arg28[%c0_127, %c640_128] : memref<16x1024xbf16, #tpu.memory_space<vmem>>, vector<16x128xbf16>
    tpu.vector_store %arg28[%c0_127, %c640_128], %233 {strides = array<i32>} : memref<16x1024xbf16, #tpu.memory_space<vmem>>, vector<16x128xbf16>,
    %c0_129 = arith.constant 0 : index
    %c768 = arith.constant 768 : index
    %235 = vector.load %arg26[%c0_129, %c768] : memref<16x1024xbf16, #tpu.memory_space<vmem>>, vector<16x128xbf16>
    %c0_130 = arith.constant 0 : index
    %c768_131 = arith.constant 768 : index
    %236 = vector.load %arg27[%c0_130, %c768_131] : memref<32x2048xbf16, #tpu.memory_space<vmem>>, vector<32x128xbf16>
    %c0_132 = arith.constant 0 : index
    %c1792 = arith.constant 1792 : index
    %237 = vector.load %arg27[%c0_132, %c1792] : memref<32x2048xbf16, #tpu.memory_space<vmem>>, vector<32x128xbf16>
    %cst_133 = arith.constant dense<0.000000e+00> : vector<16x32xf32>
    %238 = tpu.matmul %235, %236, %cst_133 {dimension_numbers = #tpu.dot_dimension_numbers<[1], [1], [0], [0], [0, 0, 1, 0], [], []>} : vector<16x128xbf16>, vector<32x128xbf16>, vector<16x32xf32> -> vector<16x32xf32>
    %cst_134 = arith.constant 0.0883883461 : f32
    %239 = vector.broadcast %cst_134 : f32 to vector<16x32xf32>
    %240 = arith.mulf %238, %239 : vector<16x32xf32>
    %cst_135 = arith.constant -1.000000e+30 : f32
    %241 = vector.broadcast %cst_135 : f32 to vector<16x32xf32>
    %242 = arith.select %102, %240, %241 : vector<16x32xi1>, vector<16x32xf32>
    %cst_136 = arith.constant dense<0xFF800000> : vector<16xf32>
    %243 = vector.multi_reduction <maximumf>, %242, %cst_136 [1] : vector<16x32xf32> to vector<16xf32>
    %244 = vector.shape_cast %243 : vector<16xf32> to vector<16x1xf32>
    %245 = vector.broadcast %244 : vector<16x1xf32> to vector<16x32xf32>
    %246 = arith.subf %242, %245 : vector<16x32xf32>
    %247 = math.exp %246 : vector<16x32xf32>
    %cst_137 = arith.constant dense<0.000000e+00> : vector<16xf32>
    %248 = vector.multi_reduction <add>, %247, %cst_137 [1] : vector<16x32xf32> to vector<16xf32>
    %249 = vector.shape_cast %248 : vector<16xf32> to vector<16x1xf32>
    %250 = tpu.reciprocal %249 {approx = true} : vector<16x1xf32> -> vector<16x1xf32>
    %251 = vector.broadcast %250 : vector<16x1xf32> to vector<16x32xf32>
    %252 = arith.mulf %247, %251 : vector<16x32xf32>
    %253 = arith.truncf %252 : vector<16x32xf32> to vector<16x32xbf16>
    %cst_138 = arith.constant dense<0.000000e+00> : vector<16x128xf32>
    %254 = tpu.matmul %253, %237, %cst_138 {dimension_numbers = #tpu.dot_dimension_numbers<[1], [0], [0], [1], [0, 0, 1, 1], [], []>} : vector<16x32xbf16>, vector<32x128xbf16>, vector<16x128xf32> -> vector<16x128xf32>
    %255 = arith.truncf %254 : vector<16x128xf32> to vector<16x128xbf16>
    %c0_139 = arith.constant 0 : index
    %c768_140 = arith.constant 768 : index
    %256 = vector.load %arg28[%c0_139, %c768_140] : memref<16x1024xbf16, #tpu.memory_space<vmem>>, vector<16x128xbf16>
    tpu.vector_store %arg28[%c0_139, %c768_140], %255 {strides = array<i32>} : memref<16x1024xbf16, #tpu.memory_space<vmem>>, vector<16x128xbf16>,
    %c0_141 = arith.constant 0 : index
    %c896 = arith.constant 896 : index
    %257 = vector.load %arg26[%c0_141, %c896] : memref<16x1024xbf16, #tpu.memory_space<vmem>>, vector<16x128xbf16>
    %c0_142 = arith.constant 0 : index
    %c896_143 = arith.constant 896 : index
    %258 = vector.load %arg27[%c0_142, %c896_143] : memref<32x2048xbf16, #tpu.memory_space<vmem>>, vector<32x128xbf16>
    %c0_144 = arith.constant 0 : index
    %c1920 = arith.constant 1920 : index
    %259 = vector.load %arg27[%c0_144, %c1920] : memref<32x2048xbf16, #tpu.memory_space<vmem>>, vector<32x128xbf16>
    %cst_145 = arith.constant dense<0.000000e+00> : vector<16x32xf32>
    %260 = tpu.matmul %257, %258, %cst_145 {dimension_numbers = #tpu.dot_dimension_numbers<[1], [1], [0], [0], [0, 0, 1, 0], [], []>} : vector<16x128xbf16>, vector<32x128xbf16>, vector<16x32xf32> -> vector<16x32xf32>
    %cst_146 = arith.constant 0.0883883461 : f32
    %261 = vector.broadcast %cst_146 : f32 to vector<16x32xf32>
    %262 = arith.mulf %260, %261 : vector<16x32xf32>
    %cst_147 = arith.constant -1.000000e+30 : f32
    %263 = vector.broadcast %cst_147 : f32 to vector<16x32xf32>
    %264 = arith.select %102, %262, %263 : vector<16x32xi1>, vector<16x32xf32>
    %cst_148 = arith.constant dense<0xFF800000> : vector<16xf32>
    %265 = vector.multi_reduction <maximumf>, %264, %cst_148 [1] : vector<16x32xf32> to vector<16xf32>
    %266 = vector.shape_cast %265 : vector<16xf32> to vector<16x1xf32>
    %267 = vector.broadcast %266 : vector<16x1xf32> to vector<16x32xf32>
    %268 = arith.subf %264, %267 : vector<16x32xf32>
    %269 = math.exp %268 : vector<16x32xf32>
    %cst_149 = arith.constant dense<0.000000e+00> : vector<16xf32>
    %270 = vector.multi_reduction <add>, %269, %cst_149 [1] : vector<16x32xf32> to vector<16xf32>
    %271 = vector.shape_cast %270 : vector<16xf32> to vector<16x1xf32>
    %272 = tpu.reciprocal %271 {approx = true} : vector<16x1xf32> -> vector<16x1xf32>
    %273 = vector.broadcast %272 : vector<16x1xf32> to vector<16x32xf32>
    %274 = arith.mulf %269, %273 : vector<16x32xf32>
    %275 = arith.truncf %274 : vector<16x32xf32> to vector<16x32xbf16>
    %cst_150 = arith.constant dense<0.000000e+00> : vector<16x128xf32>
    %276 = tpu.matmul %275, %259, %cst_150 {dimension_numbers = #tpu.dot_dimension_numbers<[1], [0], [0], [1], [0, 0, 1, 1], [], []>} : vector<16x32xbf16>, vector<32x128xbf16>, vector<16x128xf32> -> vector<16x128xf32>
    %277 = arith.truncf %276 : vector<16x128xf32> to vector<16x128xbf16>
    %c0_151 = arith.constant 0 : index
    %c896_152 = arith.constant 896 : index
    %278 = vector.load %arg28[%c0_151, %c896_152] : memref<16x1024xbf16, #tpu.memory_space<vmem>>, vector<16x128xbf16>
    tpu.vector_store %arg28[%c0_151, %c896_152], %277 {strides = array<i32>} : memref<16x1024xbf16, #tpu.memory_space<vmem>>, vector<16x128xbf16>,
    %c0_153 = arith.constant 0 : index
    %c0_154 = arith.constant 0 : index
    %279 = vector.load %arg28[%c0_153, %c0_154] : memref<16x1024xbf16, #tpu.memory_space<vmem>>, vector<16x1024xbf16>
    %c0_155 = arith.constant 0 : index
    %c0_156 = arith.constant 0 : index
    %280 = vector.load %arg17[%c0_155, %c0_156] : memref<1024x128xbf16, #tpu.memory_space<vmem>>, vector<1024x128xbf16>
    %cst_157 = arith.constant dense<0.000000e+00> : vector<16x128xf32>
    %281 = tpu.matmul %279, %280, %cst_157 {dimension_numbers = #tpu.dot_dimension_numbers<[1], [0], [0], [1], [0, 0, 1, 1], [], []>} : vector<16x1024xbf16>, vector<1024x128xbf16>, vector<16x128xf32> -> vector<16x128xf32>
    %282 = arith.addf %281, %16 : vector<16x128xf32>
    %cst_158 = arith.constant dense<0.000000e+00> : vector<16xf32>
    %283 = vector.multi_reduction <add>, %282, %cst_158 [1] : vector<16x128xf32> to vector<16xf32>
    %284 = vector.shape_cast %283 : vector<16xf32> to vector<16x1xf32>
    %cst_159 = arith.constant 1.280000e+02 : f32
    %285 = vector.broadcast %cst_159 : f32 to vector<16x1xf32>
    %286 = arith.divf %284, %285 : vector<16x1xf32>
    %287 = vector.broadcast %286 : vector<16x1xf32> to vector<16x128xf32>
    %288 = arith.subf %282, %287 : vector<16x128xf32>
    %289 = arith.mulf %288, %288 : vector<16x128xf32>
    %cst_160 = arith.constant dense<0.000000e+00> : vector<16xf32>
    %290 = vector.multi_reduction <add>, %289, %cst_160 [1] : vector<16x128xf32> to vector<16xf32>
    %291 = vector.shape_cast %290 : vector<16xf32> to vector<16x1xf32>
    %cst_161 = arith.constant 1.280000e+02 : f32
    %292 = vector.broadcast %cst_161 : f32 to vector<16x1xf32>
    %293 = arith.divf %291, %292 : vector<16x1xf32>
    %294 = vector.broadcast %286 : vector<16x1xf32> to vector<16x128xf32>
    %295 = arith.subf %282, %294 : vector<16x128xf32>
    %cst_162 = arith.constant 9.99999997E-7 : f32
    %296 = vector.broadcast %cst_162 : f32 to vector<16x1xf32>
    %297 = arith.addf %293, %296 : vector<16x1xf32>
    %298 = math.rsqrt %297 : vector<16x1xf32>
    %299 = vector.broadcast %298 : vector<16x1xf32> to vector<16x128xf32>
    %300 = arith.mulf %295, %299 : vector<16x128xf32>
    %c0_163 = arith.constant 0 : index
    %c0_164 = arith.constant 0 : index
    %301 = vector.load %arg18[%c0_163, %c0_164] : memref<1x128xf32, #tpu.memory_space<vmem>>, vector<1x128xf32>
    %302 = vector.broadcast %301 : vector<1x128xf32> to vector<16x128xf32>
    %303 = arith.mulf %300, %302 : vector<16x128xf32>
    %c0_165 = arith.constant 0 : index
    %c0_166 = arith.constant 0 : index
    %304 = vector.load %arg19[%c0_165, %c0_166] : memref<1x128xf32, #tpu.memory_space<vmem>>, vector<1x128xf32>
    %305 = vector.broadcast %304 : vector<1x128xf32> to vector<16x128xf32>
    %306 = arith.addf %303, %305 : vector<16x128xf32>
    %307 = arith.truncf %306 : vector<16x128xf32> to vector<16x128xbf16>
    %c0_167 = arith.constant 0 : index
    %c0_168 = arith.constant 0 : index
    %308 = vector.load %arg20[%c0_167, %c0_168] : memref<128x128xbf16, #tpu.memory_space<vmem>>, vector<128x128xbf16>
    %cst_169 = arith.constant dense<0.000000e+00> : vector<16x128xf32>
    %309 = tpu.matmul %307, %308, %cst_169 {dimension_numbers = #tpu.dot_dimension_numbers<[1], [0], [0], [1], [0, 0, 1, 1], [], []>} : vector<16x128xbf16>, vector<128x128xbf16>, vector<16x128xf32> -> vector<16x128xf32>
    %c0_170 = arith.constant 0 : index
    %c0_171 = arith.constant 0 : index
    %310 = vector.load %arg21[%c0_170, %c0_171] : memref<1x128xf32, #tpu.memory_space<vmem>>, vector<1x128xf32>
    %311 = vector.broadcast %310 : vector<1x128xf32> to vector<16x128xf32>
    %312 = arith.addf %309, %311 : vector<16x128xf32>
    %c0_172 = arith.constant 0 : index
    %c0_173 = arith.constant 0 : index
    %c0_174 = arith.constant 0 : index
    %313 = vector.load %arg23[%c0_172, %c0_173, %c0_174] : memref<1x16x128xf32, #tpu.memory_space<vmem>>, vector<1x16x128xf32>
    %314 = vector.shape_cast %313 : vector<1x16x128xf32> to vector<16x128xf32>
    %315 = vector.shape_cast %312 : vector<16x128xf32> to vector<1x16x128xf32>
    tpu.vector_store %arg23[%c0_172, %c0_173, %c0_174], %315 {strides = array<i32>} : memref<1x16x128xf32, #tpu.memory_space<vmem>>, vector<1x16x128xf32>,
    %316 = arith.mulf %16, %16 : vector<16x128xf32>
    %cst_175 = arith.constant dense<0.000000e+00> : vector<16xf32>
    %317 = vector.multi_reduction <add>, %316, %cst_175 [1] : vector<16x128xf32> to vector<16xf32>
    %318 = vector.shape_cast %317 : vector<16xf32> to vector<16x1xf32>
    %319 = math.rsqrt %318 : vector<16x1xf32>
    %cst_176 = arith.constant 1.000000e+05 : f32
    %320 = vector.broadcast %cst_176 : f32 to vector<16x1xf32>
    %321 = arith.minimumf %319, %320 : vector<16x1xf32>
    %322 = vector.broadcast %321 : vector<16x1xf32> to vector<16x128xf32>
    %323 = arith.mulf %16, %322 : vector<16x128xf32>
    %324 = arith.truncf %323 : vector<16x128xf32> to vector<16x128xbf16>
    %325 = arith.mulf %89, %89 : vector<32x128xf32>
    %cst_177 = arith.constant dense<0.000000e+00> : vector<32xf32>
    %326 = vector.multi_reduction <add>, %325, %cst_177 [1] : vector<32x128xf32> to vector<32xf32>
    %327 = vector.shape_cast %326 : vector<32xf32> to vector<32x1xf32>
    %328 = math.rsqrt %327 : vector<32x1xf32>
    %cst_178 = arith.constant 1.000000e+05 : f32
    %329 = vector.broadcast %cst_178 : f32 to vector<32x1xf32>
    %330 = arith.minimumf %328, %329 : vector<32x1xf32>
    %331 = vector.broadcast %330 : vector<32x1xf32> to vector<32x128xf32>
    %332 = arith.mulf %89, %331 : vector<32x128xf32>
    %333 = arith.truncf %332 : vector<32x128xf32> to vector<32x128xbf16>
    %cst_179 = arith.constant dense<0.000000e+00> : vector<16x32xf32>
    %334 = tpu.matmul %324, %333, %cst_179 {dimension_numbers = #tpu.dot_dimension_numbers<[1], [1], [0], [0], [0, 0, 1, 0], [], []>} : vector<16x128xbf16>, vector<32x128xbf16>, vector<16x32xf32> -> vector<16x32xf32>
    %c0_180 = arith.constant 0 : index
    %c0_181 = arith.constant 0 : index
    %c0_182 = arith.constant 0 : index
    %335 = vector.load %arg3[%c0_180, %c0_181, %c0_182] : memref<1x16x1xf32, #tpu.memory_space<vmem>>, vector<1x16x1xf32>
    %336 = vector.shape_cast %335 : vector<1x16x1xf32> to vector<16x1xf32>
    %c17_i32_183 = arith.constant 17 : i32
    %337 = vector.broadcast %c17_i32_183 : i32 to vector<16x32xi32>
    %338 = arith.cmpi sge, %100, %337 : vector<16x32xi32>
    %339 = arith.extui %338 : vector<16x32xi1> to vector<16x32xi32>
    %340 = arith.sitofp %339 : vector<16x32xi32> to vector<16x32xf32>
    %341 = vector.broadcast %336 : vector<16x1xf32> to vector<16x32xf32>
    %342 = arith.maximumf %341, %340 : vector<16x32xf32>
    %cst_184 = arith.constant 1.000000e+00 : f32
    %343 = vector.broadcast %cst_184 : f32 to vector<16x32xf32>
    %344 = arith.subf %343, %334 : vector<16x32xf32>
    %cst_185 = arith.constant 1.000000e+00 : f32
    %345 = vector.broadcast %cst_185 : f32 to vector<16x32xf32>
    %346 = arith.subf %345, %342 : vector<16x32xf32>
    %347 = arith.mulf %344, %346 : vector<16x32xf32>
    %c0_186 = arith.constant 0 : index
    %c0_187 = arith.constant 0 : index
    %c0_188 = arith.constant 0 : index
    %348 = vector.load %arg24[%c0_186, %c0_187, %c0_188] : memref<1x16x32xf32, #tpu.memory_space<vmem>>, vector<1x16x32xf32>
    %349 = vector.shape_cast %348 : vector<1x16x32xf32> to vector<16x32xf32>
    %350 = vector.shape_cast %347 : vector<16x32xf32> to vector<1x16x32xf32>
    tpu.vector_store %arg24[%c0_186, %c0_187, %c0_188], %350 {strides = array<i32>} : memref<1x16x32xf32, #tpu.memory_space<vmem>>, vector<1x16x32xf32>,
    return
  }
  func.func @transform_0(%arg0: i32) -> (i32, i32, i32) {
    %c0_i32 = arith.constant 0 : i32
    %c0_i32_0 = arith.constant 0 : i32
    %c0_i32_1 = arith.constant 0 : i32
    return %arg0, %c0_i32, %c0_i32_0 : i32, i32, i32
  }
  func.func @transform_1(%arg0: i32) -> (i32, i32, i32) {
    %c0_i32 = arith.constant 0 : i32
    %c0_i32_0 = arith.constant 0 : i32
    %c0_i32_1 = arith.constant 0 : i32
    return %arg0, %c0_i32, %c0_i32_0 : i32, i32, i32
  }
  func.func @transform_2(%arg0: i32) -> (i32, i32, i32) {
    %c0_i32 = arith.constant 0 : i32
    %c0_i32_0 = arith.constant 0 : i32
    %c0_i32_1 = arith.constant 0 : i32
    return %arg0, %c0_i32, %c0_i32_0 : i32, i32, i32
  }
  func.func @transform_3(%arg0: i32) -> (i32, i32) {
    %c0_i32 = arith.constant 0 : i32
    %c0_i32_0 = arith.constant 0 : i32
    %c0_i32_1 = arith.constant 0 : i32
    return %c0_i32, %c0_i32_0 : i32, i32
  }
  func.func @transform_4(%arg0: i32) -> (i32, i32) {
    %c0_i32 = arith.constant 0 : i32
    %c0_i32_0 = arith.constant 0 : i32
    %c0_i32_1 = arith.constant 0 : i32
    return %c0_i32, %c0_i32_0 : i32, i32
  }
  func.func @transform_5(%arg0: i32) -> (i32, i32) {
    %c0_i32 = arith.constant 0 : i32
    %c0_i32_0 = arith.constant 0 : i32
    %c0_i32_1 = arith.constant 0 : i32
    return %c0_i32, %c0_i32_0 : i32, i32
  }
  func.func @transform_6(%arg0: i32) -> (i32, i32) {
    %c0_i32 = arith.constant 0 : i32
    %c0_i32_0 = arith.constant 0 : i32
    %c0_i32_1 = arith.constant 0 : i32
    return %c0_i32, %c0_i32_0 : i32, i32
  }
  func.func @transform_7(%arg0: i32) -> (i32, i32) {
    %c0_i32 = arith.constant 0 : i32
    %c0_i32_0 = arith.constant 0 : i32
    %c0_i32_1 = arith.constant 0 : i32
    return %c0_i32, %c0_i32_0 : i32, i32
  }
  func.func @transform_8(%arg0: i32) -> (i32, i32, i32) {
    %c0_i32 = arith.constant 0 : i32
    %c0_i32_0 = arith.constant 0 : i32
    %c0_i32_1 = arith.constant 0 : i32
    return %arg0, %c0_i32, %c0_i32_0 : i32, i32, i32
  }
  func.func @transform_9(%arg0: i32) -> (i32, i32) {
    %c0_i32 = arith.constant 0 : i32
    %c0_i32_0 = arith.constant 0 : i32
    %c0_i32_1 = arith.constant 0 : i32
    return %c0_i32, %c0_i32_0 : i32, i32
  }
  func.func @transform_10(%arg0: i32) -> (i32, i32) {
    %c0_i32 = arith.constant 0 : i32
    %c0_i32_0 = arith.constant 0 : i32
    %c0_i32_1 = arith.constant 0 : i32
    return %c0_i32, %c0_i32_0 : i32, i32
  }
  func.func @transform_11(%arg0: i32) -> (i32, i32) {
    %c0_i32 = arith.constant 0 : i32
    %c0_i32_0 = arith.constant 0 : i32
    %c0_i32_1 = arith.constant 0 : i32
    return %c0_i32, %c0_i32_0 : i32, i32
  }
  func.func @transform_12(%arg0: i32) -> (i32, i32) {
    %c0_i32 = arith.constant 0 : i32
    %c0_i32_0 = arith.constant 0 : i32
    %c0_i32_1 = arith.constant 0 : i32
    return %c0_i32, %c0_i32_0 : i32, i32
  }
  func.func @transform_13(%arg0: i32) -> (i32, i32) {
    %c0_i32 = arith.constant 0 : i32
    %c0_i32_0 = arith.constant 0 : i32
    %c0_i32_1 = arith.constant 0 : i32
    return %c0_i32, %c0_i32_0 : i32, i32
  }
  func.func @transform_14(%arg0: i32) -> (i32, i32) {
    %c0_i32 = arith.constant 0 : i32
    %c0_i32_0 = arith.constant 0 : i32
    %c0_i32_1 = arith.constant 0 : i32
    return %c0_i32, %c0_i32_0 : i32, i32
  }
  func.func @transform_15(%arg0: i32) -> (i32, i32) {
    %c0_i32 = arith.constant 0 : i32
    %c0_i32_0 = arith.constant 0 : i32
    %c0_i32_1 = arith.constant 0 : i32
    return %c0_i32, %c0_i32_0 : i32, i32
  }
  func.func @transform_16(%arg0: i32) -> (i32, i32) {
    %c0_i32 = arith.constant 0 : i32
    %c0_i32_0 = arith.constant 0 : i32
    %c0_i32_1 = arith.constant 0 : i32
    return %c0_i32, %c0_i32_0 : i32, i32
  }
  func.func @transform_17(%arg0: i32) -> (i32, i32) {
    %c0_i32 = arith.constant 0 : i32
    %c0_i32_0 = arith.constant 0 : i32
    %c0_i32_1 = arith.constant 0 : i32
    return %c0_i32, %c0_i32_0 : i32, i32
  }
  func.func @transform_18(%arg0: i32) -> (i32, i32) {
    %c0_i32 = arith.constant 0 : i32
    %c0_i32_0 = arith.constant 0 : i32
    %c0_i32_1 = arith.constant 0 : i32
    return %c0_i32, %c0_i32_0 : i32, i32
  }
  func.func @transform_19(%arg0: i32) -> (i32, i32) {
    %c0_i32 = arith.constant 0 : i32
    %c0_i32_0 = arith.constant 0 : i32
    %c0_i32_1 = arith.constant 0 : i32
    return %c0_i32, %c0_i32_0 : i32, i32
  }
  func.func @transform_20(%arg0: i32) -> (i32, i32) {
    %c0_i32 = arith.constant 0 : i32
    %c0_i32_0 = arith.constant 0 : i32
    %c0_i32_1 = arith.constant 0 : i32
    return %c0_i32, %c0_i32_0 : i32, i32
  }
  func.func @transform_21(%arg0: i32) -> (i32, i32, i32) {
    %c0_i32 = arith.constant 0 : i32
    %c0_i32_0 = arith.constant 0 : i32
    %c0_i32_1 = arith.constant 0 : i32
    return %arg0, %c0_i32, %c0_i32_0 : i32, i32, i32
  }
  func.func @transform_22(%arg0: i32) -> (i32, i32, i32) {
    %c0_i32 = arith.constant 0 : i32
    %c0_i32_0 = arith.constant 0 : i32
    %c0_i32_1 = arith.constant 0 : i32
    return %arg0, %c0_i32, %c0_i32_0 : i32, i32, i32
  }
  func.func @transform_23(%arg0: i32) -> (i32, i32, i32) {
    %c0_i32 = arith.constant 0 : i32
    %c0_i32_0 = arith.constant 0 : i32
    %c0_i32_1 = arith.constant 0 : i32
    return %arg0, %c0_i32, %c0_i32_0 : i32, i32, i32
  }
  func.func @transform_24(%arg0: i32) -> (i32, i32, i32) {
    %c0_i32 = arith.constant 0 : i32
    %c0_i32_0 = arith.constant 0 : i32
    %c0_i32_1 = arith.constant 0 : i32
    return %arg0, %c0_i32, %c0_i32_0 : i32, i32, i32
  }
}

</mosaic_0001>

<bundles_post_ra>
// kernel: asp_forward.1
= control target key start
LH: loop header
LB: loop body
LE: loop exit
PB: predicated region body
PF: predicated region fallthrough
CT: control target
= control target key end

     0   :  { %s8406_s0 = inlined_call_operand.vmem [shape: s32[2,16,1], index: 0, kind: input, shape index: {}]   ;;  %s8407_s1 = inlined_call_operand.vmem [shape: s32[2,16,1], index: 1, kind: input, shape index: {}]   ;;  %s8408_s2 = inlined_call_operand.vmem [shape: f32[2,16,1], index: 2, kind: input, shape index: {}]   ;;  %s8409_s3 = inlined_call_operand.vmem [shape: bf16[128,128], index: 3, kind: input, shape index: {}]   ;;  %s8410_s4 = inlined_call_operand.vmem [shape: bf16[128,128], index: 4, kind: input, shape index: {}]   ;;  %s8411_s5 = inlined_call_operand.vmem [shape: f32[1,128], index: 5, kind: input, shape index: {}]   ;;  %s8412_s6 = inlined_call_operand.vmem [shape: bf16[128,128], index: 6, kind: input, shape index: {}]   ;;  %s8413_s7 = inlined_call_operand.vmem [shape: f32[1,128], index: 7, kind: input, shape index: {}]   ;;  %s8414_s8 = inlined_call_operand.vmem [shape: f32[2,32,128], index: 8, kind: input, shape index: {}]   ;;  %s8415_s9 = inlined_call_operand.vmem [shape: bf16[128,128], index: 9, kind: input, shape index: {}]   ;;  %s8416_s10 = inlined_call_operand.vmem [shape: f32[1,128], index: 10, kind: input, shape index: {}]   ;;  %s8417_s11 = inlined_call_operand.hbm [shape: f32[32,128], index: 11, kind: input, shape index: {}]   ;;  %s8418_s12 = inlined_call_operand.vmem [shape: bf16[128,128], index: 12, kind: input, shape index: {}]   ;;  %s8419_s13 = inlined_call_operand.vmem [shape: f32[1,128], index: 13, kind: input, shape index: {}]   ;;  %s8420_s14 = inlined_call_operand.vmem [shape: bf16[128,1024], index: 14, kind: input, shape index: {}]   ;;  %s8421_s15 = inlined_call_operand.vmem [shape: bf16[128,2048], index: 15, kind: input, shape index: {}]   ;;  %s8422_s16 = inlined_call_operand.hbm [shape: bf16[1024,128], index: 16, kind: input, shape index: {}]   ;;  %s8423_s17 = inlined_call_operand.vmem [shape: f32[1,128], index: 17, kind: input, shape index: {}]   ;;  %s8424_s18 = inlined_call_operand.vmem [shape: f32[1,128], index: 18, kind: input, shape index: {}]   ;;  %s8425_s19 = inlined_call_operand.hbm [shape: bf16[128,128], index: 19, kind: input, shape index: {}]   ;;  %s8426_s20 = inlined_call_operand.vmem [shape: f32[1,128], index: 20, kind: input, shape index: {}]   ;;  %s8427_s21 = inlined_call_operand.vmem [shape: f32[2,16,128], index: 21, kind: output, shape index: {0}]   ;;  %s8428_s22 = inlined_call_operand.vmem [shape: f32[2,16,128], index: 22, kind: output, shape index: {1}]   ;;  %s8429_s23 = inlined_call_operand.vmem [shape: f32[2,16,32], index: 23, kind: output, shape index: {2}]   ;;  %s8430_s24 = inlined_call_operand.vmem [shape: f32[2,1,128], index: 24, kind: output, shape index: {3}]  }
   0x1   :  { %8470 = sst [smem:[#allocation37_spill]] %s8406_s0 }
   0x2   :  { %8471 = sst [smem:[#allocation38_spill]] %s8407_s1 }
   0x3   :  { %8472 = sst [smem:[#allocation39_spill]] %s8408_s2 }
   0x4   :  { %8473 = sst [smem:[#allocation40_spill]] %s8409_s3 }
   0x5   :  { %8474 = sst [smem:[#allocation41_spill]] %s8410_s4 }
   0x6   :  { %8475 = sst [smem:[#allocation42_spill]] %s8411_s5 }
   0x7   :  { %8476 = sst [smem:[#allocation43_spill]] %s8412_s6 }
   0x8   :  { %8477 = sst [smem:[#allocation44_spill]] %s8413_s7 }
   0x9   :  { %8478 = sst [smem:[#allocation45_spill]] %s8414_s8 }
   0xa   :  { %8479 = sst [smem:[#allocation46_spill]] %s8428_s22 }
   0xb   :  { %8480 = sst [smem:[#allocation47_spill]] %s8429_s23 }
   0xc   :  { %8481 = sst [smem:[#allocation48_spill]] %s8430_s24 }
   0xd   :  { %30 = vsyncpa [#allocation6], 0 }
   0xe   :  { %31 = vsyncpa [#allocation8], 0  ;;  %s6823_s5 = smov 0  }
   0xf LB: > { %8482 = sst [smem:[#allocation12_spill]] %s6685_s5  ;;  %s6687_s26 = smov [#allocation7]   ;;  %s6685_s5 = sphi %s6823_s5, %s37_s5  }
  0x10   : > { %s665_s27 = sshll.u32 %s6687_s26, 4  ;;  %s6829_s28 = sadd.s32 4294967295, %s6685_s5   ;;  %s6838_s27 = int_to_ptr.vmem [resolvable:$true] %s665_s27 }
  0x11   : > { %p5515_p0 = scmp.ge.s32.totalorder %s6685_s5, 1  ;;  %p607_p1 = scmp.lt.s32.totalorder %s6685_s5, 3 }
  0x12   : > { %p8436_p2 = scmp.eq.s32.totalorder %s6829_s28, 0  ;;  %s6688_s2 = smov [#allocation5]  }
  0x13   : > { %p6834_p3 = pnand %p5515_p0, %p607_p1  ;;  %s640_s29 = sshll.u32 %s6688_s2, 4  ;;  %s6842_s29 = int_to_ptr.vmem [resolvable:$true] %s640_s29 }
  0x14   : > { %s6689_s7 = smov [#allocation9]   ;;  %s6587_s8 = scalar_lea.hbm %s8422_s16, 8192 }
  0x15   : > { %s8483_s6 = scalar_select %p6834_p3, 1, 0 }
  0x16   : > { %p6336_p4 = pneg %p6834_p3  ;;  %s6850_s30 = sshll.u32 %s6689_s7, 4  ;;  %s685_s30 = int_to_ptr.vmem [resolvable:$true] %s6850_s30 }
  0x17   : > { %p6588_p6 = scmp.ne.s32.totalorder %s8422_s16, %s6587_s8  ;;  %p6594_p10 = scmp.lt.u32.totalorder %s6587_s8, %s8422_s16 }
  0x18   : > { %p6846_p5 = pnand %p8436_p2, %p6336_p4 }
  0x1a   : > { %p6860_p7 = pneg %p6846_p5 }
  0x1c   : > { %p6590_p8 = pnand %p6860_p7, %p6588_p6 }
  0x1e   : > { %p6591_p9 = pneg %p6590_p8 }
  0x20   : > { %p6596_p11 = pnand %p6594_p10, %p6591_p9 }
  0x22   : > { %6599 = shalt.err (!%p6596_p11)
}
  0x23   : > { %s6600_s3 = scalar_lea.vmem %s6838_s27, 8192  ;;  %p6608_p1 = scmp.lt.s32.totalorder %s6838_s27, %s6838_s27 }
  0x24   : > { %p6601_p12 = scmp.ne.s32.totalorder %s6838_s27, %s6600_s3  ;;  %p6609_p4 = scmp.lt.s32.totalorder %s6600_s3, %s6600_s3 }
  0x26   : > { %p6603_p13 = pnand %p6601_p12, %p6860_p7  ;;  %p6610_p6 = por %p6609_p4, %p6608_p1 }
  0x28   : > { %p6604_p0 = pneg %p6603_p13 }
  0x2a   : > { %p6611_p8 = pnand %p6610_p6, %p6604_p0 }
  0x2c   : > { %6614 = shalt.err (!%p6611_p8)
}
  0x2d   : > { %s8435_s25 = smov 64   ;;  %s6691_s8 = smov 4  }
  0x2e   : > { %6342 = dma.hbm_to_vmem [thread:$0]  (!%p6846_p5), %s8422_s16, 8192, %s6838_s27, [#allocation8], %s8435_s25, %s8435_s25, %s6691_s8  }
  0x2f   : > { %s6615_s3 = scalar_lea.hbm %s8417_s11, 512 }
  0x30   : > { %p6616_p9 = scmp.ne.s32.totalorder %s8417_s11, %s6615_s3  ;;  %p6622_p12 = scmp.lt.u32.totalorder %s6615_s3, %s8417_s11 }
  0x32   : > { %p6618_p10 = pnand %p6616_p9, %p6860_p7 }
  0x34   : > { %p6619_p11 = pneg %p6618_p10 }
  0x36   : > { %p6624_p13 = pnand %p6622_p12, %p6619_p11 }
  0x38   : > { %6627 = shalt.err (!%p6624_p13)
}
  0x39   : > { %s6628_s27 = scalar_lea.vmem %s6842_s29, 512  ;;  %p6636_p6 = scmp.lt.s32.totalorder %s6842_s29, %s6842_s29 }
  0x3a   : > { %p6629_p0 = scmp.ne.s32.totalorder %s6842_s29, %s6628_s27  ;;  %p6637_p8 = scmp.lt.s32.totalorder %s6628_s27, %s6628_s27 }
  0x3c   : > { %p6631_p1 = pnand %p6629_p0, %p6860_p7  ;;  %p6638_p9 = por %p6637_p8, %p6636_p6 }
  0x3e   : > { %p6632_p4 = pneg %p6631_p1 }
  0x40   : > { %p6639_p10 = pnand %p6638_p9, %p6632_p4 }
  0x42   : > { %6642 = shalt.err (!%p6639_p10)
}
  0x43   : > { %s6692_s24 = smov 128   ;;  %s6693_s22 = smov 8  }
  0x44   : > { %6339 = dma.hbm_to_vmem [thread:$0]  (!%p6846_p5), %s8417_s11, 512, %s6842_s29, [#allocation6], %s6692_s24, %s6692_s24, %s6693_s22  }
  0x45   : > { %s6643_s2 = scalar_lea.hbm %s8425_s19, 1024 }
  0x46   : > { %p6644_p11 = scmp.ne.s32.totalorder %s8425_s19, %s6643_s2  ;;  %p6650_p0 = scmp.lt.u32.totalorder %s6643_s2, %s8425_s19 }
  0x48   : > { %p6646_p12 = pnand %p6644_p11, %p6860_p7 }
  0x4a   : > { %p6647_p13 = pneg %p6646_p12 }
  0x4c   : > { %p6652_p1 = pnand %p6650_p0, %p6647_p13 }
  0x4e   : > { %6655 = shalt.err (!%p6652_p1)
}
  0x4f   : > { %s6656_s23 = scalar_lea.vmem %s685_s30, 1024  ;;  %p6664_p9 = scmp.lt.s32.totalorder %s685_s30, %s685_s30 }
  0x50   : > { %p6657_p4 = scmp.ne.s32.totalorder %s685_s30, %s6656_s23  ;;  %p6665_p10 = scmp.lt.s32.totalorder %s6656_s23, %s6656_s23 }
  0x52   : > { %p6659_p6 = pnand %p6657_p4, %p6860_p7  ;;  %p6666_p2 = por %p6665_p10, %p6664_p9 }
  0x54   : > { %p6660_p8 = pneg %p6659_p6 }
  0x56   : > { %p6667_p3 = pnand %p6666_p2, %p6660_p8 }
  0x58   : > { %6670 = shalt.err (!%p6667_p3)
}
  0x59   : > { %s8486_s29 = smov 64   ;;  %p8487_p11 = scmp.ne.s32.totalorder %s8483_s6, 0 }
  0x5a   : > { %6345 = dma.hbm_to_vmem [thread:$0]  (!%p6846_p5), %s8425_s19, 1024, %s685_s30, [#allocation8], %s8486_s29, %s8486_s29, %s6691_s8  }
  0x5b   : > { %735 = sbr.rel (%p8487_p11) target bundleno = 6086 (0x17c6), region = 104 }
  0x62   : > { %p8488_p7 = scmp.eq.s32.totalorder %s6829_s28, 0 }
  0x64   : > { %6676 = dma.done.wait (%p8488_p7), [#allocation6], 512   ;;  %p8489_p12 = pmov %p8488_p7 }
  0x65   : > { %p8490_p2 = pmov %p8488_p7 }
  0x66   : > { %6678 = vsyncadd (%p8489_p12), [#allocation6], 4294966784 }
  0x67   : > { %6680 = dma.done.wait (%p8490_p2), [#allocation8], 9216   ;;  %p8491_p3 = pmov %p8490_p2 }
  0x68   : > { %p837_p13 = scmp.lt.s32.totalorder %s6829_s28, 1  ;;  %v6694_v0 = vmov 0   ;;  %v8446_v1 = vmov 0.0   ;;  %s8492_s26 = sld [smem:[#allocation37_spill]]  ;;  %vm6696_vm0 = vmmov 0   ;;  %v878_v19 = vlaneseq  ;;  %v6389_v25 = vld [vmem:[%s8415_s9] sm:$0xff]  }
  0x69   : > { %6682 = vsyncadd (%p8491_p3), [#allocation8], 4294958080  ;;  %6371 = vset.pattern.permute.xlu0 %v6694_v0  ;;  %6068 = vmatprep.subr.bf16.mxu0 %v8446_v1  ;;  %s8493_s4 = sld [smem:[#allocation40_spill]]  ;;  %s8494_s29 = sld [smem:[#allocation41_spill]]  ;;  %v6697_v23 = vmov 1.0|1.0  }
  0x6a   : > { %s8588_s28 = smov (!%p837_p13, %s6829_s28), 1  ;;  %6088 = vmatprep.subr.bf16.mxu1 %v8446_v1  ;;  %6372 = vset.pattern.permute.xlu1 %v6694_v0  ;;  %v7018_v21 = vand.u32 127, %v878_v19  ;;  %s8495_s25 = sld [smem:[#allocation43_spill]]  ;;  %v6390_v38 = vld [vmem:[%s8415_s9 + $0x8] sm:$0xff]   ;;  %v6391_v39 = vld [vmem:[%s8415_s9 + $0x10] sm:$0xff]   ;;  %v6392_v40 = vld [vmem:[%s8415_s9 + $0x18] sm:$0xff]  }
  0x6b   : > { %s6948_s6 = sshll.u32 %s8588_s28, 4  ;;  %6084 = vmatprep.mubr.msk.bf16.mxu0 %vm6696_vm0, %v8446_v1  ;;  %6104 = vmatprep.mubr.msk.bf16.mxu1 %vm6696_vm0, %v8446_v1  ;;  %s5869_s5 = sshll.u32 %s8588_s28, 5  ;;  %v6393_v41 = vld [vmem:[%s8415_s9 + $0x20] sm:$0xff]   ;;  %v6394_v42 = vld [vmem:[%s8415_s9 + $0x28] sm:$0xff]   ;;  %v6395_v43 = vld [vmem:[%s8415_s9 + $0x30] sm:$0xff]   ;;  %vm3452_vm5 = vcmask 261120  }
  0x6c   : > { %s8496_s7 = sld [smem:[#allocation45_spill]]  ;;  %v6396_v44 = vld [vmem:[%s8415_s9 + $0x38] sm:$0xff]   ;;  %v1571_v45 = vld [vmem:[%s8420_s14] sm:$0xff]  ;;  %s7448_s24 = scalar_lea.vmem %s8427_s21, %s6948_s6  ;;  %vm3401_vm4 = vcmp.lt.s32.totalorder %v7018_v21, 17  ;;  %vm1230_vm6 = vcmp.lt.s32.totalorder %v7018_v21, 5  ;;  %vm1277_vm9 = vcmask 7168  }
  0x6d   : > { %v1575_v46 = vld [vmem:[%s8420_s14 + $0x20] sm:$0xff]  ;;  %s8581_s2 = sld [smem:[#allocation38_spill]]  ;;  %vm5277_vm12 = vcmp.ge.s32.totalorder %v7018_v21, 17  ;;  %s8584_s0 = sld [smem:[#allocation47_spill]]  ;;  %vm1297_vm13 = vcmp.eq.s32.totalorder %v7018_v21, 1  ;;  %vm1296_vm14 = vcmp.eq.s32.totalorder %v7018_v21, 0 }
  0x6e   : > { %s841_s8 = scalar_lea.vmem %s8492_s26, %s6948_s6  ;;  %v5589_v49 = vcombine.high %v1571_v45, %v1575_v46  ;;  %v1579_v50 = vld [vmem:[%s8420_s14 + $0x40] sm:$0xff]  ;;  %v5588_v53 = vcombine.low %v1571_v45, %v1575_v46  ;;  %v6407_v45 = vld [vmem:[%s8418_s12 + $0x10] sm:$0xff]  }
  0x6f   : > { %v876_v2 = vld [vmem:[%s841_s8] sm:$0xff]  ;;  %v877_v4 = vld [vmem:[%s841_s8 + $0x8] sm:$0xff]  ;;  %v6375_v6 = vld [vmem:[%s8493_s4 + $0x10] sm:$0xff]   ;;  %s8582_s8 = sld [smem:[#allocation39_spill]] }
  0x70   : > { %881 = vperm.xlu0 %6371, %v876_v2   ;;  %v6373_v3 = vld [vmem:[%s8493_s4] sm:$0xff]   ;;  %v6374_v5 = vld [vmem:[%s8493_s4 + $0x8] sm:$0xff]   ;;  %v6376_v9 = vld [vmem:[%s8493_s4 + $0x18] sm:$0xff]  }
  0x71   : > { %6069 = vmatpush3.bf16.msra.mxu0 %v6373_v3  ;;  %v6381_v7 = vld [vmem:[%s8494_s29] sm:$0xff]   ;;  %v6382_v8 = vld [vmem:[%s8494_s29 + $0x8] sm:$0xff]   ;;  %v6383_v10 = vld [vmem:[%s8494_s29 + $0x10] sm:$0xff]  }
  0x72   : > { %6070 = vmatprep.subr.bf16.mxu0 %v8446_v1  ;;  %6089 = vmatpush3.bf16.msra.mxu1 %v6381_v7  ;;  %v6377_v11 = vld [vmem:[%s8493_s4 + $0x20] sm:$0xff]   ;;  %v6384_v12 = vld [vmem:[%s8494_s29 + $0x18] sm:$0xff]   ;;  %v6378_v13 = vld [vmem:[%s8493_s4 + $0x28] sm:$0xff]   ;;  %s7050_s3 = scalar_lea.vmem %s8496_s7, %s5869_s5  ;;  %s8497_s7 = sld [smem:[#allocation42_spill]] }
  0x73   : > { %6090 = vmatprep.subr.bf16.mxu1 %v8446_v1  ;;  %v6385_v14 = vld [vmem:[%s8494_s29 + $0x20] sm:$0xff]   ;;  %v6379_v15 = vld [vmem:[%s8493_s4 + $0x30] sm:$0xff]   ;;  %v6386_v16 = vld [vmem:[%s8494_s29 + $0x28] sm:$0xff]   ;;  %s871_s30 = scalar_lea.vmem %s8584_s0, %s6948_s6 }
  0x74   : > { %884 = vperm.xlu0 %6371, %v877_v4   ;;  %v6380_v17 = vld [vmem:[%s8493_s4 + $0x38] sm:$0xff]   ;;  %v6387_v18 = vld [vmem:[%s8494_s29 + $0x30] sm:$0xff]   ;;  %v6397_v26 = vld [vmem:[%s8495_s25] sm:$0xff]  }
  0x75   : > { %6071 = vmatpush3.bf16.msra.mxu0 %v6374_v5  ;;  %v6388_v24 = vld [vmem:[%s8494_s29 + $0x38] sm:$0xff]   ;;  %v6398_v27 = vld [vmem:[%s8495_s25 + $0x8] sm:$0xff]   ;;  %v6399_v28 = vld [vmem:[%s8495_s25 + $0x10] sm:$0xff]   ;;  %s851_s22 = scalar_lea.vmem %s8582_s8, %s6948_s6  ;;  %s8585_s8 = sld [smem:[#allocation48_spill]] }
  0x76   : > { %6072 = vmatprep.subr.bf16.mxu0 %v8446_v1  ;;  %6091 = vmatpush3.bf16.msra.mxu1 %v6382_v8  ;;  %v6400_v29 = vld [vmem:[%s8495_s25 + $0x18] sm:$0xff]   ;;  %v1311_v30 = vld [vmem:[%s7050_s3] sm:$0xff]  ;;  %v1312_v31 = vld [vmem:[%s7050_s3 + $0x8] sm:$0xff] }
  0x77   : > { %6092 = vmatprep.subr.bf16.mxu1 %v8446_v1  ;;  %v1315_v35 = vpack.c.bf16 %v1312_v31, %v1311_v30  ;;  %v1313_v47 = vld [vmem:[%s7050_s3 + $0x10] sm:$0xff]  ;;  %v1314_v48 = vld [vmem:[%s7050_s3 + $0x18] sm:$0xff]  ;;  %v1583_v51 = vld [vmem:[%s8420_s14 + $0x60] sm:$0xff]  ;;  %s8500_s3 = sld [smem:[#allocation44_spill]] }
  0x78   : > { %v1316_v52 = vpack.c.bf16 %v1314_v48, %v1313_v47  ;;  %v5597_v54 = vcombine.high %v1579_v50, %v1583_v51  ;;  %v1587_v55 = vld [vmem:[%s8420_s14 + $0x80] sm:$0xff]  ;;  %v5596_v57 = vcombine.low %v1579_v50, %v1583_v51  ;;  %v1597_v47 = vld [vmem:[%s8420_s14 + $0xd0] sm:$0xff]  ;;  %v6408_v50 = vld [vmem:[%s8418_s12 + $0x18] sm:$0xff]  }
  0x79   : > { %6073 = vmatpush3.bf16.msra.mxu0 %v6375_v6  ;;  %v1591_v56 = vld [vmem:[%s8420_s14 + $0xa0] sm:$0xff]  ;;  %v1601_v48 = vld [vmem:[%s8420_s14 + $0xf0] sm:$0xff] }
  0x7a   : > { %6074 = vmatprep.subr.bf16.mxu0 %v8446_v1  ;;  %6093 = vmatpush3.bf16.msra.mxu1 %v6383_v10  ;;  %v5605_v58 = vcombine.high %v1587_v55, %v1591_v56  ;;  %v1595_v59 = vld [vmem:[%s8420_s14 + $0xc0] sm:$0xff]  ;;  %v5604_v61 = vcombine.low %v1587_v55, %v1591_v56  ;;  %v5617_v51 = vcombine.high %v1597_v47, %v1601_v48 }
  0x7b   : > { %6094 = vmatprep.subr.bf16.mxu1 %v8446_v1  ;;  %v1599_v60 = vld [vmem:[%s8420_s14 + $0xe0] sm:$0xff] }
  0x7c   : > { %v5613_v62 = vcombine.high %v1595_v59, %v1599_v60  ;;  %v5612_v63 = vcombine.low %v1595_v59, %v1599_v60  ;;  %v1603_v2 = vld [vmem:[%s8420_s14 + $0x100] sm:$0xff] }
  0x7d   : > { %6075 = vmatpush3.bf16.msra.mxu0 %v6376_v9  ;;  %v1607_v3 = vld [vmem:[%s8420_s14 + $0x120] sm:$0xff] }
  0x7e   : > { %6076 = vmatprep.subr.bf16.mxu0 %v8446_v1  ;;  %6095 = vmatpush3.bf16.msra.mxu1 %v6384_v12  ;;  %v5621_v4 = vcombine.high %v1603_v2, %v1607_v3  ;;  %v5620_v5 = vcombine.low %v1603_v2, %v1607_v3  ;;  %v6401_v6 = vld [vmem:[%s8495_s25 + $0x20] sm:$0xff]  }
  0x7f   : > { %6096 = vmatprep.subr.bf16.mxu1 %v8446_v1  ;;  %v1611_v7 = vld [vmem:[%s8420_s14 + $0x140] sm:$0xff] }
  0x80   : > { %v1615_v8 = vld [vmem:[%s8420_s14 + $0x160] sm:$0xff] }
  0x81   : > { %6077 = vmatpush3.bf16.msra.mxu0 %v6377_v11  ;;  %v5629_v9 = vcombine.high %v1611_v7, %v1615_v8  ;;  %v5628_v10 = vcombine.low %v1611_v7, %v1615_v8  ;;  %v6402_v11 = vld [vmem:[%s8495_s25 + $0x28] sm:$0xff]   ;;  %v1619_v12 = vld [vmem:[%s8420_s14 + $0x180] sm:$0xff]  ;;  %v1625_v7 = vld [vmem:[%s8420_s14 + $0x1b0] sm:$0xff] }
  0x82   : > { %6078 = vmatprep.subr.bf16.mxu0 %v8446_v1  ;;  %6097 = vmatpush3.bf16.msra.mxu1 %v6385_v14  ;;  %v6409_v55 = vld [vmem:[%s8418_s12 + $0x20] sm:$0xff]  }
  0x83   : > { %6098 = vmatprep.subr.bf16.mxu1 %v8446_v1  ;;  %v5570_v59 = vld [vmem:[%s8416_s10] ss:$0 sm:$0xff] }
  0x85   : > { %6079 = vmatpush3.bf16.msra.mxu0 %v6378_v13  ;;  %v1623_v13 = vld [vmem:[%s8420_s14 + $0x1a0] sm:$0xff] }
  0x86   : > { %6080 = vmatprep.subr.bf16.mxu0 %v8446_v1  ;;  %6099 = vmatpush3.bf16.msra.mxu1 %v6386_v16  ;;  %v5636_v14 = vcombine.low %v1619_v12, %v1623_v13  ;;  %v6403_v16 = vld [vmem:[%s8495_s25 + $0x30] sm:$0xff]  }
  0x87   : > { %6100 = vmatprep.subr.bf16.mxu1 %v8446_v1 }
  0x89   : > { %6081 = vmatpush3.bf16.msra.mxu0 %v6379_v15  ;;  %v5637_v15 = vcombine.high %v1619_v12, %v1623_v13 }
  0x8a   : > { %6082 = vmatprep.subr.bf16.mxu0 %v8446_v1  ;;  %6101 = vmatpush3.bf16.msra.mxu1 %v6387_v18  ;;  %v1631_v18 = vld [vmem:[%s8420_s14 + $0x1e0] sm:$0xff] }
  0x8b   : > { %6102 = vmatprep.subr.bf16.mxu1 %v8446_v1 }
  0x8d   : > { %6083 = vmatpush3.bf16.msra.mxu0 %v6380_v17  ;;  %v1627_v17 = vld [vmem:[%s8420_s14 + $0x1c0] sm:$0xff] }
  0x8e   : > { %6108 = vmatprep.subr.bf16.mxu0 %v8446_v1  ;;  %6103 = vmatpush3.bf16.msra.mxu1 %v6388_v24  ;;  %v5645_v19 = vcombine.high %v1627_v17, %v1631_v18  ;;  %v5644_v24 = vcombine.low %v1627_v17, %v1631_v18  ;;  %v6411_v18 = vld [vmem:[%s8418_s12 + $0x30] sm:$0xff]  }
  0x8f   : > { %6128 = vmatprep.subr.bf16.mxu1 %v6389_v25 }
  0xef   : > { %v882_v20 = vpop.permute.xlu0 %881 }
  0xf0   : > { %vm886_vm1 = vcmp.eq.s32.totalorder %v7018_v21, %v882_v20  ;;  %v1573_v20 = vld [vmem:[%s8420_s14 + $0x10] sm:$0xff] }
  0xf3   : > { %v885_v22 = vpop.permute.xlu0 %884 }
  0xf4   : > { %vm887_vm2 = vcmp.eq.s32.totalorder %v7018_v21, %v885_v22  ;;  %v1577_v22 = vld [vmem:[%s8420_s14 + $0x30] sm:$0xff] }
  0xf5   : > { %vm5548_vm3 = vmpackc.low %vm887_vm2, %vm886_vm1 }
  0xf6   : > { %6085 = vmatmul.mubr.msk.bf16.vlgmr.msra.gmra.mrb[0].mxu0 %vm5548_vm3, %v6697_v23  ;;  %v5592_v23 = vcombine.low %v1573_v20, %v1577_v22 }
  0xf7   : > { %6124 = vmatprep.mubr.msk.bf16.mxu0 %vm6696_vm0, %v8446_v1  ;;  %6109 = vmatpush3.bf16.msra.mxu0 %v6397_v26  ;;  %v6405_v26 = vld [vmem:[%s8418_s12] sm:$0xff]  }
  0xf8   : > { %6110 = vmatprep.subr.bf16.mxu0 %v8446_v1 }
  0xfb   : > { %6111 = vmatpush3.bf16.msra.mxu0 %v6398_v27  ;;  %v5593_v27 = vcombine.high %v1573_v20, %v1577_v22  ;;  %v1629_v22 = vld [vmem:[%s8420_s14 + $0x1d0] sm:$0xff] }
  0xfc   : > { %6112 = vmatprep.subr.bf16.mxu0 %v8446_v1 }
  0xff   : > { %6113 = vmatpush3.bf16.msra.mxu0 %v6399_v28  ;;  %v5550_v28 = vld [vmem:[%s8497_s7] ss:$0 sm:$0xff]  ;;  %s846_s7 = scalar_lea.vmem %s8581_s2, %s6948_s6 }
 0x100   : > { %6114 = vmatprep.subr.bf16.mxu0 %v8446_v1 }
 0x103   : > { %6115 = vmatpush3.bf16.msra.mxu0 %v6400_v29 }
 0x104   : > { %6116 = vmatprep.subr.bf16.mxu0 %v8446_v1 }
 0x107   : > { %6117 = vmatpush3.bf16.msra.mxu0 %v6401_v6  ;;  %v1621_v6 = vld [vmem:[%s8420_s14 + $0x190] sm:$0xff] }
 0x108   : > { %6118 = vmatprep.subr.bf16.mxu0 %v8446_v1 }
 0x10b   : > { %6119 = vmatpush3.bf16.msra.mxu0 %v6402_v11 }
 0x10c   : > { %6120 = vmatprep.subr.bf16.mxu0 %v8446_v1 }
 0x10f   : > { %6121 = vmatpush3.bf16.msra.mxu0 %v6403_v16 }
 0x110   : > { %6122 = vmatprep.subr.bf16.mxu0 %v8446_v1 }
 0x1c9   : > { %v991_v32 = vpop.f32.mrb[0].mxu0 }
 0x1ca   : > { %v6086_v33 = vpop.f32.mrb[1].mxu0 }
 0x1cb   : > { %v994_v34 = vpop.f32.mrb[2].mxu0 }
 0x1cc   : > { %v998_v36 = vpack.c.bf16 %v994_v34, %v991_v32  ;;  %v6087_v37 = vpop.f32.mrb[3].mxu0 }
 0x1ce   : > { %6105 = vmatmul.mubr.bf16.vlgmr.msra.gmra.mrb[0].mxu1 %v998_v36  ;;  %v1585_v36 = vld [vmem:[%s8420_s14 + $0x70] sm:$0xff] }
 0x1cf   : > { %6129 = vmatpush3.bf16.msra.mxu1 %v6389_v25  ;;  %6144 = vmatprep.mubr.bf16.mxu1 %v1315_v35  ;;  %v6404_v25 = vld [vmem:[%s8495_s25 + $0x38] sm:$0xff]   ;;  %v1581_v35 = vld [vmem:[%s8420_s14 + $0x50] sm:$0xff] }
 0x1d0   : > { %6130 = vmatprep.subr.bf16.mxu1 %v6390_v38  ;;  %6123 = vmatpush3.bf16.msra.mxu0 %v6404_v25 }
 0x1d1   : > { %6148 = vmatprep.subr.bf16.mxu0 %v6405_v26 }
 0x1d3   : > { %6131 = vmatpush3.bf16.msra.mxu1 %v6390_v38 }
 0x1d4   : > { %6132 = vmatprep.subr.bf16.mxu1 %v6391_v39 }
 0x1d7   : > { %6133 = vmatpush3.bf16.msra.mxu1 %v6391_v39 }
 0x1d8   : > { %6134 = vmatprep.subr.bf16.mxu1 %v6392_v40 }
 0x1db   : > { %6135 = vmatpush3.bf16.msra.mxu1 %v6392_v40  ;;  %v6406_v40 = vld [vmem:[%s8418_s12 + $0x8] sm:$0xff]  }
 0x1dc   : > { %6136 = vmatprep.subr.bf16.mxu1 %v6393_v41 }
 0x1df   : > { %6137 = vmatpush3.bf16.msra.mxu1 %v6393_v41  ;;  %v5601_v41 = vcombine.high %v1581_v35, %v1585_v36 }
 0x1e0   : > { %6138 = vmatprep.subr.bf16.mxu1 %v6394_v42 }
 0x1e3   : > { %6139 = vmatpush3.bf16.msra.mxu1 %v6394_v42  ;;  %v1589_v42 = vld [vmem:[%s8420_s14 + $0x90] sm:$0xff] }
 0x1e4   : > { %6140 = vmatprep.subr.bf16.mxu1 %v6395_v43 }
 0x1e7   : > { %6141 = vmatpush3.bf16.msra.mxu1 %v6395_v43  ;;  %v1593_v43 = vld [vmem:[%s8420_s14 + $0xb0] sm:$0xff] }
 0x1e8   : > { %6142 = vmatprep.subr.bf16.mxu1 %v6396_v44  ;;  %v5609_v46 = vcombine.high %v1589_v42, %v1593_v43 }
 0x1eb   : > { %6143 = vmatpush3.bf16.msra.mxu1 %v6396_v44  ;;  %v5600_v44 = vcombine.low %v1581_v35, %v1585_v36  ;;  %v1584_v35 = vld [vmem:[%s8420_s14 + $0x68] sm:$0xff] }
 0x1ec   : > { %1955 = vmatprep.subr.bf16.mxu1 %v5589_v49  ;;  %v5608_v49 = vcombine.low %v1589_v42, %v1593_v43  ;;  %v1592_v42 = vld [vmem:[%s8420_s14 + $0xa8] sm:$0xff] }
 0x1ee   : > { %6145 = vmatmul.mubr.bf16.vlgmr.msra.gmra.mrb[4].mxu1 %v1316_v52  ;;  %v1605_v52 = vld [vmem:[%s8420_s14 + $0x110] sm:$0xff] }
 0x1ef   : > { %1956 = vmatpush1.bf16.msra.mxu1 %v5588_v53  ;;  %1987 = vmatprep.mubr.bf16.mxu1 %v6694_v0  ;;  %v1609_v53 = vld [vmem:[%s8420_s14 + $0x130] sm:$0xff] }
 0x1f0   : > { %1957 = vmatprep.subr.bf16.mxu1 %v5597_v54  ;;  %v5616_v54 = vcombine.low %v1597_v47, %v1601_v48  ;;  %v5625_v56 = vcombine.high %v1605_v52, %v1609_v53  ;;  %v5624_v60 = vcombine.low %v1605_v52, %v1609_v53  ;;  %v1612_v53 = vld [vmem:[%s8420_s14 + $0x148] sm:$0xff] }
 0x1f3   : > { %1958 = vmatpush1.bf16.msra.mxu1 %v5596_v57  ;;  %v1613_v57 = vld [vmem:[%s8420_s14 + $0x150] sm:$0xff] }
 0x1f4   : > { %1959 = vmatprep.subr.bf16.mxu1 %v5605_v58  ;;  %v1617_v58 = vld [vmem:[%s8420_s14 + $0x170] sm:$0xff] }
 0x1f5   : > { %v5633_v2 = vcombine.high %v1613_v57, %v1617_v58  ;;  %v5632_v13 = vcombine.low %v1613_v57, %v1617_v58  ;;  %v1620_v57 = vld [vmem:[%s8420_s14 + $0x188] sm:$0xff] }
 0x1f6   : > { %v1624_v58 = vld [vmem:[%s8420_s14 + $0x1a8] sm:$0xff] }
 0x1f7   : > { %1960 = vmatpush1.bf16.msra.mxu1 %v5604_v61 }
 0x1f8   : > { %1961 = vmatprep.subr.bf16.mxu1 %v5613_v62  ;;  %v1439_v62 = vld [vmem:[#allocation5 + $0x10] sm:$0xff] }
 0x1fb   : > { %1962 = vmatpush1.bf16.msra.mxu1 %v5612_v63  ;;  %v6410_v63 = vld [vmem:[%s8418_s12 + $0x28] sm:$0xff]  }
 0x1fc   : > { %1963 = vmatprep.subr.bf16.mxu1 %v5621_v4 }
 0x1ff   : > { %1964 = vmatpush1.bf16.msra.mxu1 %v5620_v5  ;;  %v1437_v5 = vld [vmem:[#allocation5] sm:$0xff] }
 0x200   : > { %1965 = vmatprep.subr.bf16.mxu1 %v5629_v9 }
 0x203   : > { %1966 = vmatpush1.bf16.msra.mxu1 %v5628_v10  ;;  %v1440_v10 = vld [vmem:[#allocation5 + $0x18] sm:$0xff] }
 0x204   : > { %1967 = vmatprep.subr.bf16.mxu1 %v5637_v15  ;;  %v1438_v15 = vld [vmem:[#allocation5 + $0x8] sm:$0xff] }
 0x207   : > { %1968 = vmatpush1.bf16.msra.mxu1 %v5636_v14 }
 0x208   : > { %1969 = vmatprep.subr.bf16.mxu1 %v5645_v19  ;;  %v5641_v19 = vcombine.high %v1621_v6, %v1625_v7 }
 0x20b   : > { %1970 = vmatpush1.bf16.msra.mxu1 %v5644_v24 }
 0x20c   : > { %2041 = vmatprep.subr.bf16.mxu1 %v5593_v27  ;;  %v6412_v27 = vld [vmem:[%s8418_s12 + $0x38] sm:$0xff]  }
 0x2a1   : > { %v1104_v29 = vpop.f32.mrb[0].mxu1 }
 0x2a2   : > { %v1105_v30 = vadd.f32 %v5550_v28, %v1104_v29  ;;  %v6106_v31 = vpop.f32.mrb[1].mxu1 }
 0x2a3   : > { %v1107_v32 = vpop.f32.mrb[2].mxu1  ;;  %v1576_v31 = vld [vmem:[%s8420_s14 + $0x28] sm:$0xff] }
 0x2a4   : > { %v1108_v33 = vadd.f32 %v5550_v28, %v1107_v32  ;;  %v6107_v34 = vpop.f32.mrb[3].mxu1  ;;  %6485 = vtanh.f32 %v1105_v30  ;;  %v1572_v30 = vld [vmem:[%s8420_s14 + $0x8] sm:$0xff] }
 0x2a5   : > { %v1580_v34 = vld [vmem:[%s8420_s14 + $0x48] sm:$0xff]  ;;  %v5590_v36 = vcombine.low %v1572_v30, %v1576_v31 }
 0x2a6   : > { %6487 = vtanh.f32 %v1108_v33  ;;  %v5591_v33 = vcombine.high %v1572_v30, %v1576_v31  ;;  %v5598_v43 = vcombine.low %v1580_v34, %v1584_v35 }
 0x2ae   : > { %v7159_v37 = vpop.eup %6485 }
 0x2af   : > { %8498 = vst [vmem:[#allocation13_spill] sm:$0xff] %v7159_v37 }
 0x2b0   : > { %v7161_v38 = vpop.eup %6487 }
 0x2b1   : > { %8499 = vst [vmem:[#allocation14_spill] sm:$0xff] %v7161_v38  ;;  %v7165_v39 = vpack.c.bf16 %v7161_v38, %v7159_v37 }
 0x2b3   : > { %6125 = vmatmul.mubr.bf16.vlgmr.msra.gmra.mrb[4].mxu0 %v7165_v39  ;;  %1988 = vmatmul.mubr.bf16.vlgmr.msra.gmra.mrb[8].mxu1 %v7165_v39 }
 0x2b4   : > { %6149 = vmatpush3.bf16.msra.mxu0 %v6405_v26  ;;  %2042 = vmatpush1.bf16.msra.mxu1 %v5592_v23  ;;  %v1633_v23 = vld [vmem:[%s8420_s14 + $0x1f0] sm:$0xff]  ;;  %v5640_v26 = vcombine.low %v1621_v6, %v1625_v7  ;;  %v1582_v7 = vld [vmem:[%s8420_s14 + $0x58] sm:$0xff] }
 0x2b5   : > { %6150 = vmatprep.subr.bf16.mxu0 %v6406_v40  ;;  %2043 = vmatprep.subr.bf16.mxu1 %v5601_v41  ;;  %v5649_v29 = vcombine.high %v1629_v22, %v1633_v23  ;;  %v5648_v32 = vcombine.low %v1629_v22, %v1633_v23  ;;  %v1588_v41 = vld [vmem:[%s8420_s14 + $0x88] sm:$0xff] }
 0x2b6   : > { %2073 = vmatprep.mubr.bf16.mxu1 %v6694_v0  ;;  %v5606_v47 = vcombine.low %v1588_v41, %v1592_v42 }
 0x2b8   : > { %6151 = vmatpush3.bf16.msra.mxu0 %v6406_v40  ;;  %2044 = vmatpush1.bf16.msra.mxu1 %v5600_v44  ;;  %v5599_v40 = vcombine.high %v1580_v34, %v1584_v35  ;;  %v5607_v44 = vcombine.high %v1588_v41, %v1592_v42  ;;  %v2146_v41 = vld [vmem:[%s8421_s15 + $0x8] sm:$0xff] }
 0x2b9   : > { %6152 = vmatprep.subr.bf16.mxu0 %v6407_v45  ;;  %2045 = vmatprep.subr.bf16.mxu1 %v5609_v46  ;;  %v1600_v46 = vld [vmem:[%s8420_s14 + $0xe8] sm:$0xff] }
 0x2bc   : > { %6153 = vmatpush3.bf16.msra.mxu0 %v6407_v45  ;;  %2046 = vmatpush1.bf16.msra.mxu1 %v5608_v49  ;;  %v1596_v45 = vld [vmem:[%s8420_s14 + $0xc8] sm:$0xff] }
 0x2bd   : > { %6154 = vmatprep.subr.bf16.mxu0 %v6408_v50  ;;  %2047 = vmatprep.subr.bf16.mxu1 %v5617_v51  ;;  %v5615_v48 = vcombine.high %v1596_v45, %v1600_v46  ;;  %v1604_v49 = vld [vmem:[%s8420_s14 + $0x108] sm:$0xff]  ;;  %v5614_v51 = vcombine.low %v1596_v45, %v1600_v46  ;;  %v2161_v46 = vld [vmem:[%s8421_s15 + $0x80] sm:$0xff] }
 0x2be   : > { %v2154_v45 = vld [vmem:[%s8421_s15 + $0x48] sm:$0xff] }
 0x2c0   : > { %6155 = vmatpush3.bf16.msra.mxu0 %v6408_v50  ;;  %2048 = vmatpush1.bf16.msra.mxu1 %v5616_v54  ;;  %v1608_v50 = vld [vmem:[%s8420_s14 + $0x128] sm:$0xff] }
 0x2c1   : > { %6156 = vmatprep.subr.bf16.mxu0 %v6409_v55  ;;  %2049 = vmatprep.subr.bf16.mxu1 %v5625_v56  ;;  %v6146_v61 = vpop.f32.mrb[4].mxu1  ;;  %v5623_v52 = vcombine.high %v1604_v49, %v1608_v50  ;;  %v1616_v54 = vld [vmem:[%s8420_s14 + $0x168] sm:$0xff] }
 0x2c2   : > { %v1431_v3 = vadd.f32 %v6146_v61, %v5570_v59  ;;  %v1422_v4 = vpop.f32.mrb[5].mxu1  ;;  %v5631_v56 = vcombine.high %v1612_v53, %v1616_v54  ;;  %v1628_v61 = vld [vmem:[%s8420_s14 + $0x1c8] sm:$0xff] }
 0x2c3   : > { %v1423_v8 = vadd.f32 %v5570_v59, %v1422_v4  ;;  %v6147_v9 = vpop.f32.mrb[6].mxu1  ;;  %v1578_v4 = vld [vmem:[%s8420_s14 + $0x38] sm:$0xff] }
 0x2c4   : > { %6157 = vmatpush3.bf16.msra.mxu0 %v6409_v55  ;;  %2050 = vmatpush1.bf16.msra.mxu1 %v5624_v60  ;;  %v1443_v11 = vadd.f32 %v1439_v62, %v1431_v3  ;;  %v1434_v12 = vadd.f32 %v6147_v9, %v5570_v59  ;;  %v1425_v14 = vpop.f32.mrb[7].mxu1  ;;  %v5622_v55 = vcombine.low %v1604_v49, %v1608_v50  ;;  %v1632_v62 = vld [vmem:[%s8420_s14 + $0x1e8] sm:$0xff]  ;;  %v1574_v3 = vld [vmem:[%s8420_s14 + $0x18] sm:$0xff]  ;;  %v2177_v50 = vld [vmem:[%s8421_s15 + $0x100] sm:$0xff] }
 0x2c5   : > { %v1441_v16 = vadd.f32 %v1437_v5, %v1423_v8  ;;  %6158 = vmatprep.subr.bf16.mxu0 %v6410_v63  ;;  %2051 = vmatprep.subr.bf16.mxu1 %v5633_v2  ;;  %v1426_v17 = vadd.f32 %v5570_v59, %v1425_v14  ;;  %v5630_v59 = vcombine.low %v1612_v53, %v1616_v54  ;;  %v1586_v8 = vld [vmem:[%s8420_s14 + $0x78] sm:$0xff]  ;;  %v2185_v53 = vld [vmem:[%s8421_s15 + $0x140] sm:$0xff] }
 0x2c6   : > { %v1444_v20 = vadd.f32 %v1440_v10, %v1434_v12  ;;  %v5639_v60 = vcombine.high %v1620_v57, %v1624_v58  ;;  %v5647_v2 = vcombine.high %v1628_v61, %v1632_v62  ;;  %v5646_v5 = vcombine.low %v1628_v61, %v1632_v62  ;;  %v1594_v12 = vld [vmem:[%s8420_s14 + $0xb8] sm:$0xff]  ;;  %v2186_v61 = vld [vmem:[%s8421_s15 + $0x148] sm:$0xff] }
 0x2c7   : > { %v1442_v24 = vadd.f32 %v1438_v15, %v1426_v17  ;;  %v5595_v6 = vcombine.high %v1574_v3, %v1578_v4  ;;  %v5594_v9 = vcombine.low %v1574_v3, %v1578_v4  ;;  %v5603_v10 = vcombine.high %v1582_v7, %v1586_v8  ;;  %v1598_v15 = vld [vmem:[%s8420_s14 + $0xd8] sm:$0xff]  ;;  %v2194_v4 = vld [vmem:[%s8421_s15 + $0x188] sm:$0xff] }
 0x2c8   : > { %v1446_v25 = vpack.c.bf16 %v1444_v20, %v1443_v11  ;;  %6159 = vmatpush3.bf16.msra.mxu0 %v6410_v63  ;;  %2052 = vmatpush1.bf16.msra.mxu1 %v5632_v13  ;;  %v5638_v63 = vcombine.low %v1620_v57, %v1624_v58  ;;  %v1590_v11 = vld [vmem:[%s8420_s14 + $0x98] sm:$0xff]  ;;  %v5602_v13 = vcombine.low %v1582_v7, %v1586_v8  ;;  %v2193_v58 = vld [vmem:[%s8421_s15 + $0x180] sm:$0xff] }
 0x2c9   : > { %6160 = vmatprep.subr.bf16.mxu0 %v6411_v18  ;;  %2053 = vmatprep.subr.bf16.mxu1 %v5641_v19  ;;  %v1445_v28 = vpack.c.bf16 %v1442_v24, %v1441_v16  ;;  %v5611_v14 = vcombine.high %v1590_v11, %v1594_v12  ;;  %v1602_v16 = vld [vmem:[%s8420_s14 + $0xf8] sm:$0xff]  ;;  %v5610_v17 = vcombine.low %v1590_v11, %v1594_v12  ;;  %v2210_v11 = vld [vmem:[%s8421_s15 + $0x208] sm:$0xff] }
 0x2ca   : > { %v1606_v19 = vld [vmem:[%s8420_s14 + $0x118] sm:$0xff]  ;;  %v5618_v22 = vcombine.low %v1598_v15, %v1602_v16  ;;  %v5684_v62 = vcombine.low %v2177_v50, %v2185_v53 }
 0x2cb   : > { %6164 = vmatprep.mubr.bf16.mxu0 %v1445_v28  ;;  %v1610_v20 = vld [vmem:[%s8420_s14 + $0x138] sm:$0xff] }
 0x2cc   : > { %6161 = vmatpush3.bf16.msra.mxu0 %v6411_v18  ;;  %2054 = vmatpush1.bf16.msra.mxu1 %v5640_v26  ;;  %v5619_v18 = vcombine.high %v1598_v15, %v1602_v16  ;;  %v5627_v23 = vcombine.high %v1606_v19, %v1610_v20  ;;  %v1614_v24 = vld [vmem:[%s8420_s14 + $0x158] sm:$0xff]  ;;  %v5626_v26 = vcombine.low %v1606_v19, %v1610_v20  ;;  %v2226_v19 = vld [vmem:[%s8421_s15 + $0x288] sm:$0xff] }
 0x2cd   : > { %6162 = vmatprep.subr.bf16.mxu0 %v6412_v27  ;;  %2055 = vmatprep.subr.bf16.mxu1 %v5649_v29  ;;  %v1622_v28 = vld [vmem:[%s8420_s14 + $0x198] sm:$0xff] }
 0x2ce   : > { %v1626_v29 = vld [vmem:[%s8420_s14 + $0x1b8] sm:$0xff] }
 0x2cf   : > { %v5643_v31 = vcombine.high %v1622_v28, %v1626_v29  ;;  %v5642_v34 = vcombine.low %v1622_v28, %v1626_v29  ;;  %v2242_v28 = vld [vmem:[%s8421_s15 + $0x308] sm:$0xff] }
 0x2d0   : > { %6163 = vmatpush3.bf16.msra.mxu0 %v6412_v27  ;;  %2056 = vmatpush1.bf16.msra.mxu1 %v5648_v32  ;;  %v1630_v32 = vld [vmem:[%s8420_s14 + $0x1d8] sm:$0xff] }
 0x2d1   : > { %1998 = vmatprep.subr.bf16.mxu0 %v5591_v33  ;;  %v1634_v33 = vld [vmem:[%s8420_s14 + $0x1f8] sm:$0xff] }
 0x2d2   : > { %v5651_v35 = vcombine.high %v1630_v32, %v1634_v33  ;;  %v5650_v42 = vcombine.low %v1630_v32, %v1634_v33 }
 0x2d3   : > { %6165 = vmatmul.mubr.bf16.vlgmr.msra.gmra.mrb[8].mxu0 %v1446_v25  ;;  %2074 = vmatmul.mubr.bf16.vlgmr.msra.gmra.mrb[12].mxu1 %v7165_v39  ;;  %v1618_v25 = vld [vmem:[%s8420_s14 + $0x178] sm:$0xff] }
 0x2d4   : > { %1999 = vmatpush1.bf16.msra.mxu0 %v5590_v36  ;;  %2030 = vmatprep.mubr.bf16.mxu0 %v6694_v0  ;;  %v5635_v27 = vcombine.high %v1614_v24, %v1618_v25  ;;  %v5634_v30 = vcombine.low %v1614_v24, %v1618_v25  ;;  %v2145_v36 = vld [vmem:[%s8421_s15] sm:$0xff] }
 0x2d5   : > { %2000 = vmatprep.subr.bf16.mxu0 %v5599_v40  ;;  %2945 = vmatprep.mubr.bf16.mxu1 %v6694_v0  ;;  %v2153_v40 = vld [vmem:[%s8421_s15 + $0x40] sm:$0xff] }
 0x2d8   : > { %2001 = vmatpush1.bf16.msra.mxu0 %v5598_v43  ;;  %v5652_v43 = vcombine.low %v2145_v36, %v2153_v40 }
 0x2d9   : > { %2002 = vmatprep.subr.bf16.mxu0 %v5607_v44  ;;  %v5653_v44 = vcombine.high %v2145_v36, %v2153_v40  ;;  %v2258_v36 = vld [vmem:[%s8421_s15 + $0x388] sm:$0xff] }
 0x2db   : > { %2913 = vmatprep.subr.bf16.mxu1 %v5653_v44 }
 0x2dc   : > { %2003 = vmatpush1.bf16.msra.mxu0 %v5606_v47  ;;  %v2169_v47 = vld [vmem:[%s8421_s15 + $0xc0] sm:$0xff]  ;;  %2914 = vmatpush1.bf16.msra.mxu1 %v5652_v43 }
 0x2dd   : > { %2004 = vmatprep.subr.bf16.mxu0 %v5615_v48  ;;  %v5655_v48 = vcombine.high %v2146_v41, %v2154_v45  ;;  %v5669_v49 = vcombine.high %v2161_v46, %v2169_v47  ;;  %v5668_v54 = vcombine.low %v2161_v46, %v2169_v47  ;;  %v2155_v46 = vld [vmem:[%s8421_s15 + $0x50] sm:$0xff]  ;;  %v2148_v47 = vld [vmem:[%s8421_s15 + $0x18] sm:$0xff] }
 0x2df   : > { %2915 = vmatprep.subr.bf16.mxu1 %v5669_v49  ;;  %v2156_v49 = vld [vmem:[%s8421_s15 + $0x58] sm:$0xff] }
 0x2e0   : > { %2005 = vmatpush1.bf16.msra.mxu0 %v5614_v51  ;;  %v2162_v51 = vld [vmem:[%s8421_s15 + $0x88] sm:$0xff]  ;;  %2916 = vmatpush1.bf16.msra.mxu1 %v5668_v54 }
 0x2e1   : > { %2006 = vmatprep.subr.bf16.mxu0 %v5623_v52  ;;  %v2170_v52 = vld [vmem:[%s8421_s15 + $0xc8] sm:$0xff] }
 0x2e2   : > { %v5671_v57 = vcombine.high %v2162_v51, %v2170_v52 }
 0x2e4   : > { %2007 = vmatpush1.bf16.msra.mxu0 %v5622_v55  ;;  %v5654_v55 = vcombine.low %v2146_v41, %v2154_v45  ;;  %v2266_v41 = vld [vmem:[%s8421_s15 + $0x3c8] sm:$0xff]  ;;  %v2147_v45 = vld [vmem:[%s8421_s15 + $0x10] sm:$0xff] }
 0x2e5   : > { %2008 = vmatprep.subr.bf16.mxu0 %v5631_v56  ;;  %v5685_v56 = vcombine.high %v2177_v50, %v2185_v53  ;;  %v5766_v43 = vcombine.low %v2258_v36, %v2266_v41  ;;  %v5767_v44 = vcombine.high %v2258_v36, %v2266_v41  ;;  %v5656_v50 = vcombine.low %v2147_v45, %v2155_v46  ;;  %v5559_v53 = vld [vmem:[%s8500_s3] ss:$0 sm:$0xff]  ;;  %v2195_v36 = vld [vmem:[%s8421_s15 + $0x190] sm:$0xff] }
 0x2e6   : > { %v2203_v41 = vld [vmem:[%s8421_s15 + $0x1d0] sm:$0xff] }
 0x2e7   : > { %2917 = vmatprep.subr.bf16.mxu1 %v5685_v56 }
 0x2e8   : > { %2009 = vmatpush1.bf16.msra.mxu0 %v5630_v59  ;;  %v2201_v59 = vld [vmem:[%s8421_s15 + $0x1c0] sm:$0xff]  ;;  %2918 = vmatpush1.bf16.msra.mxu1 %v5684_v62 }
 0x2e9   : > { %2010 = vmatprep.subr.bf16.mxu0 %v5639_v60  ;;  %v2178_v60 = vld [vmem:[%s8421_s15 + $0x108] sm:$0xff] }
 0x2ea   : > { %v5687_v3 = vcombine.high %v2178_v60, %v2186_v61 }
 0x2ec   : > { %2011 = vmatpush1.bf16.msra.mxu0 %v5638_v63  ;;  %v5670_v63 = vcombine.low %v2162_v51, %v2170_v52  ;;  %v5658_v51 = vcombine.low %v2148_v47, %v2156_v49  ;;  %v5659_v52 = vcombine.high %v2148_v47, %v2156_v49 }
 0x2ed   : > { %2012 = vmatprep.subr.bf16.mxu0 %v5647_v2  ;;  %v5701_v2 = vcombine.high %v2193_v58, %v2201_v59 }
 0x2ef   : > { %2919 = vmatprep.subr.bf16.mxu1 %v5701_v2 }
 0x2f0   : > { %2013 = vmatpush1.bf16.msra.mxu0 %v5646_v5  ;;  %v2202_v5 = vld [vmem:[%s8421_s15 + $0x1c8] sm:$0xff] }
 0x2f1   : > { %2084 = vmatprep.subr.bf16.mxu0 %v5595_v6  ;;  %v5686_v6 = vcombine.low %v2178_v60, %v2186_v61  ;;  %v5703_v7 = vcombine.high %v2194_v4, %v2202_v5  ;;  %v5702_v8 = vcombine.low %v2194_v4, %v2202_v5  ;;  %v5579_v4 = vld [vmem:[%s8419_s13] ss:$0 sm:$0xff] }
 0x2f3   : > { %2031 = vmatmul.mubr.bf16.vlgmr.msra.gmra.mrb[12].mxu0 %v7165_v39 }
 0x2f4   : > { %2085 = vmatpush1.bf16.msra.mxu0 %v5594_v9  ;;  %2116 = vmatprep.mubr.bf16.mxu0 %v6694_v0  ;;  %v2209_v9 = vld [vmem:[%s8421_s15 + $0x200] sm:$0xff] }
 0x2f5   : > { %2086 = vmatprep.subr.bf16.mxu0 %v5603_v10  ;;  %v2217_v10 = vld [vmem:[%s8421_s15 + $0x240] sm:$0xff] }
 0x2f6   : > { %v5717_v12 = vcombine.high %v2209_v9, %v2217_v10 }
 0x2f8   : > { %2087 = vmatpush1.bf16.msra.mxu0 %v5602_v13  ;;  %v2218_v13 = vld [vmem:[%s8421_s15 + $0x248] sm:$0xff] }
 0x2f9   : > { %2088 = vmatprep.subr.bf16.mxu0 %v5611_v14  ;;  %v5716_v14 = vcombine.low %v2209_v9, %v2217_v10  ;;  %v5718_v15 = vcombine.low %v2210_v11, %v2218_v13  ;;  %v5719_v16 = vcombine.high %v2210_v11, %v2218_v13 }
 0x2fc   : > { %2089 = vmatpush1.bf16.msra.mxu0 %v5610_v17  ;;  %v2225_v17 = vld [vmem:[%s8421_s15 + $0x280] sm:$0xff] }
 0x2fd   : > { %2090 = vmatprep.subr.bf16.mxu0 %v5619_v18  ;;  %v2233_v18 = vld [vmem:[%s8421_s15 + $0x2c0] sm:$0xff] }
 0x2fe   : > { %v5733_v20 = vcombine.high %v2225_v17, %v2233_v18 }
 0x300   : > { %2091 = vmatpush1.bf16.msra.mxu0 %v5618_v22  ;;  %v2234_v22 = vld [vmem:[%s8421_s15 + $0x2c8] sm:$0xff] }
 0x301   : > { %2092 = vmatprep.subr.bf16.mxu0 %v5627_v23  ;;  %v5732_v23 = vcombine.low %v2225_v17, %v2233_v18  ;;  %v5734_v24 = vcombine.low %v2226_v19, %v2234_v22  ;;  %v5735_v25 = vcombine.high %v2226_v19, %v2234_v22  ;;  %v2163_v18 = vld [vmem:[%s8421_s15 + $0x90] sm:$0xff]  ;;  %v2172_v22 = vld [vmem:[%s8421_s15 + $0xd8] sm:$0xff] }
 0x302   : > { %v2171_v19 = vld [vmem:[%s8421_s15 + $0xd0] sm:$0xff] }
 0x304   : > { %2093 = vmatpush1.bf16.msra.mxu0 %v5626_v26  ;;  %v2241_v26 = vld [vmem:[%s8421_s15 + $0x300] sm:$0xff] }
 0x305   : > { %2094 = vmatprep.subr.bf16.mxu0 %v5635_v27  ;;  %v2249_v27 = vld [vmem:[%s8421_s15 + $0x340] sm:$0xff] }
 0x306   : > { %v5749_v29 = vcombine.high %v2241_v26, %v2249_v27 }
 0x308   : > { %2095 = vmatpush1.bf16.msra.mxu0 %v5634_v30  ;;  %v2250_v30 = vld [vmem:[%s8421_s15 + $0x348] sm:$0xff] }
 0x309   : > { %2096 = vmatprep.subr.bf16.mxu0 %v5643_v31  ;;  %v5748_v31 = vcombine.low %v2241_v26, %v2249_v27  ;;  %v5750_v32 = vcombine.low %v2242_v28, %v2250_v30  ;;  %v5751_v33 = vcombine.high %v2242_v28, %v2250_v30  ;;  %v5673_v26 = vcombine.high %v2163_v18, %v2171_v19  ;;  %v2179_v28 = vld [vmem:[%s8421_s15 + $0x110] sm:$0xff]  ;;  %v2180_v30 = vld [vmem:[%s8421_s15 + $0x118] sm:$0xff] }
 0x30c   : > { %2097 = vmatpush1.bf16.msra.mxu0 %v5642_v34  ;;  %v2257_v34 = vld [vmem:[%s8421_s15 + $0x380] sm:$0xff] }
 0x30d   : > { %2098 = vmatprep.subr.bf16.mxu0 %v5651_v35  ;;  %v2265_v35 = vld [vmem:[%s8421_s15 + $0x3c0] sm:$0xff] }
 0x30e   : > { %v5765_v40 = vcombine.high %v2257_v34, %v2265_v35 }
 0x310   : > { %2099 = vmatpush1.bf16.msra.mxu0 %v5650_v42  ;;  %v5764_v42 = vcombine.low %v2257_v34, %v2265_v35 }
 0x311   : > { %2966 = vmatprep.subr.bf16.mxu0 %v5655_v48  ;;  %v5657_v48 = vcombine.high %v2147_v45, %v2155_v46 }
 0x313   : > { %2117 = vmatmul.mubr.bf16.vlgmr.msra.gmra.mrb[16].mxu0 %v7165_v39  ;;  %v5700_v39 = vcombine.low %v2193_v58, %v2201_v59 }
 0x314   : > { %2967 = vmatpush1.bf16.msra.mxu0 %v5654_v55  ;;  %2998 = vmatprep.mubr.bf16.mxu0 %v6694_v0 }
 0x315   : > { %2968 = vmatprep.subr.bf16.mxu0 %v5671_v57  ;;  %2920 = vmatpush1.bf16.msra.mxu1 %v5700_v39 }
 0x316   : > { %2921 = vmatprep.subr.bf16.mxu1 %v5717_v12 }
 0x318   : > { %2969 = vmatpush1.bf16.msra.mxu0 %v5670_v63 }
 0x319   : > { %2970 = vmatprep.subr.bf16.mxu0 %v5687_v3  ;;  %2922 = vmatpush1.bf16.msra.mxu1 %v5716_v14 }
 0x31a   : > { %2923 = vmatprep.subr.bf16.mxu1 %v5733_v20  ;;  %v2164_v20 = vld [vmem:[%s8421_s15 + $0x98] sm:$0xff] }
 0x31b   : > { %v5675_v27 = vcombine.high %v2164_v20, %v2172_v22 }
 0x31c   : > { %2971 = vmatpush1.bf16.msra.mxu0 %v5686_v6 }
 0x31d   : > { %2972 = vmatprep.subr.bf16.mxu0 %v5703_v7  ;;  %2924 = vmatpush1.bf16.msra.mxu1 %v5732_v23 }
 0x31e   : > { %2925 = vmatprep.subr.bf16.mxu1 %v5749_v29  ;;  %v2187_v29 = vld [vmem:[%s8421_s15 + $0x150] sm:$0xff] }
 0x31f   : > { %v5689_v34 = vcombine.high %v2179_v28, %v2187_v29  ;;  %v5688_v45 = vcombine.low %v2179_v28, %v2187_v29 }
 0x320   : > { %2973 = vmatpush1.bf16.msra.mxu0 %v5702_v8 }
 0x321   : > { %2974 = vmatprep.subr.bf16.mxu0 %v5719_v16  ;;  %2926 = vmatpush1.bf16.msra.mxu1 %v5748_v31  ;;  %v2188_v31 = vld [vmem:[%s8421_s15 + $0x158] sm:$0xff] }
 0x322   : > { %2927 = vmatprep.subr.bf16.mxu1 %v5765_v40  ;;  %v5691_v35 = vcombine.high %v2180_v30, %v2188_v31  ;;  %v5690_v46 = vcombine.low %v2180_v30, %v2188_v31 }
 0x324   : > { %2975 = vmatpush1.bf16.msra.mxu0 %v5718_v15 }
 0x325   : > { %2976 = vmatprep.subr.bf16.mxu0 %v5735_v25  ;;  %2928 = vmatpush1.bf16.msra.mxu1 %v5764_v42  ;;  %v2196_v42 = vld [vmem:[%s8421_s15 + $0x198] sm:$0xff] }
 0x326   : > { %3019 = vmatprep.subr.bf16.mxu1 %v5657_v48  ;;  %v5705_v48 = vcombine.high %v2195_v36, %v2203_v41 }
 0x328   : > { %2977 = vmatpush1.bf16.msra.mxu0 %v5734_v24 }
 0x329   : > { %2978 = vmatprep.subr.bf16.mxu0 %v5751_v33  ;;  %v5674_v33 = vcombine.low %v2164_v20, %v2172_v22  ;;  %v2244_v20 = vld [vmem:[%s8421_s15 + $0x318] sm:$0xff] }
 0x32a   : > { %v2252_v22 = vld [vmem:[%s8421_s15 + $0x358] sm:$0xff] }
 0x32c   : > { %2979 = vmatpush1.bf16.msra.mxu0 %v5750_v32  ;;  %v5672_v32 = vcombine.low %v2163_v18, %v2171_v19  ;;  %v2251_v19 = vld [vmem:[%s8421_s15 + $0x350] sm:$0xff] }
 0x32d   : > { %2980 = vmatprep.subr.bf16.mxu0 %v5767_v44 }
 0x330   : > { %2981 = vmatpush1.bf16.msra.mxu0 %v5766_v43  ;;  %v2204_v43 = vld [vmem:[%s8421_s15 + $0x1d8] sm:$0xff] }
 0x331   : > { %3072 = vmatprep.subr.bf16.mxu0 %v5659_v52  ;;  %v5707_v49 = vcombine.high %v2196_v42, %v2204_v43  ;;  %v2212_v52 = vld [vmem:[%s8421_s15 + $0x218] sm:$0xff] }
 0x386   : > { %v1219_v54 = vpop.f32.mrb[4].mxu0  ;;  %v7450_v55 = vpop.f32.mrb[8].mxu1 }
 0x387   : > { %v1220_v56 = vadd.f32 %v5559_v53, %v1219_v54  ;;  %v6126_v57 = vpop.f32.mrb[5].mxu0  ;;  %v7452_v58 = vpop.f32.mrb[9].mxu1  ;;  %v5704_v54 = vcombine.low %v2195_v36, %v2203_v41  ;;  %v2268_v36 = vld [vmem:[%s8421_s15 + $0x3d8] sm:$0xff] }
 0x388   : > { %v1222_v59 = vpop.f32.mrb[6].mxu0  ;;  %v7454_v60 = vpop.f32.mrb[10].mxu1 }
 0x389   : > { %1226 = vst [vmem:[%s7448_s24] sm:$0xff] %v1220_v56  ;;  %v1223_v61 = vadd.f32 %v5559_v53, %v1222_v59  ;;  %v2127_v62 = vpack.c.bf16 %v7454_v60, %v7450_v55  ;;  %v6127_v63 = vpop.f32.mrb[7].mxu0  ;;  %v7459_v2 = vpop.f32.mrb[11].mxu1  ;;  %v2220_v53 = vld [vmem:[%s8421_s15 + $0x258] sm:$0xff]  ;;  %v5706_v56 = vcombine.low %v2196_v42, %v2204_v43  ;;  %v5754_v42 = vcombine.low %v2244_v20, %v2252_v22 }
 0x38a   : > { %v5723_v59 = vcombine.high %v2212_v52, %v2220_v53  ;;  %v2235_v63 = vld [vmem:[%s8421_s15 + $0x2d0] sm:$0xff] }
 0x38b   : > { %1227 = vst [vmem:[%s7448_s24 + $0x8] sm:$0xff] %v1223_v61  ;;  %v2227_v61 = vld [vmem:[%s8421_s15 + $0x290] sm:$0xff] }
 0x38c   : > { %v5736_v29 = vcombine.low %v2227_v61, %v2235_v63 }
 0x3a6   : > { %v6166_v5 = vpop.f32.mrb[8].mxu0  ;;  %v7467_v39 = vpop.f32.mrb[12].mxu1 }
 0x3a7   : > { %v1552_v6 = vpop.f32.mrb[9].mxu0  ;;  %v7469_v7 = vpop.f32.mrb[13].mxu1  ;;  %v1561_v17 = vadd.f32 %v6166_v5, %v5579_v4  ;;  %v2236_v5 = vld [vmem:[%s8421_s15 + $0x2d8] sm:$0xff] }
 0x3a8   : > { %v1553_v8 = vadd.f32 %v5579_v4, %v1552_v6  ;;  %v6167_v9 = vpop.f32.mrb[10].mxu0  ;;  %v7471_v10 = vpop.f32.mrb[14].mxu1 }
 0x3a9   : > { %v1555_v12 = vpop.f32.mrb[11].mxu0  ;;  %v7475_v13 = vpop.f32.mrb[15].mxu1  ;;  %v1564_v16 = vadd.f32 %v6167_v9, %v5579_v4  ;;  %v5722_v9 = vcombine.low %v2212_v52, %v2220_v53 }
 0x3aa   : > { %v1556_v14 = vadd.f32 %v5579_v4, %v1555_v12  ;;  %6489 = vtanh.f32 %v1553_v8  ;;  %v2228_v4 = vld [vmem:[%s8421_s15 + $0x298] sm:$0xff] }
 0x3ab   : > { %v5738_v30 = vcombine.low %v2228_v4, %v2236_v5 }
 0x3ac   : > { %6491 = vtanh.f32 %v1556_v14  ;;  %v5737_v14 = vcombine.high %v2227_v61, %v2235_v63  ;;  %v2174_v61 = vld [vmem:[%s8421_s15 + $0xe8] sm:$0xff] }
 0x3ad   : > { %6493 = vtanh.f32 %v1564_v16  ;;  %v5739_v16 = vcombine.high %v2228_v4, %v2236_v5 }
 0x3ae   : > { %6495 = vtanh.f32 %v1561_v17  ;;  %v2243_v17 = vld [vmem:[%s8421_s15 + $0x310] sm:$0xff] }
 0x3af   : > { %v5753_v31 = vcombine.high %v2243_v17, %v2251_v19  ;;  %v5752_v41 = vcombine.low %v2243_v17, %v2251_v19  ;;  %v2190_v17 = vld [vmem:[%s8421_s15 + $0x168] sm:$0xff] }
 0x3b4   : > { %v7491_v23 = vpop.eup %6489 }
 0x3b5   : > { %8501 = vst [vmem:[#allocation15_spill] sm:$0xff] %v7491_v23 }
 0x3b6   : > { %v7493_v24 = vpop.eup %6491 }
 0x3b7   : > { %8502 = vst [vmem:[#allocation16_spill] sm:$0xff] %v7493_v24  ;;  %v7497_v25 = vpack.c.bf16 %v7493_v24, %v7491_v23  ;;  %v7516_v40 = vpop.eup %6493 }
 0x3b8   : > { %8503 = vst [vmem:[#allocation17_spill] sm:$0xff] %v7516_v40  ;;  %v7529_v44 = vpop.eup %6495 }
 0x3b9   : > { %2946 = vmatmul.mubr.bf16.vlgmr.msra.gmra.mrb[16].mxu1 %v7497_v25  ;;  %2999 = vmatmul.mubr.bf16.vlgmr.msra.gmra.mrb[20].mxu0 %v7497_v25  ;;  %8504 = vst [vmem:[#allocation18_spill] sm:$0xff] %v7529_v44  ;;  %v7533_v47 = vpack.c.bf16 %v7516_v40, %v7529_v44 }
 0x3ba   : > { %3020 = vmatpush1.bf16.msra.mxu1 %v5656_v50  ;;  %3073 = vmatpush1.bf16.msra.mxu0 %v5658_v51  ;;  %v2211_v50 = vld [vmem:[%s8421_s15 + $0x210] sm:$0xff] }
 0x3bb   : > { %3021 = vmatprep.subr.bf16.mxu1 %v5673_v26  ;;  %3074 = vmatprep.subr.bf16.mxu0 %v5675_v27  ;;  %v2219_v51 = vld [vmem:[%s8421_s15 + $0x250] sm:$0xff] }
 0x3bc   : > { %2955 = vmatprep.mubr.bf16.mxu1 %v6694_v0  ;;  %3008 = vmatprep.mubr.bf16.mxu0 %v6694_v0  ;;  %v5721_v57 = vcombine.high %v2211_v50, %v2219_v51  ;;  %v5720_v8 = vcombine.low %v2211_v50, %v2219_v51  ;;  %v2158_v50 = vld [vmem:[%s8421_s15 + $0x68] sm:$0xff] }
 0x3be   : > { %3022 = vmatpush1.bf16.msra.mxu1 %v5672_v32  ;;  %3075 = vmatpush1.bf16.msra.mxu0 %v5674_v33  ;;  %v5755_v32 = vcombine.high %v2244_v20, %v2252_v22  ;;  %v2259_v33 = vld [vmem:[%s8421_s15 + $0x390] sm:$0xff] }
 0x3bf   : > { %3023 = vmatprep.subr.bf16.mxu1 %v5689_v34  ;;  %3076 = vmatprep.subr.bf16.mxu0 %v5691_v35  ;;  %v2267_v34 = vld [vmem:[%s8421_s15 + $0x3d0] sm:$0xff]  ;;  %v2260_v35 = vld [vmem:[%s8421_s15 + $0x398] sm:$0xff] }
 0x3c0   : > { %v5769_v43 = vcombine.high %v2259_v33, %v2267_v34  ;;  %v5768_v51 = vcombine.low %v2259_v33, %v2267_v34  ;;  %v5770_v52 = vcombine.low %v2260_v35, %v2268_v36  ;;  %v2206_v33 = vld [vmem:[%s8421_s15 + $0x1e8] sm:$0xff] }
 0x3c1   : > { %2956 = vmatmul.mubr.bf16.gmra.mrb[20].mxu1 %v7533_v47  ;;  %3009 = vmatmul.mubr.bf16.gmra.mrb[24].mxu0 %v7533_v47 }
 0x3c2   : > { %3024 = vmatpush1.bf16.msra.mxu1 %v5688_v45  ;;  %3077 = vmatpush1.bf16.msra.mxu0 %v5690_v46  ;;  %v5771_v45 = vcombine.high %v2260_v35, %v2268_v36  ;;  %v2149_v46 = vld [vmem:[%s8421_s15 + $0x20] sm:$0xff] }
 0x3c3   : > { %3025 = vmatprep.subr.bf16.mxu1 %v5705_v48  ;;  %3078 = vmatprep.subr.bf16.mxu0 %v5707_v49  ;;  %v2157_v48 = vld [vmem:[%s8421_s15 + $0x60] sm:$0xff]  ;;  %v2150_v49 = vld [vmem:[%s8421_s15 + $0x28] sm:$0xff] }
 0x3c4   : > { %3051 = vmatprep.mubr.bf16.mxu1 %v6694_v0  ;;  %3104 = vmatprep.mubr.bf16.mxu0 %v6694_v0  ;;  %v5661_v53 = vcombine.high %v2149_v46, %v2157_v48  ;;  %v5660_v63 = vcombine.low %v2149_v46, %v2157_v48  ;;  %v5662_v4 = vcombine.low %v2150_v49, %v2158_v50  ;;  %v2222_v46 = vld [vmem:[%s8421_s15 + $0x268] sm:$0xff] }
 0x3c6   : > { %3026 = vmatpush1.bf16.msra.mxu1 %v5704_v54  ;;  %3079 = vmatpush1.bf16.msra.mxu0 %v5706_v56  ;;  %v7563_v6 = vpop.f32.mrb[12].mxu0  ;;  %v5663_v54 = vcombine.high %v2150_v49, %v2158_v50  ;;  %v2165_v56 = vld [vmem:[%s8421_s15 + $0xa0] sm:$0xff] }
 0x3c7   : > { %v7565_v12 = vpop.f32.mrb[13].mxu0  ;;  %3027 = vmatprep.subr.bf16.mxu1 %v5721_v57  ;;  %3080 = vmatprep.subr.bf16.mxu0 %v5723_v59  ;;  %v2173_v57 = vld [vmem:[%s8421_s15 + $0xe0] sm:$0xff]  ;;  %v2166_v59 = vld [vmem:[%s8421_s15 + $0xa8] sm:$0xff] }
 0x3c8   : > { %v7570_v18 = vpop.f32.mrb[14].mxu0  ;;  %v5677_v5 = vcombine.high %v2165_v56, %v2173_v57  ;;  %v5676_v19 = vcombine.low %v2165_v56, %v2173_v57  ;;  %v5678_v20 = vcombine.low %v2166_v59, %v2174_v61  ;;  %v2238_v56 = vld [vmem:[%s8421_s15 + $0x2e8] sm:$0xff] }
 0x3c9   : > { %v7583_v27 = vpop.f32.mrb[15].mxu0 }
 0x3ca   : > { %3028 = vmatpush1.bf16.msra.mxu1 %v5720_v8  ;;  %3081 = vmatpush1.bf16.msra.mxu0 %v5722_v9  ;;  %v5679_v8 = vcombine.high %v2166_v59, %v2174_v61  ;;  %v2181_v9 = vld [vmem:[%s8421_s15 + $0x120] sm:$0xff] }
 0x3cb   : > { %3029 = vmatprep.subr.bf16.mxu1 %v5737_v14  ;;  %3082 = vmatprep.subr.bf16.mxu0 %v5739_v16  ;;  %v2189_v14 = vld [vmem:[%s8421_s15 + $0x160] sm:$0xff]  ;;  %v2182_v16 = vld [vmem:[%s8421_s15 + $0x128] sm:$0xff] }
 0x3cc   : > { %v5693_v22 = vcombine.high %v2181_v9, %v2189_v14  ;;  %v5692_v34 = vcombine.low %v2181_v9, %v2189_v14  ;;  %v5694_v35 = vcombine.low %v2182_v16, %v2190_v17  ;;  %v2253_v14 = vld [vmem:[%s8421_s15 + $0x360] sm:$0xff] }
 0x3ce   : > { %3030 = vmatpush1.bf16.msra.mxu1 %v5736_v29  ;;  %3083 = vmatpush1.bf16.msra.mxu0 %v5738_v30  ;;  %v5695_v29 = vcombine.high %v2182_v16, %v2190_v17  ;;  %v2197_v30 = vld [vmem:[%s8421_s15 + $0x1a0] sm:$0xff]  ;;  %v2246_v16 = vld [vmem:[%s8421_s15 + $0x328] sm:$0xff] }
 0x3cf   : > { %3031 = vmatprep.subr.bf16.mxu1 %v5753_v31  ;;  %3084 = vmatprep.subr.bf16.mxu0 %v5755_v32  ;;  %v2205_v31 = vld [vmem:[%s8421_s15 + $0x1e0] sm:$0xff]  ;;  %v2198_v32 = vld [vmem:[%s8421_s15 + $0x1a8] sm:$0xff] }
 0x3d0   : > { %v5709_v36 = vcombine.high %v2197_v30, %v2205_v31  ;;  %v5708_v48 = vcombine.low %v2197_v30, %v2205_v31  ;;  %v5710_v49 = vcombine.low %v2198_v32, %v2206_v33  ;;  %v2254_v17 = vld [vmem:[%s8421_s15 + $0x368] sm:$0xff] }
 0x3d2   : > { %3032 = vmatpush1.bf16.msra.mxu1 %v5752_v41  ;;  %3085 = vmatpush1.bf16.msra.mxu0 %v5754_v42  ;;  %v5711_v41 = vcombine.high %v2198_v32, %v2206_v33  ;;  %v2213_v42 = vld [vmem:[%s8421_s15 + $0x220] sm:$0xff]  ;;  %v5759_v32 = vcombine.high %v2246_v16, %v2254_v17 }
 0x3d3   : > { %3033 = vmatprep.subr.bf16.mxu1 %v5769_v43  ;;  %3086 = vmatprep.subr.bf16.mxu0 %v5771_v45  ;;  %v2221_v43 = vld [vmem:[%s8421_s15 + $0x260] sm:$0xff]  ;;  %v2214_v45 = vld [vmem:[%s8421_s15 + $0x228] sm:$0xff] }
 0x3d4   : > { %v5725_v50 = vcombine.high %v2213_v42, %v2221_v43  ;;  %v5724_v59 = vcombine.low %v2213_v42, %v2221_v43  ;;  %v5726_v61 = vcombine.low %v2214_v45, %v2222_v46  ;;  %v2261_v33 = vld [vmem:[%s8421_s15 + $0x3a0] sm:$0xff]  ;;  %v5758_v42 = vcombine.low %v2246_v16, %v2254_v17  ;;  %v2183_v17 = vld [vmem:[%s8421_s15 + $0x130] sm:$0xff] }
 0x3d6   : > { %3034 = vmatpush1.bf16.msra.mxu1 %v5768_v51  ;;  %3087 = vmatpush1.bf16.msra.mxu0 %v5770_v52  ;;  %v5727_v51 = vcombine.high %v2214_v45, %v2222_v46  ;;  %v2229_v52 = vld [vmem:[%s8421_s15 + $0x2a0] sm:$0xff]  ;;  %v2151_v46 = vld [vmem:[%s8421_s15 + $0x30] sm:$0xff] }
 0x3d7   : > { %3125 = vmatprep.subr.bf16.mxu1 %v5661_v53  ;;  %3178 = vmatprep.subr.bf16.mxu0 %v5663_v54  ;;  %v2237_v53 = vld [vmem:[%s8421_s15 + $0x2e0] sm:$0xff]  ;;  %v2230_v54 = vld [vmem:[%s8421_s15 + $0x2a8] sm:$0xff] }
 0x3d8   : > { %v5742_v30 = vcombine.low %v2230_v54, %v2238_v56 }
 0x3d9   : > { %3052 = vmatmul.mubr.bf16.vlgmr.msra.gmra.mrb[24].mxu1 %v7497_v25  ;;  %3105 = vmatmul.mubr.bf16.vlgmr.msra.gmra.mrb[28].mxu0 %v7497_v25 }
 0x3da   : > { %3126 = vmatpush1.bf16.msra.mxu1 %v5660_v63  ;;  %3179 = vmatpush1.bf16.msra.mxu0 %v5662_v4  ;;  %v5741_v4 = vcombine.high %v2229_v52, %v2237_v53 }
 0x3db   : > { %3127 = vmatprep.subr.bf16.mxu1 %v5677_v5  ;;  %3180 = vmatprep.subr.bf16.mxu0 %v5679_v8  ;;  %v5743_v5 = vcombine.high %v2230_v54, %v2238_v56  ;;  %v2245_v8 = vld [vmem:[%s8421_s15 + $0x320] sm:$0xff]  ;;  %v2167_v56 = vld [vmem:[%s8421_s15 + $0xb0] sm:$0xff] }
 0x3dc   : > { %3061 = vmatprep.mubr.bf16.mxu1 %v6694_v0  ;;  %3114 = vmatprep.mubr.bf16.mxu0 %v6694_v0  ;;  %v5757_v31 = vcombine.high %v2245_v8, %v2253_v14 }
 0x3de   : > { %3128 = vmatpush1.bf16.msra.mxu1 %v5676_v19  ;;  %3181 = vmatpush1.bf16.msra.mxu0 %v5678_v20 }
 0x3df   : > { %3129 = vmatprep.subr.bf16.mxu1 %v5693_v22  ;;  %3182 = vmatprep.subr.bf16.mxu0 %v5695_v29  ;;  %v5740_v29 = vcombine.low %v2229_v52, %v2237_v53 }
 0x3e1   : > { %3062 = vmatmul.mubr.bf16.gmra.mrb[28].mxu1 %v7533_v47  ;;  %3115 = vmatmul.mubr.bf16.gmra.mrb[32].mxu0 %v7533_v47 }
 0x3e2   : > { %3130 = vmatpush1.bf16.msra.mxu1 %v5692_v34  ;;  %3183 = vmatpush1.bf16.msra.mxu0 %v5694_v35  ;;  %v2269_v34 = vld [vmem:[%s8421_s15 + $0x3e0] sm:$0xff]  ;;  %v2262_v35 = vld [vmem:[%s8421_s15 + $0x3a8] sm:$0xff] }
 0x3e3   : > { %3131 = vmatprep.subr.bf16.mxu1 %v5709_v36  ;;  %3184 = vmatprep.subr.bf16.mxu0 %v5711_v41  ;;  %v2270_v36 = vld [vmem:[%s8421_s15 + $0x3e8] sm:$0xff]  ;;  %v5756_v41 = vcombine.low %v2245_v8, %v2253_v14  ;;  %v5773_v43 = vcombine.high %v2261_v33, %v2269_v34 }
 0x3e4   : > { %3157 = vmatprep.mubr.bf16.mxu1 %v6694_v0  ;;  %3210 = vmatprep.mubr.bf16.mxu0 %v6694_v0  ;;  %v5775_v45 = vcombine.high %v2262_v35, %v2270_v36  ;;  %v5774_v52 = vcombine.low %v2262_v35, %v2270_v36  ;;  %v2199_v36 = vld [vmem:[%s8421_s15 + $0x1b0] sm:$0xff] }
 0x3e6   : > { %3132 = vmatpush1.bf16.msra.mxu1 %v5708_v48  ;;  %3185 = vmatpush1.bf16.msra.mxu0 %v5710_v49  ;;  %v7679_v57 = vpop.f32.mrb[16].mxu0  ;;  %v2159_v48 = vld [vmem:[%s8421_s15 + $0x70] sm:$0xff]  ;;  %v2152_v49 = vld [vmem:[%s8421_s15 + $0x38] sm:$0xff] }
 0x3e7   : > { %8505 = vst [vmem:[#allocation19_spill] sm:$0xff] %v7679_v57  ;;  %v7681_v63 = vpop.f32.mrb[17].mxu0  ;;  %3133 = vmatprep.subr.bf16.mxu1 %v5725_v50  ;;  %3186 = vmatprep.subr.bf16.mxu0 %v5727_v51  ;;  %v2160_v50 = vld [vmem:[%s8421_s15 + $0x78] sm:$0xff]  ;;  %v5772_v51 = vcombine.low %v2261_v33, %v2269_v34  ;;  %v5665_v53 = vcombine.high %v2151_v46, %v2159_v48 }
 0x3e8   : > { %8506 = vst [vmem:[#allocation20_spill] sm:$0xff] %v7681_v63  ;;  %v7686_v9 = vpop.f32.mrb[18].mxu0  ;;  %v5667_v54 = vcombine.high %v2152_v49, %v2160_v50  ;;  %v5666_v8 = vcombine.low %v2152_v49, %v2160_v50  ;;  %v2215_v50 = vld [vmem:[%s8421_s15 + $0x230] sm:$0xff] }
 0x3e9   : > { %8507 = vst [vmem:[#allocation21_spill] sm:$0xff] %v7686_v9  ;;  %v7699_v20 = vpop.f32.mrb[19].mxu0 }
 0x3ea   : > { %8508 = vst [vmem:[#allocation22_spill] sm:$0xff] %v7699_v20  ;;  %3134 = vmatpush1.bf16.msra.mxu1 %v5724_v59  ;;  %3187 = vmatpush1.bf16.msra.mxu0 %v5726_v61  ;;  %v2175_v59 = vld [vmem:[%s8421_s15 + $0xf0] sm:$0xff]  ;;  %v2168_v61 = vld [vmem:[%s8421_s15 + $0xb8] sm:$0xff] }
 0x3eb   : > { %3135 = vmatprep.subr.bf16.mxu1 %v5741_v4  ;;  %3188 = vmatprep.subr.bf16.mxu0 %v5743_v5  ;;  %v2176_v4 = vld [vmem:[%s8421_s15 + $0xf8] sm:$0xff]  ;;  %v5664_v5 = vcombine.low %v2151_v46, %v2159_v48  ;;  %v5681_v14 = vcombine.high %v2167_v56, %v2175_v59 }
 0x3ec   : > { %v5683_v16 = vcombine.high %v2168_v61, %v2176_v4  ;;  %v5682_v33 = vcombine.low %v2168_v61, %v2176_v4  ;;  %v2231_v4 = vld [vmem:[%s8421_s15 + $0x2b0] sm:$0xff] }
 0x3ee   : > { %3136 = vmatpush1.bf16.msra.mxu1 %v5740_v29  ;;  %3189 = vmatpush1.bf16.msra.mxu0 %v5742_v30  ;;  %v2191_v29 = vld [vmem:[%s8421_s15 + $0x170] sm:$0xff]  ;;  %v2184_v30 = vld [vmem:[%s8421_s15 + $0x138] sm:$0xff] }
 0x3ef   : > { %3137 = vmatprep.subr.bf16.mxu1 %v5757_v31  ;;  %3190 = vmatprep.subr.bf16.mxu0 %v5759_v32  ;;  %v2192_v31 = vld [vmem:[%s8421_s15 + $0x178] sm:$0xff]  ;;  %v5680_v32 = vcombine.low %v2167_v56, %v2175_v59  ;;  %v5697_v34 = vcombine.high %v2183_v17, %v2191_v29 }
 0x3f0   : > { %v5699_v35 = vcombine.high %v2184_v30, %v2192_v31  ;;  %v5698_v46 = vcombine.low %v2184_v30, %v2192_v31  ;;  %v2247_v31 = vld [vmem:[%s8421_s15 + $0x330] sm:$0xff] }
 0x3f2   : > { %3138 = vmatpush1.bf16.msra.mxu1 %v5756_v41  ;;  %3191 = vmatpush1.bf16.msra.mxu0 %v5758_v42  ;;  %v2207_v41 = vld [vmem:[%s8421_s15 + $0x1f0] sm:$0xff]  ;;  %v2200_v42 = vld [vmem:[%s8421_s15 + $0x1b8] sm:$0xff] }
 0x3f3   : > { %3139 = vmatprep.subr.bf16.mxu1 %v5773_v43  ;;  %3192 = vmatprep.subr.bf16.mxu0 %v5775_v45  ;;  %v2208_v43 = vld [vmem:[%s8421_s15 + $0x1f8] sm:$0xff]  ;;  %v5696_v45 = vcombine.low %v2183_v17, %v2191_v29  ;;  %v5713_v48 = vcombine.high %v2199_v36, %v2207_v41 }
 0x3f4   : > { %v5715_v49 = vcombine.high %v2200_v42, %v2208_v43  ;;  %v5714_v56 = vcombine.low %v2200_v42, %v2208_v43  ;;  %v2263_v43 = vld [vmem:[%s8421_s15 + $0x3b0] sm:$0xff] }
 0x3f6   : > { %3140 = vmatpush1.bf16.msra.mxu1 %v5772_v51  ;;  %3193 = vmatpush1.bf16.msra.mxu0 %v5774_v52  ;;  %v2223_v51 = vld [vmem:[%s8421_s15 + $0x270] sm:$0xff]  ;;  %v2216_v52 = vld [vmem:[%s8421_s15 + $0x238] sm:$0xff] }
 0x3f7   : > { %3231 = vmatprep.subr.bf16.mxu1 %v5665_v53  ;;  %3284 = vmatprep.subr.bf16.mxu0 %v5667_v54  ;;  %v2224_v53 = vld [vmem:[%s8421_s15 + $0x278] sm:$0xff]  ;;  %v5712_v54 = vcombine.low %v2199_v36, %v2207_v41  ;;  %v5729_v59 = vcombine.high %v2215_v50, %v2223_v51 }
 0x3f8   : > { %v5731_v61 = vcombine.high %v2216_v52, %v2224_v53  ;;  %v5730_v17 = vcombine.low %v2216_v52, %v2224_v53 }
 0x3f9   : > { %3158 = vmatmul.mubr.bf16.vlgmr.msra.gmra.mrb[32].mxu1 %v7497_v25  ;;  %3211 = vmatmul.mubr.bf16.vlgmr.msra.gmra.mrb[36].mxu0 %v7497_v25 }
 0x3fa   : > { %3232 = vmatpush1.bf16.msra.mxu1 %v5664_v5  ;;  %3285 = vmatpush1.bf16.msra.mxu0 %v5666_v8  ;;  %v2239_v5 = vld [vmem:[%s8421_s15 + $0x2f0] sm:$0xff]  ;;  %v2232_v8 = vld [vmem:[%s8421_s15 + $0x2b8] sm:$0xff] }
 0x3fb   : > { %3233 = vmatprep.subr.bf16.mxu1 %v5681_v14  ;;  %3286 = vmatprep.subr.bf16.mxu0 %v5683_v16  ;;  %v2240_v14 = vld [vmem:[%s8421_s15 + $0x2f8] sm:$0xff]  ;;  %v5728_v16 = vcombine.low %v2215_v50, %v2223_v51  ;;  %v5745_v29 = vcombine.high %v2231_v4, %v2239_v5 }
 0x3fc   : > { %3167 = vmatprep.mubr.bf16.mxu1 %v6694_v0  ;;  %3220 = vmatprep.mubr.bf16.mxu0 %v6694_v0  ;;  %v5747_v30 = vcombine.high %v2232_v8, %v2240_v14  ;;  %v5746_v36 = vcombine.low %v2232_v8, %v2240_v14 }
 0x3fe   : > { %3234 = vmatpush1.bf16.msra.mxu1 %v5680_v32  ;;  %3287 = vmatpush1.bf16.msra.mxu0 %v5682_v33  ;;  %v2255_v32 = vld [vmem:[%s8421_s15 + $0x370] sm:$0xff]  ;;  %v2248_v33 = vld [vmem:[%s8421_s15 + $0x338] sm:$0xff] }
 0x3ff   : > { %3235 = vmatprep.subr.bf16.mxu1 %v5697_v34  ;;  %3288 = vmatprep.subr.bf16.mxu0 %v5699_v35  ;;  %v2256_v34 = vld [vmem:[%s8421_s15 + $0x378] sm:$0xff]  ;;  %v5744_v35 = vcombine.low %v2231_v4, %v2239_v5  ;;  %v5761_v41 = vcombine.high %v2247_v31, %v2255_v32 }
 0x400   : > { %v5763_v42 = vcombine.high %v2248_v33, %v2256_v34  ;;  %v5762_v50 = vcombine.low %v2248_v33, %v2256_v34 }
 0x401   : > { %3168 = vmatmul.mubr.bf16.gmra.mrb[36].mxu1 %v7533_v47  ;;  %3221 = vmatmul.mubr.bf16.gmra.mrb[40].mxu0 %v7533_v47 }
 0x402   : > { %3236 = vmatpush1.bf16.msra.mxu1 %v5696_v45  ;;  %3289 = vmatpush1.bf16.msra.mxu0 %v5698_v46  ;;  %v2271_v45 = vld [vmem:[%s8421_s15 + $0x3f0] sm:$0xff]  ;;  %v2264_v46 = vld [vmem:[%s8421_s15 + $0x3b8] sm:$0xff] }
 0x403   : > { %3237 = vmatprep.subr.bf16.mxu1 %v5713_v48  ;;  %3290 = vmatprep.subr.bf16.mxu0 %v5715_v49  ;;  %v2272_v48 = vld [vmem:[%s8421_s15 + $0x3f8] sm:$0xff]  ;;  %v5760_v49 = vcombine.low %v2247_v31, %v2255_v32  ;;  %v5777_v51 = vcombine.high %v2263_v43, %v2271_v45  ;;  %v5776_v53 = vcombine.low %v2263_v43, %v2271_v45 }
 0x404   : > { %3263 = vmatprep.mubr.bf16.mxu1 %v6694_v0  ;;  %3316 = vmatprep.mubr.bf16.mxu0 %v6694_v0  ;;  %v5779_v52 = vcombine.high %v2264_v46, %v2272_v48 }
 0x406   : > { %3238 = vmatpush1.bf16.msra.mxu1 %v5712_v54  ;;  %3291 = vmatpush1.bf16.msra.mxu0 %v5714_v56  ;;  %v5778_v54 = vcombine.low %v2264_v46, %v2272_v48 }
 0x407   : > { %3239 = vmatprep.subr.bf16.mxu1 %v5729_v59  ;;  %3292 = vmatprep.subr.bf16.mxu0 %v5731_v61 }
 0x40a   : > { %3240 = vmatpush1.bf16.msra.mxu1 %v5728_v16  ;;  %3293 = vmatpush1.bf16.msra.mxu0 %v5730_v17 }
 0x40b   : > { %3241 = vmatprep.subr.bf16.mxu1 %v5745_v29  ;;  %3294 = vmatprep.subr.bf16.mxu0 %v5747_v30 }
 0x40e   : > { %3242 = vmatpush1.bf16.msra.mxu1 %v5744_v35  ;;  %3295 = vmatpush1.bf16.msra.mxu0 %v5746_v36 }
 0x40f   : > { %3243 = vmatprep.subr.bf16.mxu1 %v5761_v41  ;;  %3296 = vmatprep.subr.bf16.mxu0 %v5763_v42 }
 0x412   : > { %3244 = vmatpush1.bf16.msra.mxu1 %v5760_v49  ;;  %3297 = vmatpush1.bf16.msra.mxu0 %v5762_v50 }
 0x413   : > { %3245 = vmatprep.subr.bf16.mxu1 %v5777_v51  ;;  %3298 = vmatprep.subr.bf16.mxu0 %v5779_v52 }
 0x416   : > { %3246 = vmatpush1.bf16.msra.mxu1 %v5776_v53  ;;  %3299 = vmatpush1.bf16.msra.mxu0 %v5778_v54 }
 0x417   : > { %6168 = vmatprep.subr.bf16.mxu1 %v8446_v1  ;;  %6192 = vmatprep.subr.bf16.mxu0 %v8446_v1 }
 0x419   : > { %3264 = vmatmul.mubr.bf16.vlgmr.msra.gmra.mrb[40].mxu1 %v7497_v25  ;;  %3317 = vmatmul.mubr.bf16.vlgmr.msra.gmra.mrb[44].mxu0 %v7497_v25 }
 0x41a   : > { %3273 = vmatprep.mubr.bf16.mxu1 %v6694_v0  ;;  %3326 = vmatprep.mubr.bf16.mxu0 %v6694_v0 }
 0x421   : > { %3274 = vmatmul.mubr.bf16.gmra.mrb[44].mxu1 %v7533_v47  ;;  %3327 = vmatmul.mubr.bf16.gmra.mrb[48].mxu0 %v7533_v47 }
 0x422   : > { %6172 = vmatprep.mubr.msk.bf16.mxu1 %vm6696_vm0, %v8446_v1  ;;  %6196 = vmatprep.mubr.msk.bf16.mxu0 %vm6696_vm0, %v8446_v1 }
 0x48c   : > { %v2947_v56 = vpop.f32.mrb[16].mxu1  ;;  %v7831_v59 = vpop.f32.mrb[20].mxu0 }
 0x48d   : > { %v7833_v61 = vpop.f32.mrb[17].mxu1  ;;  %v7835_v25 = vpop.f32.mrb[21].mxu0 }
 0x48e   : > { %v2951_v4 = vpop.f32.mrb[18].mxu1  ;;  %v7837_v5 = vpop.f32.mrb[22].mxu0 }
 0x48f   : > { %v3337_v0 = vpack.c.bf16 %v2951_v4, %v2947_v56  ;;  %v7841_v8 = vpop.f32.mrb[19].mxu1  ;;  %v7843_v14 = vpop.f32.mrb[23].mxu0 }
 0x491   : > { %6169 = vmatpush3.bf16.xpose.msra.mxu1 %v3337_v0 }
 0x492   : > { %6170 = vmatprep.subr.bf16.mxu1 %v8446_v1 }
 0x494   : > { %v2957_v29 = vpop.f32.mrb[20].mxu1  ;;  %v7850_v30 = vpop.f32.mrb[24].mxu0 }
 0x495   : > { %v7852_v31 = vpop.f32.mrb[21].mxu1  ;;  %v7854_v32 = vpop.f32.mrb[25].mxu0 }
 0x496   : > { %v2961_v33 = vpop.f32.mrb[22].mxu1  ;;  %v7856_v34 = vpop.f32.mrb[26].mxu0 }
 0x497   : > { %v3353_v35 = vpack.c.bf16 %v2961_v33, %v2957_v29  ;;  %v7860_v41 = vpop.f32.mrb[23].mxu1  ;;  %v7862_v42 = vpop.f32.mrb[27].mxu0 }
 0x499   : > { %6171 = vmatpush3.bf16.xpose.msra.mxu1 %v3353_v35 }
 0x49a   : > { %6176 = vmatprep.subr.bf16.mxu1 %v8446_v1 }
 0x4a0   : > { %6173 = vmatmul.mubr.bf16.vlgmr.msra.gmra.mrb[48].mxu1 %v2127_v62 }
 0x4a1   : > { %6180 = vmatprep.mubr.msk.bf16.mxu1 %vm6696_vm0, %v8446_v1 }
 0x4ac   : > { %v7874_v46 = vpop.f32.mrb[24].mxu1  ;;  %v7876_v48 = vpop.f32.mrb[28].mxu0 }
 0x4ad   : > { %8509 = vst [vmem:[#allocation23_spill] sm:$0xff] %v7876_v48  ;;  %v7878_v49 = vpop.f32.mrb[25].mxu1  ;;  %v7880_v50 = vpop.f32.mrb[29].mxu0 }
 0x4ae   : > { %8510 = vst [vmem:[#allocation24_spill] sm:$0xff] %v7880_v50  ;;  %v7882_v51 = vpop.f32.mrb[26].mxu1  ;;  %v7884_v52 = vpop.f32.mrb[30].mxu0 }
 0x4af   : > { %8511 = vst [vmem:[#allocation25_spill] sm:$0xff] %v7884_v52  ;;  %v7890_v60 = vpop.f32.mrb[27].mxu1  ;;  %v7892_v62 = vpop.f32.mrb[31].mxu0 }
 0x4b0   : > { %8512 = vst [vmem:[#allocation26_spill] sm:$0xff] %v7892_v62 }
 0x4b4   : > { %v7898_v4 = vpop.f32.mrb[28].mxu1  ;;  %v7900_v0 = vpop.f32.mrb[32].mxu0 }
 0x4b5   : > { %8513 = vst [vmem:[#allocation27_spill] sm:$0xff] %v7900_v0  ;;  %v7902_v29 = vpop.f32.mrb[29].mxu1  ;;  %v7904_v33 = vpop.f32.mrb[33].mxu0 }
 0x4b6   : > { %8514 = vst [vmem:[#allocation28_spill] sm:$0xff] %v7904_v33  ;;  %v7906_v35 = vpop.f32.mrb[30].mxu1  ;;  %v7908_v22 = vpop.f32.mrb[34].mxu0 }
 0x4b7   : > { %8515 = vst [vmem:[#allocation29_spill] sm:$0xff] %v7908_v22  ;;  %v7914_v15 = vpop.f32.mrb[31].mxu1  ;;  %v7916_v56 = vpop.f32.mrb[35].mxu0 }
 0x4b8   : > { %8516 = vst [vmem:[#allocation30_spill] sm:$0xff] %v7916_v56 }
 0x4cc   : > { %v3159_v53 = vpop.f32.mrb[32].mxu1  ;;  %v7922_v28 = vpop.f32.mrb[36].mxu0 }
 0x4cd   : > { %v3161_v45 = vpop.f32.mrb[33].mxu1  ;;  %v7924_v17 = vpop.f32.mrb[37].mxu0 }
 0x4ce   : > { %v3163_v19 = vpop.f32.mrb[34].mxu1  ;;  %v7926_v26 = vpop.f32.mrb[38].mxu0 }
 0x4cf   : > { %v3345_v55 = vpack.c.bf16 %v3163_v19, %v3159_v53  ;;  %v3165_v47 = vpop.f32.mrb[35].mxu1  ;;  %v7930_v3 = vpop.f32.mrb[39].mxu0 }
 0x4d0   : > { %v3346_v54 = vpack.c.bf16 %v3165_v47, %v3161_v45 }
 0x4d1   : > { %6177 = vmatpush3.bf16.msra.mxu1 %v3345_v55 }
 0x4d2   : > { %6193 = vmatpush3.bf16.msra.mxu0 %v3346_v54  ;;  %6178 = vmatprep.subr.bf16.mxu1 %v8446_v1 }
 0x4d3   : > { %6194 = vmatprep.subr.bf16.mxu0 %v8446_v1 }
 0x4d4   : > { %v3169_v43 = vpop.f32.mrb[36].mxu1  ;;  %v7936_v16 = vpop.f32.mrb[40].mxu0 }
 0x4d5   : > { %v3171_v19 = vpop.f32.mrb[37].mxu1  ;;  %v7938_v53 = vpop.f32.mrb[41].mxu0 }
 0x4d6   : > { %v3173_v36 = vpop.f32.mrb[38].mxu1  ;;  %v7940_v40 = vpop.f32.mrb[42].mxu0 }
 0x4d7   : > { %v3361_v44 = vpack.c.bf16 %v3173_v36, %v3169_v43  ;;  %v3175_v45 = vpop.f32.mrb[39].mxu1  ;;  %v7944_v55 = vpop.f32.mrb[43].mxu0 }
 0x4d8   : > { %v3362_v54 = vpack.c.bf16 %v3175_v45, %v3171_v19 }
 0x4d9   : > { %6179 = vmatpush3.bf16.msra.mxu1 %v3361_v44 }
 0x4da   : > { %6195 = vmatpush3.bf16.msra.mxu0 %v3362_v54  ;;  %6184 = vmatprep.subr.bf16.mxu1 %v8446_v1 }
 0x4db   : > { %6208 = vmatprep.subr.bf16.mxu0 %v8446_v1 }
 0x4ec   : > { %v7950_v24 = vpop.f32.mrb[40].mxu1  ;;  %v7952_v23 = vpop.f32.mrb[44].mxu0 }
 0x4ed   : > { %v7954_v36 = vpop.f32.mrb[41].mxu1  ;;  %v7956_v43 = vpop.f32.mrb[45].mxu0 }
 0x4ee   : > { %8517 = vst [vmem:[#allocation31_spill] sm:$0xff] %v7956_v43  ;;  %v7958_v47 = vpop.f32.mrb[42].mxu1  ;;  %v7960_v19 = vpop.f32.mrb[46].mxu0 }
 0x4ef   : > { %v7966_v54 = vpop.f32.mrb[43].mxu1  ;;  %v7968_v11 = vpop.f32.mrb[47].mxu0 }
 0x4f0   : > { %8518 = vst [vmem:[#allocation32_spill] sm:$0xff] %v7968_v11 }
 0x4f4   : > { %v7974_v37 = vpop.f32.mrb[44].mxu1  ;;  %v7976_v63 = vpop.f32.mrb[48].mxu0 }
 0x4f5   : > { %8519 = vst [vmem:[#allocation33_spill] sm:$0xff] %v7976_v63  ;;  %v7978_v20 = vpop.f32.mrb[45].mxu1  ;;  %v7980_v44 = vpop.f32.mrb[49].mxu0 }
 0x4f6   : > { %8520 = vst [vmem:[#allocation34_spill] sm:$0xff] %v7980_v44  ;;  %v7982_v33 = vpop.f32.mrb[46].mxu1  ;;  %v7984_v45 = vpop.f32.mrb[50].mxu0 }
 0x4f7   : > { %8521 = vst [vmem:[#allocation35_spill] sm:$0xff] %v7984_v45  ;;  %v7990_v50 = vpop.f32.mrb[47].mxu1  ;;  %v7992_v38 = vpop.f32.mrb[51].mxu0 }
 0x4f8   : > { %8522 = vst [vmem:[#allocation36_spill] sm:$0xff] %v7992_v38 }
 0x573   : > { %v3441_v11 = vpop.f32.mrb[48].mxu1 }
 0x574   : > { %v3448_v57 = vmul.f32 0.088388346, %v3441_v11  ;;  %v6174_v9 = vpop.f32.mrb[49].mxu1 }
 0x575   : > { %v3444_v56 = vpop.f32.mrb[50].mxu1 }
 0x576   : > { %v3449_v0 = vmul.f32 0.088388346, %v3444_v56  ;;  %v6175_v22 = vpop.f32.mrb[51].mxu1  ;;  %v3450_v1 = vsel %vm3401_vm4, %v3448_v57, -1e+30 }
 0x577   : > { %v3453_v48 = vsel %vm3452_vm5, %v3450_v1, -inf }
 0x578   : > { %3454 = vmax.xlane.f32.xlu1 %v3453_v48  ;;  %v3451_v62 = vsel %vm3401_vm4, %v3449_v0, -1e+30 }
 0x579   : > { %v3456_v43 = vsel %vm3452_vm5, %v3451_v62, -inf }
 0x57c   : > { %3457 = vmax.xlane.f32.xlu1 %v3456_v43 }
 0x605   : > { %v3455_v44 = vpop.xlane.xlu1 %3454 }
 0x606   : > { %v3459_v38 = vsub.f32 %v3450_v1, %v3455_v44 }
 0x608   : > { %v3461_v11 = vmul.f32 1.442695, %v3459_v38 }
 0x609   : > { %v3458_v9 = vpop.xlane.xlu1 %3457 }
 0x60a   : > { %6497 = vpow2.f32 %v3461_v11  ;;  %v3460_v52 = vsub.f32 %v3451_v62, %v3458_v9  ;;  %v8524_v62 = vmov 0.0   ;;  %v8525_v9 = vpack.c.bf16 %v7860_v41, %v7852_v31 }
 0x60c   : > { %v3463_v56 = vmul.f32 1.442695, %v3460_v52  ;;  %v8523_v52 = vpack.c.bf16 %v7841_v8, %v7833_v61  ;;  %v8528_v61 = vpack.c.bf16 %v7856_v34, %v7850_v30  ;;  %v8529_v8 = vpack.c.bf16 %v7570_v18, %v7563_v6 }
 0x60e   : > { %6499 = vpow2.f32 %v3463_v56 }
 0x614   : > { %v6498_v22 = vpop.eup %6497 }
 0x615   : > { %v3465_v57 = vsel %vm3452_vm5, %v6498_v22, 0.0 }
 0x616   : > { %3466 = vadd.xlane.f32.xlu0 %v3465_v57 }
 0x618   : > { %v6500_v63 = vpop.eup %6499 }
 0x619   : > { %v3468_v48 = vsel %vm3452_vm5, %v6500_v63, 0.0 }
 0x61a   : > { %3469 = vadd.xlane.f32.xlu1 %v3468_v48 }
 0x6a3   : > { %v3467_v0 = vpop.xlane.xlu0 %3466 }
 0x6a4   : > { %6501 = vrcp.f32 %v3467_v0 }
 0x6a7   : > { %v3470_v45 = vpop.xlane.xlu1 %3469 }
 0x6a8   : > { %6503 = vrcp.f32 %v3470_v45  ;;  %v8527_v45 = vpack.c.bf16 %v7837_v5, %v7831_v59 }
 0x6ae   : > { %v6502_v43 = vpop.eup %6501 }
 0x6af   : > { %v3473_v38 = vmul.f32 %v6502_v43, %v6498_v22 }
 0x6b2   : > { %v6504_v1 = vpop.eup %6503 }
 0x6b3   : > { %v3474_v44 = vmul.f32 %v6504_v1, %v6500_v63  ;;  %v8526_v63 = vpack.c.bf16 %v7459_v2, %v7452_v58  ;;  %v8530_v58 = vpack.c.bf16 %v7930_v3, %v7924_v17  ;;  %v8531_v2 = vpack.c.bf16 %v7944_v55, %v7938_v53 }
 0x6b5   : > { %v3475_v11 = vpack.c.bf16 %v3474_v44, %v3473_v38 }
 0x6b7   : > { %6181 = vmatmul.mubr.msk.bf16.vlgmr.msra.gmra.mrb[52].mxu1 %vm3452_vm5, %v3475_v11 }
 0x6b8   : > { %6185 = vmatpush3.bf16.xpose.msra.mxu1 %v8523_v52  ;;  %6188 = vmatprep.mubr.msk.bf16.mxu1 %vm6696_vm0, %v8524_v62 }
 0x6b9   : > { %6186 = vmatprep.subr.bf16.mxu1 %v8524_v62 }
 0x6c0   : > { %6187 = vmatpush3.bf16.xpose.msra.mxu1 %v8525_v9 }
 0x6c1   : > { %6200 = vmatprep.subr.bf16.mxu1 %v8524_v62 }
 0x6c7   : > { %6189 = vmatmul.mubr.bf16.vlgmr.msra.gmra.mrb[56].mxu1 %v8526_v63 }
 0x6c8   : > { %6201 = vmatpush3.bf16.xpose.msra.mxu1 %v8527_v45  ;;  %6204 = vmatprep.mubr.msk.bf16.mxu1 %vm6696_vm0, %v8524_v62 }
 0x6c9   : > { %6202 = vmatprep.subr.bf16.mxu1 %v8524_v62 }
 0x6d0   : > { %6203 = vmatpush3.bf16.xpose.msra.mxu1 %v8528_v61 }
 0x6d1   : > { %6224 = vmatprep.subr.bf16.mxu1 %v8524_v62 }
 0x6d7   : > { %6205 = vmatmul.mubr.bf16.vlgmr.msra.gmra.mrb[60].mxu1 %v8529_v8 }
 0x6d8   : > { %6225 = vmatpush3.bf16.msra.mxu1 %v8530_v58  ;;  %6228 = vmatprep.mubr.msk.bf16.mxu1 %vm6696_vm0, %v8524_v62 }
 0x6d9   : > { %6226 = vmatprep.subr.bf16.mxu1 %v8524_v62 }
 0x6dc   : > { %6227 = vmatpush3.bf16.msra.mxu1 %v8531_v2 }
 0x6dd   : > { %6232 = vmatprep.subr.bf16.mxu1 %v8524_v62 }
 0x78a   : > { %v8044_v59 = vpop.f32.mrb[52].mxu1 }
 0x78b   : > { %v6182_v5 = vpop.f32.mrb[53].mxu1 }
 0x78c   : > { %v8046_v6 = vpop.f32.mrb[54].mxu1 }
 0x78d   : > { %v3520_v3 = vpack.c.bf16 %v8046_v6, %v8044_v59  ;;  %v6183_v18 = vpop.f32.mrb[55].mxu1  ;;  %v6455_v59 = vld [vmem:[#allocation7 + $0x168] sm:$0xff]  }
 0x78e   : > { %v6456_v6 = vld [vmem:[#allocation7 + $0x128] sm:$0xff]  }
 0x79a   : > { %v3561_v17 = vpop.f32.mrb[56].mxu1 }
 0x79b   : > { %v3568_v30 = vmul.f32 0.088388346, %v3561_v17  ;;  %v6190_v31 = vpop.f32.mrb[57].mxu1 }
 0x79c   : > { %v3564_v34 = vpop.f32.mrb[58].mxu1 }
 0x79d   : > { %v3569_v41 = vmul.f32 0.088388346, %v3564_v34  ;;  %v6191_v56 = vpop.f32.mrb[59].mxu1  ;;  %v3570_v53 = vsel %vm3401_vm4, %v3568_v30, -1e+30 }
 0x79e   : > { %v3572_v55 = vsel %vm3452_vm5, %v3570_v53, -inf }
 0x79f   : > { %3573 = vmax.xlane.f32.xlu1 %v3572_v55  ;;  %v3571_v22 = vsel %vm3401_vm4, %v3569_v41, -1e+30 }
 0x7a0   : > { %v3575_v57 = vsel %vm3452_vm5, %v3571_v22, -inf }
 0x7a3   : > { %3576 = vmax.xlane.f32.xlu1 %v3575_v57 }
 0x7aa   : > { %v3680_v48 = vpop.f32.mrb[60].mxu1 }
 0x7ab   : > { %v3687_v0 = vmul.f32 0.088388346, %v3680_v48  ;;  %v6206_v43 = vpop.f32.mrb[61].mxu1 }
 0x7ac   : > { %v3683_v1 = vpop.f32.mrb[62].mxu1 }
 0x7ad   : > { %v3688_v38 = vmul.f32 0.088388346, %v3683_v1  ;;  %v6207_v44 = vpop.f32.mrb[63].mxu1  ;;  %v3689_v11 = vsel %vm3401_vm4, %v3687_v0, -1e+30 }
 0x7ae   : > { %v3691_v52 = vsel %vm3452_vm5, %v3689_v11, -inf }
 0x7af   : > { %3692 = vmax.xlane.f32.xlu1 %v3691_v52  ;;  %v3690_v9 = vsel %vm3401_vm4, %v3688_v38, -1e+30 }
 0x7b0   : > { %v3694_v63 = vsel %vm3452_vm5, %v3690_v9, -inf }
 0x7b3   : > { %3695 = vmax.xlane.f32.xlu1 %v3694_v63 }
 0x82c   : > { %v3574_v45 = vpop.xlane.xlu1 %3573 }
 0x82d   : > { %v3578_v61 = vsub.f32 %v3570_v53, %v3574_v45 }
 0x82f   : > { %v3580_v8 = vmul.f32 1.442695, %v3578_v61 }
 0x830   : > { %v3577_v58 = vpop.xlane.xlu1 %3576 }
 0x831   : > { %6505 = vpow2.f32 %v3580_v8  ;;  %v3579_v2 = vsub.f32 %v3571_v22, %v3577_v58  ;;  %v8532_v8 = vpack.c.bf16 %v7926_v26, %v7922_v28  ;;  %v8533_v58 = vpack.c.bf16 %v7940_v40, %v7936_v16 }
 0x832   : > { %v8534_v26 = vpack.c.bf16 %v7843_v14, %v7835_v25  ;;  %v8535_v40 = vpack.c.bf16 %v7862_v42, %v7854_v32  ;;  %v8536_v28 = vpack.c.bf16 %v7583_v27, %v7565_v12  ;;  %v8537_v16 = vpack.c.bf16 %v7958_v47, %v7950_v24 }
 0x833   : > { %v3582_v5 = vmul.f32 1.442695, %v3579_v2  ;;  %v8538_v25 = vpack.c.bf16 %v7982_v33, %v7974_v37 }
 0x835   : > { %6507 = vpow2.f32 %v3582_v5 }
 0x83b   : > { %v6506_v18 = vpop.eup %6505 }
 0x83c   : > { %v3693_v17 = vpop.xlane.xlu1 %3692  ;;  %v3584_v30 = vsel %vm3452_vm5, %v6506_v18, 0.0 }
 0x83d   : > { %v3697_v31 = vsub.f32 %v3689_v11, %v3693_v17  ;;  %3585 = vadd.xlane.f32.xlu1 %v3584_v30 }
 0x83f   : > { %v6508_v34 = vpop.eup %6507  ;;  %v3699_v41 = vmul.f32 1.442695, %v3697_v31 }
 0x840   : > { %v3696_v56 = vpop.xlane.xlu1 %3695  ;;  %v3587_v55 = vsel %vm3452_vm5, %v6508_v34, 0.0 }
 0x841   : > { %6509 = vpow2.f32 %v3699_v41  ;;  %v3698_v57 = vsub.f32 %v3690_v9, %v3696_v56  ;;  %3588 = vadd.xlane.f32.xlu1 %v3587_v55 }
 0x843   : > { %v3701_v53 = vmul.f32 1.442695, %v3698_v57 }
 0x845   : > { %6511 = vpow2.f32 %v3701_v53 }
 0x84b   : > { %v6510_v48 = vpop.eup %6509 }
 0x84c   : > { %v3703_v22 = vsel %vm3452_vm5, %v6510_v48, 0.0 }
 0x84d   : > { %3704 = vadd.xlane.f32.xlu1 %v3703_v22 }
 0x84f   : > { %v6512_v0 = vpop.eup %6511 }
 0x850   : > { %v3706_v43 = vsel %vm3452_vm5, %v6512_v0, 0.0 }
 0x851   : > { %3707 = vadd.xlane.f32.xlu0 %v3706_v43 }
 0x8ca   : > { %v3586_v1 = vpop.xlane.xlu1 %3585 }
 0x8cb   : > { %6513 = vrcp.f32 %v3586_v1 }
 0x8ce   : > { %v3589_v38 = vpop.xlane.xlu1 %3588 }
 0x8cf   : > { %6515 = vrcp.f32 %v3589_v38 }
 0x8d5   : > { %v6514_v44 = vpop.eup %6513 }
 0x8d6   : > { %v3592_v52 = vmul.f32 %v6514_v44, %v6506_v18 }
 0x8d9   : > { %v6516_v11 = vpop.eup %6515 }
 0x8da   : > { %v3593_v63 = vmul.f32 %v6516_v11, %v6508_v34  ;;  %v3705_v9 = vpop.xlane.xlu1 %3704 }
 0x8db   : > { %6517 = vrcp.f32 %v3705_v9 }
 0x8dc   : > { %v3594_v45 = vpack.c.bf16 %v3593_v63, %v3592_v52 }
 0x8de   : > { %v3708_v61 = vpop.xlane.xlu0 %3707  ;;  %6197 = vmatmul.mubr.msk.bf16.vlgmr.msra.gmra.mrb[52].mxu0 %vm3452_vm5, %v3594_v45 }
 0x8df   : > { %6519 = vrcp.f32 %v3708_v61  ;;  %6209 = vmatpush3.bf16.msra.mxu0 %v8532_v8  ;;  %6212 = vmatprep.mubr.msk.bf16.mxu0 %vm6696_vm0, %v8524_v62 }
 0x8e0   : > { %6210 = vmatprep.subr.bf16.mxu0 %v8524_v62 }
 0x8e3   : > { %6211 = vmatpush3.bf16.msra.mxu0 %v8533_v58 }
 0x8e4   : > { %6216 = vmatprep.subr.bf16.mxu0 %v8524_v62 }
 0x8e5   : > { %v6518_v2 = vpop.eup %6517 }
 0x8e6   : > { %v3711_v18 = vmul.f32 %v6518_v2, %v6510_v48 }
 0x8e9   : > { %v6520_v5 = vpop.eup %6519 }
 0x8ea   : > { %v3712_v17 = vmul.f32 %v6520_v5, %v6512_v0 }
 0x8ec   : > { %v3713_v30 = vpack.c.bf16 %v3712_v17, %v3711_v18 }
 0x8ee   : > { %6213 = vmatmul.mubr.msk.bf16.vlgmr.msra.gmra.mrb[56].mxu0 %vm3452_vm5, %v3713_v30 }
 0x8ef   : > { %6217 = vmatpush3.bf16.xpose.msra.mxu0 %v8534_v26  ;;  %6220 = vmatprep.mubr.msk.bf16.mxu0 %vm6696_vm0, %v8524_v62 }
 0x8f0   : > { %6218 = vmatprep.subr.bf16.mxu0 %v8524_v62 }
 0x8f7   : > { %6219 = vmatpush3.bf16.xpose.msra.mxu0 %v8535_v40  ;;  %v8539_v40 = vpack.c.bf16 %v7882_v51, %v7874_v46  ;;  %v8543_v46 = vpack.c.bf16 %v7990_v50, %v7978_v20 }
 0x8f8   : > { %6240 = vmatprep.subr.bf16.mxu0 %v8524_v62 }
 0x8fe   : > { %6221 = vmatmul.mubr.bf16.vlgmr.msra.gmra.mrb[60].mxu0 %v8536_v28  ;;  %v8540_v28 = vpack.c.bf16 %v7906_v35, %v7898_v4 }
 0x8ff   : > { %6241 = vmatpush3.bf16.msra.mxu0 %v8537_v16  ;;  %6244 = vmatprep.mubr.msk.bf16.mxu0 %vm6696_vm0, %v8524_v62  ;;  %v8541_v16 = vpack.c.bf16 %v7471_v10, %v7467_v39 }
 0x900   : > { %6242 = vmatprep.subr.bf16.mxu0 %v8524_v62 }
 0x903   : > { %6243 = vmatpush3.bf16.msra.mxu0 %v8538_v25  ;;  %v8542_v25 = vpack.c.bf16 %v7966_v54, %v7954_v36 }
 0x904   : > { %6248 = vmatprep.subr.bf16.mxu0 %v8524_v62 }
 0x9b1   : > { %v8101_v14 = vpop.f32.mrb[52].mxu0 }
 0x9b2   : > { %v6198_v32 = vpop.f32.mrb[53].mxu0 }
 0x9b3   : > { %v8103_v12 = vpop.f32.mrb[54].mxu0 }
 0x9b4   : > { %v3639_v24 = vpack.c.bf16 %v8103_v12, %v8101_v14  ;;  %v6199_v27 = vpop.f32.mrb[55].mxu0  ;;  %v6441_v14 = vld [vmem:[#allocation7 + $0x70] sm:$0xff]  }
 0x9b5   : > { %v6442_v12 = vld [vmem:[#allocation7 + $0x30] sm:$0xff]  }
 0x9c1   : > { %v8107_v42 = vpop.f32.mrb[56].mxu0 }
 0x9c2   : > { %v6214_v47 = vpop.f32.mrb[57].mxu0 }
 0x9c3   : > { %v8109_v31 = vpop.f32.mrb[58].mxu0 }
 0x9c4   : > { %v3758_v37 = vpack.c.bf16 %v8109_v31, %v8107_v42  ;;  %v6215_v33 = vpop.f32.mrb[59].mxu0 }
 0x9d1   : > { %v3799_v34 = vpop.f32.mrb[60].mxu0 }
 0x9d2   : > { %v3806_v41 = vmul.f32 0.088388346, %v3799_v34  ;;  %v6222_v56 = vpop.f32.mrb[61].mxu0 }
 0x9d3   : > { %v3802_v55 = vpop.f32.mrb[62].mxu0 }
 0x9d4   : > { %v3807_v57 = vmul.f32 0.088388346, %v3802_v55  ;;  %v6223_v53 = vpop.f32.mrb[63].mxu0  ;;  %v3808_v48 = vsel %vm3401_vm4, %v3806_v41, -1e+30 }
 0x9d5   : > { %v3810_v22 = vsel %vm3452_vm5, %v3808_v48, -inf }
 0x9d6   : > { %3811 = vmax.xlane.f32.xlu1 %v3810_v22  ;;  %v3809_v0 = vsel %vm3401_vm4, %v3807_v57, -1e+30 }
 0x9d7   : > { %v3813_v43 = vsel %vm3452_vm5, %v3809_v0, -inf }
 0x9d8   : > { %3814 = vmax.xlane.f32.xlu0 %v3813_v43 }
 0xa63   : > { %v3812_v1 = vpop.xlane.xlu1 %3811 }
 0xa64   : > { %v3816_v38 = vsub.f32 %v3808_v48, %v3812_v1 }
 0xa65   : > { %v3815_v44 = vpop.xlane.xlu0 %3814 }
 0xa66   : > { %v3818_v11 = vmul.f32 1.442695, %v3816_v38  ;;  %v3817_v52 = vsub.f32 %v3809_v0, %v3815_v44 }
 0xa68   : > { %6521 = vpow2.f32 %v3818_v11  ;;  %v3820_v63 = vmul.f32 1.442695, %v3817_v52 }
 0xa6a   : > { %6523 = vpow2.f32 %v3820_v63 }
 0xa72   : > { %v6522_v9 = vpop.eup %6521 }
 0xa73   : > { %v3822_v45 = vsel %vm3452_vm5, %v6522_v9, 0.0 }
 0xa74   : > { %v6524_v61 = vpop.eup %6523  ;;  %3823 = vadd.xlane.f32.xlu1 %v3822_v45 }
 0xa75   : > { %v3825_v8 = vsel %vm3452_vm5, %v6524_v61, 0.0 }
 0xa76   : > { %3826 = vadd.xlane.f32.xlu0 %v3825_v8  ;;  %v8544_v8 = vpack.c.bf16 %v7890_v60, %v7878_v49  ;;  %v8548_v49 = vld [vmem:[#allocation35_spill] sm:$0xff]  ;;  %v8549_v60 = vld [vmem:[#allocation33_spill] sm:$0xff] }
 0xb01   : > { %v3824_v58 = vpop.xlane.xlu1 %3823 }
 0xb02   : > { %6525 = vrcp.f32 %v3824_v58  ;;  %v8545_v58 = vpack.c.bf16 %v7914_v15, %v7902_v29 }
 0xb03   : > { %v3827_v2 = vpop.xlane.xlu0 %3826 }
 0xb04   : > { %6527 = vrcp.f32 %v3827_v2  ;;  %v8546_v2 = vpack.c.bf16 %v7475_v13, %v7469_v7 }
 0xb0c   : > { %v6526_v5 = vpop.eup %6525 }
 0xb0d   : > { %v3830_v17 = vmul.f32 %v6526_v5, %v6522_v9  ;;  %v8547_v5 = vpack.c.bf16 %v7960_v19, %v7952_v23 }
 0xb0e   : > { %v6528_v18 = vpop.eup %6527 }
 0xb0f   : > { %v3831_v30 = vmul.f32 %v6528_v18, %v6524_v61  ;;  %v8550_v18 = vpack.c.bf16 %v8548_v49, %v8549_v60 }
 0xb11   : > { %v3832_v26 = vpack.c.bf16 %v3831_v30, %v3830_v17 }
 0xb13   : > { %6229 = vmatmul.mubr.msk.bf16.vlgmr.msra.gmra.mrb[64].mxu1 %vm3452_vm5, %v3832_v26 }
 0xb14   : > { %6233 = vmatpush3.bf16.xpose.msra.mxu1 %v8539_v40  ;;  %6236 = vmatprep.mubr.msk.bf16.mxu1 %vm6696_vm0, %v8524_v62 }
 0xb15   : > { %6234 = vmatprep.subr.bf16.mxu1 %v8524_v62 }
 0xb1c   : > { %6235 = vmatpush3.bf16.xpose.msra.mxu1 %v8540_v28 }
 0xb1d   : > { %6256 = vmatprep.subr.bf16.mxu1 %v8524_v62 }
 0xb23   : > { %6237 = vmatmul.mubr.bf16.vlgmr.msra.gmra.mrb[68].mxu1 %v8541_v16 }
 0xb24   : > { %6257 = vmatpush3.bf16.msra.mxu1 %v8542_v25  ;;  %6260 = vmatprep.mubr.msk.bf16.mxu1 %vm6696_vm0, %v8524_v62 }
 0xb25   : > { %6258 = vmatprep.subr.bf16.mxu1 %v8524_v62 }
 0xb28   : > { %6259 = vmatpush3.bf16.msra.mxu1 %v8543_v46 }
 0xb29   : > { %6264 = vmatprep.subr.bf16.mxu1 %v8524_v62 }
 0xbe6   : > { %v8145_v51 = vpop.f32.mrb[64].mxu1 }
 0xbe7   : > { %v6230_v4 = vpop.f32.mrb[65].mxu1 }
 0xbe8   : > { %v8147_v39 = vpop.f32.mrb[66].mxu1 }
 0xbe9   : > { %v3877_v10 = vpack.c.bf16 %v8147_v39, %v8145_v51  ;;  %v6231_v35 = vpop.f32.mrb[67].mxu1  ;;  %v6425_v51 = vld [vmem:[#allocation7 + $0xf0] sm:$0xff]  }
 0xbea   : > { %v6426_v39 = vld [vmem:[#allocation7 + $0xb0] sm:$0xff]  }
 0xbf6   : > { %v3918_v36 = vpop.f32.mrb[68].mxu1 }
 0xbf7   : > { %v3925_v54 = vmul.f32 0.088388346, %v3918_v36  ;;  %v6238_v32 = vpop.f32.mrb[69].mxu1 }
 0xbf8   : > { %v3921_v27 = vpop.f32.mrb[70].mxu1 }
 0xbf9   : > { %v3926_v47 = vmul.f32 0.088388346, %v3921_v27  ;;  %v6239_v33 = vpop.f32.mrb[71].mxu1  ;;  %v3927_v20 = vsel %vm3401_vm4, %v3925_v54, -1e+30 }
 0xbfa   : > { %v3929_v50 = vsel %vm3452_vm5, %v3927_v20, -inf }
 0xbfb   : > { %3930 = vmax.xlane.f32.xlu1 %v3929_v50  ;;  %v3928_v34 = vsel %vm3401_vm4, %v3926_v47, -1e+30 }
 0xbfc   : > { %v3932_v41 = vsel %vm3452_vm5, %v3928_v34, -inf }
 0xbfd   : > { %3933 = vmax.xlane.f32.xlu0 %v3932_v41 }
 0xc88   : > { %v3931_v56 = vpop.xlane.xlu1 %3930 }
 0xc89   : > { %v3935_v55 = vsub.f32 %v3927_v20, %v3931_v56 }
 0xc8a   : > { %v3934_v57 = vpop.xlane.xlu0 %3933 }
 0xc8b   : > { %v3937_v53 = vmul.f32 1.442695, %v3935_v55  ;;  %v3936_v48 = vsub.f32 %v3928_v34, %v3934_v57 }
 0xc8d   : > { %6529 = vpow2.f32 %v3937_v53  ;;  %v3939_v22 = vmul.f32 1.442695, %v3936_v48 }
 0xc8f   : > { %6531 = vpow2.f32 %v3939_v22 }
 0xc97   : > { %v6530_v0 = vpop.eup %6529 }
 0xc98   : > { %v3941_v43 = vsel %vm3452_vm5, %v6530_v0, 0.0 }
 0xc99   : > { %v6532_v1 = vpop.eup %6531  ;;  %3942 = vadd.xlane.f32.xlu1 %v3941_v43  ;;  %v8552_v43 = vld [vmem:[#allocation23_spill] sm:$0xff] }
 0xc9a   : > { %v3944_v38 = vsel %vm3452_vm5, %v6532_v1, 0.0 }
 0xc9b   : > { %3945 = vadd.xlane.f32.xlu0 %v3944_v38  ;;  %v8554_v38 = vld [vmem:[#allocation29_spill] sm:$0xff] }
 0xd26   : > { %v3943_v44 = vpop.xlane.xlu1 %3942 }
 0xd27   : > { %6533 = vrcp.f32 %v3943_v44  ;;  %v8555_v44 = vld [vmem:[#allocation27_spill] sm:$0xff] }
 0xd28   : > { %v3946_v11 = vpop.xlane.xlu0 %3945 }
 0xd29   : > { %6535 = vrcp.f32 %v3946_v11  ;;  %v8556_v11 = vpack.c.bf16 %v8554_v38, %v8555_v44  ;;  %v6413_v38 = vld [vmem:[#allocation7 + $0xc0] sm:$0xff]   ;;  %v8569_v44 = vld [vmem:[#allocation30_spill] sm:$0xff] }
 0xd31   : > { %v6534_v52 = vpop.eup %6533 }
 0xd32   : > { %v3949_v9 = vmul.f32 %v6534_v52, %v6530_v0  ;;  %v8551_v0 = vld [vmem:[#allocation25_spill] sm:$0xff] }
 0xd33   : > { %v6536_v63 = vpop.eup %6535  ;;  %v8557_v52 = vld [vmem:[#allocation21_spill] sm:$0xff] }
 0xd34   : > { %v3950_v45 = vmul.f32 %v6536_v63, %v6532_v1  ;;  %v8553_v1 = vpack.c.bf16 %v8551_v0, %v8552_v43  ;;  %v8558_v63 = vld [vmem:[#allocation19_spill] sm:$0xff]  ;;  %v8566_v0 = vld [vmem:[#allocation26_spill] sm:$0xff]  ;;  %v8567_v43 = vld [vmem:[#allocation24_spill] sm:$0xff] }
 0xd36   : > { %v3951_v61 = vpack.c.bf16 %v3950_v45, %v3949_v9  ;;  %v8559_v9 = vpack.c.bf16 %v8557_v52, %v8558_v63  ;;  %v8560_v45 = vld [vmem:[#allocation32_spill] sm:$0xff]  ;;  %v6414_v63 = vld [vmem:[#allocation7 + $0x80] sm:$0xff]  }
 0xd38   : > { %6245 = vmatmul.mubr.msk.bf16.vlgmr.msra.gmra.mrb[64].mxu0 %vm3452_vm5, %v3951_v61  ;;  %v8561_v61 = vld [vmem:[#allocation31_spill] sm:$0xff] }
 0xd39   : > { %6249 = vmatpush3.bf16.xpose.msra.mxu0 %v8544_v8  ;;  %6252 = vmatprep.mubr.msk.bf16.mxu0 %vm6696_vm0, %v8524_v62  ;;  %v8562_v8 = vpack.c.bf16 %v8560_v45, %v8561_v61  ;;  %v8572_v45 = vld [vmem:[#allocation22_spill] sm:$0xff]  ;;  %v8573_v61 = vld [vmem:[#allocation20_spill] sm:$0xff] }
 0xd3a   : > { %6250 = vmatprep.subr.bf16.mxu0 %v8524_v62 }
 0xd41   : > { %6251 = vmatpush3.bf16.xpose.msra.mxu0 %v8545_v58  ;;  %v8563_v58 = vld [vmem:[#allocation36_spill] sm:$0xff] }
 0xd42   : > { %6272 = vmatprep.subr.bf16.mxu0 %v8524_v62 }
 0xd48   : > { %6253 = vmatmul.mubr.bf16.vlgmr.msra.gmra.mrb[68].mxu0 %v8546_v2  ;;  %v8564_v2 = vld [vmem:[#allocation34_spill] sm:$0xff] }
 0xd49   : > { %6273 = vmatpush3.bf16.msra.mxu0 %v8547_v5  ;;  %6276 = vmatprep.mubr.msk.bf16.mxu0 %vm6696_vm0, %v8524_v62  ;;  %v8565_v5 = vpack.c.bf16 %v8563_v58, %v8564_v2  ;;  %v6416_v58 = vld [vmem:[#allocation7 + $0x88] sm:$0xff]   ;;  %v6417_v2 = vld [vmem:[#allocation7 + $0xd0] sm:$0xff]  }
 0xd4a   : > { %6274 = vmatprep.subr.bf16.mxu0 %v8524_v62 }
 0xd4d   : > { %6275 = vmatpush3.bf16.msra.mxu0 %v8550_v18 }
 0xd4e   : > { %6280 = vmatprep.subr.bf16.mxu0 %v8524_v62 }
 0xe0b   : > { %v8183_v15 = vpop.f32.mrb[64].mxu0 }
 0xe0c   : > { %v6246_v29 = vpop.f32.mrb[65].mxu0 }
 0xe0d   : > { %v8185_v7 = vpop.f32.mrb[66].mxu0 }
 0xe0e   : > { %v3996_v13 = vpack.c.bf16 %v8185_v7, %v8183_v15  ;;  %v6247_v23 = vpop.f32.mrb[67].mxu0 }
 0xe1b   : > { %v4037_v19 = vpop.f32.mrb[68].mxu0 }
 0xe1c   : > { %v4044_v17 = vmul.f32 0.088388346, %v4037_v19  ;;  %v6254_v30 = vpop.f32.mrb[69].mxu0 }
 0xe1d   : > { %v4040_v26 = vpop.f32.mrb[70].mxu0 }
 0xe1e   : > { %v4045_v40 = vmul.f32 0.088388346, %v4040_v26  ;;  %v6255_v28 = vpop.f32.mrb[71].mxu0  ;;  %v4046_v16 = vsel %vm3401_vm4, %v4044_v17, -1e+30 }
 0xe1f   : > { %v4048_v25 = vsel %vm3452_vm5, %v4046_v16, -inf }
 0xe20   : > { %4049 = vmax.xlane.f32.xlu1 %v4048_v25  ;;  %v4047_v46 = vsel %vm3401_vm4, %v4045_v40, -1e+30 }
 0xe21   : > { %v4051_v4 = vsel %vm3452_vm5, %v4047_v46, -inf }
 0xe22   : > { %4052 = vmax.xlane.f32.xlu0 %v4051_v4 }
 0xead   : > { %v4050_v35 = vpop.xlane.xlu1 %4049 }
 0xeae   : > { %v4054_v36 = vsub.f32 %v4046_v16, %v4050_v35 }
 0xeaf   : > { %v4053_v54 = vpop.xlane.xlu0 %4052 }
 0xeb0   : > { %v4056_v32 = vmul.f32 1.442695, %v4054_v36  ;;  %v4055_v27 = vsub.f32 %v4047_v46, %v4053_v54 }
 0xeb2   : > { %6537 = vpow2.f32 %v4056_v32  ;;  %v4058_v47 = vmul.f32 1.442695, %v4055_v27 }
 0xeb4   : > { %6539 = vpow2.f32 %v4058_v47 }
 0xebc   : > { %v6538_v33 = vpop.eup %6537 }
 0xebd   : > { %v4060_v20 = vsel %vm3452_vm5, %v6538_v33, 0.0 }
 0xebe   : > { %v6540_v50 = vpop.eup %6539  ;;  %4061 = vadd.xlane.f32.xlu1 %v4060_v20 }
 0xebf   : > { %v4063_v34 = vsel %vm3452_vm5, %v6540_v50, 0.0 }
 0xec0   : > { %4064 = vadd.xlane.f32.xlu0 %v4063_v34 }
 0xf4b   : > { %v4062_v41 = vpop.xlane.xlu1 %4061 }
 0xf4c   : > { %6541 = vrcp.f32 %v4062_v41 }
 0xf4d   : > { %v4065_v56 = vpop.xlane.xlu0 %4064 }
 0xf4e   : > { %6543 = vrcp.f32 %v4065_v56 }
 0xf56   : > { %v6542_v55 = vpop.eup %6541 }
 0xf57   : > { %v4068_v53 = vmul.f32 %v6542_v55, %v6538_v33 }
 0xf58   : > { %v6544_v57 = vpop.eup %6543 }
 0xf59   : > { %v4069_v48 = vmul.f32 %v6544_v57, %v6540_v50 }
 0xf5b   : > { %v4070_v22 = vpack.c.bf16 %v4069_v48, %v4068_v53 }
 0xf5d   : > { %6261 = vmatmul.mubr.msk.bf16.vlgmr.msra.gmra.mrb[72].mxu1 %vm3452_vm5, %v4070_v22 }
 0xf5e   : > { %6265 = vmatpush3.bf16.xpose.msra.mxu1 %v8553_v1  ;;  %6268 = vmatprep.mubr.msk.bf16.mxu1 %vm6696_vm0, %v8524_v62  ;;  %v8568_v1 = vpack.c.bf16 %v8566_v0, %v8567_v43 }
 0xf5f   : > { %6266 = vmatprep.subr.bf16.mxu1 %v8524_v62 }
 0xf66   : > { %6267 = vmatpush3.bf16.xpose.msra.mxu1 %v8556_v11  ;;  %v8570_v11 = vld [vmem:[#allocation28_spill] sm:$0xff] }
 0xf67   : > { %6288 = vmatprep.subr.bf16.mxu1 %v8524_v62  ;;  %v8571_v52 = vpack.c.bf16 %v8569_v44, %v8570_v11 }
 0xf6d   : > { %6269 = vmatmul.mubr.bf16.vlgmr.msra.gmra.mrb[76].mxu1 %v8559_v9  ;;  %v6415_v9 = vld [vmem:[#allocation7 + $0xc8] sm:$0xff]  }
 0xf6e   : > { %6289 = vmatpush3.bf16.msra.mxu1 %v8562_v8  ;;  %6292 = vmatprep.mubr.msk.bf16.mxu1 %vm6696_vm0, %v8524_v62  ;;  %v8574_v8 = vpack.c.bf16 %v8572_v45, %v8573_v61  ;;  %v6463_v45 = vld [vmem:[#allocation7 + $0x1c8] sm:$0xff]  }
 0xf6f   : > { %6290 = vmatprep.subr.bf16.mxu1 %v8524_v62  ;;  %v6464_v61 = vld [vmem:[#allocation7 + $0x188] sm:$0xff]  }
 0xf72   : > { %6291 = vmatpush3.bf16.msra.mxu1 %v8565_v5  ;;  %v6418_v5 = vld [vmem:[#allocation7 + $0x90] sm:$0xff]  }
0x1030   : > { %v8220_v49 = vpop.f32.mrb[72].mxu1 }
0x1031   : > { %v6262_v60 = vpop.f32.mrb[73].mxu1 }
0x1032   : > { %v8222_v18 = vpop.f32.mrb[74].mxu1  ;;  %v6419_v60 = vld [vmem:[#allocation7 + $0xd8] sm:$0xff]  }
0x1033   : > { %v4115_v29 = vpack.c.bf16 %v8222_v18, %v8220_v49  ;;  %v6263_v23 = vpop.f32.mrb[75].mxu1  ;;  %v6458_v49 = vld [vmem:[#allocation7 + $0x130] sm:$0xff]   ;;  %v6459_v18 = vld [vmem:[#allocation7 + $0x178] sm:$0xff]  }
0x1034   : > { %v6420_v23 = vld [vmem:[#allocation7 + $0x98] sm:$0xff]  }
0x1040   : > { %v4156_v19 = vpop.f32.mrb[76].mxu1 }
0x1041   : > { %v4163_v17 = vmul.f32 0.088388346, %v4156_v19  ;;  %v6270_v30 = vpop.f32.mrb[77].mxu1  ;;  %v6421_v19 = vld [vmem:[#allocation7 + $0xe0] sm:$0xff]  }
0x1042   : > { %v4159_v26 = vpop.f32.mrb[78].mxu1  ;;  %v6423_v30 = vld [vmem:[#allocation7 + $0xe8] sm:$0xff]  }
0x1043   : > { %v4164_v40 = vmul.f32 0.088388346, %v4159_v26  ;;  %v6271_v28 = vpop.f32.mrb[79].mxu1  ;;  %v4165_v16 = vsel %vm3401_vm4, %v4163_v17, -1e+30  ;;  %v6422_v17 = vld [vmem:[#allocation7 + $0xa0] sm:$0xff]  }
0x1044   : > { %v4167_v25 = vsel %vm3452_vm5, %v4165_v16, -inf  ;;  %v6424_v26 = vld [vmem:[#allocation7 + $0xa8] sm:$0xff]  }
0x1045   : > { %4168 = vmax.xlane.f32.xlu1 %v4167_v25  ;;  %v4166_v46 = vsel %vm3401_vm4, %v4164_v40, -1e+30  ;;  %v6428_v40 = vld [vmem:[#allocation7 + $0xb8] sm:$0xff]  }
0x1046   : > { %v4170_v4 = vsel %vm3452_vm5, %v4166_v46, -inf }
0x1047   : > { %4171 = vmax.xlane.f32.xlu0 %v4170_v4 }
0x10d2   : > { %v4169_v35 = vpop.xlane.xlu1 %4168 }
0x10d3   : > { %v4173_v36 = vsub.f32 %v4165_v16, %v4169_v35 }
0x10d4   : > { %v4172_v54 = vpop.xlane.xlu0 %4171 }
0x10d5   : > { %v4175_v32 = vmul.f32 1.442695, %v4173_v36  ;;  %v4174_v27 = vsub.f32 %v4166_v46, %v4172_v54 }
0x10d7   : > { %6545 = vpow2.f32 %v4175_v32  ;;  %v4177_v47 = vmul.f32 1.442695, %v4174_v27 }
0x10d9   : > { %6547 = vpow2.f32 %v4177_v47 }
0x10e1   : > { %v6546_v33 = vpop.eup %6545 }
0x10e2   : > { %v4179_v20 = vsel %vm3452_vm5, %v6546_v33, 0.0 }
0x10e3   : > { %v6548_v50 = vpop.eup %6547  ;;  %4180 = vadd.xlane.f32.xlu1 %v4179_v20 }
0x10e4   : > { %v4182_v34 = vsel %vm3452_vm5, %v6548_v50, 0.0 }
0x10e5   : > { %4183 = vadd.xlane.f32.xlu0 %v4182_v34 }
0x1170   : > { %v4181_v41 = vpop.xlane.xlu1 %4180 }
0x1171   : > { %6549 = vrcp.f32 %v4181_v41 }
0x1172   : > { %v4184_v56 = vpop.xlane.xlu0 %4183 }
0x1173   : > { %6551 = vrcp.f32 %v4184_v56 }
0x117b   : > { %v6550_v55 = vpop.eup %6549 }
0x117c   : > { %v4187_v53 = vmul.f32 %v6550_v55, %v6546_v33 }
0x117d   : > { %v6552_v57 = vpop.eup %6551 }
0x117e   : > { %v4188_v48 = vmul.f32 %v6552_v57, %v6548_v50 }
0x1180   : > { %v4189_v22 = vpack.c.bf16 %v4188_v48, %v4187_v53 }
0x1182   : > { %6277 = vmatmul.mubr.msk.bf16.vlgmr.msra.gmra.mrb[72].mxu0 %vm3452_vm5, %v4189_v22 }
0x1183   : > { %6281 = vmatpush3.bf16.xpose.msra.mxu0 %v8568_v1  ;;  %6284 = vmatprep.mubr.msk.bf16.mxu0 %vm6696_vm0, %v8524_v62 }
0x1184   : > { %6282 = vmatprep.subr.bf16.mxu0 %v8524_v62 }
0x118b   : > { %6283 = vmatpush3.bf16.xpose.msra.mxu0 %v8571_v52  ;;  %v6429_v52 = vld [vmem:[#allocation7 + $0x40] sm:$0xff]  }
0x118c   : > { %5990 = vmatprep.subr.bf16.mxu0 %v6413_v38  ;;  %5968 = vmatprep.subr.bf16.mxu1 %v6429_v52  ;;  %v6476_v52 = vld [vmem:[#allocation7 + $0x1b8] sm:$0xff]  }
0x1192   : > { %6285 = vmatmul.mubr.bf16.vlgmr.msra.gmra.mrb[76].mxu0 %v8574_v8  ;;  %v6465_v8 = vld [vmem:[#allocation7 + $0x1d0] sm:$0xff]  }
0x1193   : > { %5991 = vmatpush3.bf16.msra.mxu0 %v6414_v63  ;;  %4948 = vmatprep.mubr.bf16.mxu0 %v3877_v10  ;;  %v6427_v10 = vld [vmem:[#allocation7 + $0xf8] sm:$0xff]   ;;  %v6461_v63 = vld [vmem:[#allocation7 + $0x1c0] sm:$0xff]  }
0x1194   : > { %5992 = vmatprep.subr.bf16.mxu0 %v6415_v9  ;;  %v6462_v9 = vld [vmem:[#allocation7 + $0x180] sm:$0xff]  }
0x1197   : > { %5993 = vmatpush3.bf16.msra.mxu0 %v6416_v58  ;;  %v6466_v58 = vld [vmem:[#allocation7 + $0x190] sm:$0xff]  }
0x1198   : > { %5994 = vmatprep.subr.bf16.mxu0 %v6417_v2  ;;  %v6467_v2 = vld [vmem:[#allocation7 + $0x1d8] sm:$0xff]  }
0x119b   : > { %5995 = vmatpush3.bf16.msra.mxu0 %v6418_v5  ;;  %v6468_v5 = vld [vmem:[#allocation7 + $0x198] sm:$0xff]  }
0x119c   : > { %5996 = vmatprep.subr.bf16.mxu0 %v6419_v60  ;;  %v6469_v60 = vld [vmem:[#allocation7 + $0x1e0] sm:$0xff]  }
0x119f   : > { %5997 = vmatpush3.bf16.msra.mxu0 %v6420_v23  ;;  %v6470_v23 = vld [vmem:[#allocation7 + $0x1a0] sm:$0xff]  }
0x11a0   : > { %5998 = vmatprep.subr.bf16.mxu0 %v6421_v19  ;;  %v6471_v19 = vld [vmem:[#allocation7 + $0x1e8] sm:$0xff]  }
0x11a3   : > { %5999 = vmatpush3.bf16.msra.mxu0 %v6422_v17  ;;  %v6472_v17 = vld [vmem:[#allocation7 + $0x1a8] sm:$0xff]  }
0x11a4   : > { %6000 = vmatprep.subr.bf16.mxu0 %v6423_v30  ;;  %v6473_v30 = vld [vmem:[#allocation7 + $0x1f0] sm:$0xff]  }
0x11a7   : > { %6001 = vmatpush3.bf16.msra.mxu0 %v6424_v26  ;;  %v6474_v26 = vld [vmem:[#allocation7 + $0x1b0] sm:$0xff]  }
0x11a8   : > { %6002 = vmatprep.subr.bf16.mxu0 %v6425_v51 }
0x11ab   : > { %6003 = vmatpush3.bf16.msra.mxu0 %v6426_v39 }
0x11ac   : > { %6004 = vmatprep.subr.bf16.mxu0 %v6427_v10 }
0x11af   : > { %6005 = vmatpush3.bf16.msra.mxu0 %v6428_v40 }
0x11b0   : > { %6034 = vmatprep.subr.bf16.mxu0 %v6461_v63 }
0x11b2   : > { %4949 = vmatmul.mubr.bf16.vlgmr.msra.gmra.mrb[80].mxu0 %v3758_v37 }
0x11b3   : > { %6035 = vmatpush3.bf16.msra.mxu0 %v6462_v9 }
0x11b4   : > { %6036 = vmatprep.subr.bf16.mxu0 %v6463_v45 }
0x11b7   : > { %6037 = vmatpush3.bf16.msra.mxu0 %v6464_v61 }
0x11b8   : > { %6038 = vmatprep.subr.bf16.mxu0 %v6465_v8 }
0x11bb   : > { %6039 = vmatpush3.bf16.msra.mxu0 %v6466_v58 }
0x11bc   : > { %6040 = vmatprep.subr.bf16.mxu0 %v6467_v2 }
0x11bf   : > { %6041 = vmatpush3.bf16.msra.mxu0 %v6468_v5  ;;  %v8575_v5 = vld [vmem:[#allocation13_spill] sm:$0xff] }
0x11c0   : > { %6042 = vmatprep.subr.bf16.mxu0 %v6469_v60 }
0x11c3   : > { %6043 = vmatpush3.bf16.msra.mxu0 %v6470_v23 }
0x11c4   : > { %6044 = vmatprep.subr.bf16.mxu0 %v6471_v19  ;;  %v8576_v19 = vld [vmem:[#allocation14_spill] sm:$0xff] }
0x11c7   : > { %6045 = vmatpush3.bf16.msra.mxu0 %v6472_v17 }
0x11c8   : > { %6046 = vmatprep.subr.bf16.mxu0 %v6473_v30 }
0x11cb   : > { %6047 = vmatpush3.bf16.msra.mxu0 %v6474_v26 }
0x1255   : > { %v8253_v28 = vpop.f32.mrb[72].mxu0 }
0x1256   : > { %v6278_v16 = vpop.f32.mrb[73].mxu0 }
0x1257   : > { %v8255_v25 = vpop.f32.mrb[74].mxu0 }
0x1258   : > { %v4234_v46 = vpack.c.bf16 %v8255_v25, %v8253_v28  ;;  %v6279_v4 = vpop.f32.mrb[75].mxu0 }
0x1265   : > { %v4275_v35 = vpop.f32.mrb[76].mxu0 }
0x1266   : > { %v4282_v36 = vmul.f32 0.088388346, %v4275_v35  ;;  %v6286_v54 = vpop.f32.mrb[77].mxu0  ;;  %v6430_v35 = vld [vmem:[#allocation7] sm:$0xff]  }
0x1267   : > { %v4278_v32 = vpop.f32.mrb[78].mxu0  ;;  %v6431_v54 = vld [vmem:[#allocation7 + $0x48] sm:$0xff]  }
0x1268   : > { %v4283_v27 = vmul.f32 0.088388346, %v4278_v32  ;;  %v6287_v47 = vpop.f32.mrb[79].mxu0  ;;  %v4284_v33 = vsel %vm3401_vm4, %v4282_v36, -1e+30  ;;  %v6432_v32 = vld [vmem:[#allocation7 + $0x8] sm:$0xff]  }
0x1269   : > { %v4286_v42 = vsel %vm3452_vm5, %v4284_v33, -inf  ;;  %v6434_v47 = vld [vmem:[#allocation7 + $0x10] sm:$0xff]  }
0x126a   : > { %4287 = vmax.xlane.f32.xlu1 %v4286_v42  ;;  %v4285_v31 = vsel %vm3401_vm4, %v4283_v27, -1e+30  ;;  %v6433_v27 = vld [vmem:[#allocation7 + $0x50] sm:$0xff]   ;;  %v6436_v42 = vld [vmem:[#allocation7 + $0x18] sm:$0xff]  }
0x126b   : > { %v4289_v37 = vsel %vm3452_vm5, %v4285_v31, -inf }
0x126c   : > { %4290 = vmax.xlane.f32.xlu0 %v4289_v37  ;;  %v6438_v37 = vld [vmem:[#allocation7 + $0x20] sm:$0xff]  }
0x1285   : > { %v6006_v20 = vpop.f32.mrb[80].mxu0 }
0x1286   : > { %v6007_v50 = vpop.f32.mrb[81].mxu0 }
0x1287   : > { %v8265_v34 = vadd.f32 %v6007_v50, %v6006_v20  ;;  %v6009_v41 = vpop.f32.mrb[82].mxu0  ;;  %v6439_v20 = vld [vmem:[#allocation7 + $0x68] sm:$0xff]  }
0x1288   : > { %v6010_v56 = vpop.f32.mrb[83].mxu0  ;;  %v6440_v50 = vld [vmem:[#allocation7 + $0x28] sm:$0xff]  }
0x1289   : > { %v8267_v55 = vadd.f32 %v6010_v56, %v6009_v41  ;;  %v6444_v41 = vld [vmem:[#allocation7 + $0x38] sm:$0xff]   ;;  %v6445_v56 = vld [vmem:[#allocation7 + $0x140] sm:$0xff]  }
0x12f7   : > { %v4288_v57 = vpop.xlane.xlu1 %4287 }
0x12f8   : > { %v4292_v53 = vsub.f32 %v4284_v33, %v4288_v57  ;;  %v6435_v33 = vld [vmem:[#allocation7 + $0x58] sm:$0xff]   ;;  %v6446_v57 = vld [vmem:[#allocation7 + $0x100] sm:$0xff]  }
0x12f9   : > { %v4291_v48 = vpop.xlane.xlu0 %4290 }
0x12fa   : > { %v4294_v22 = vmul.f32 1.442695, %v4292_v53  ;;  %v4293_v0 = vsub.f32 %v4285_v31, %v4291_v48  ;;  %v6437_v31 = vld [vmem:[#allocation7 + $0x60] sm:$0xff]   ;;  %v6447_v53 = vld [vmem:[#allocation7 + $0x148] sm:$0xff]  }
0x12fb   : > { %v6448_v48 = vld [vmem:[#allocation7 + $0x108] sm:$0xff]  }
0x12fc   : > { %6553 = vpow2.f32 %v4294_v22  ;;  %v4296_v43 = vmul.f32 1.442695, %v4293_v0  ;;  %v6449_v22 = vld [vmem:[#allocation7 + $0x150] sm:$0xff]  }
0x12fd   : > { %v6450_v0 = vld [vmem:[#allocation7 + $0x110] sm:$0xff]  }
0x12fe   : > { %6555 = vpow2.f32 %v4296_v43  ;;  %v6451_v43 = vld [vmem:[#allocation7 + $0x158] sm:$0xff]  }
0x1306   : > { %v6554_v1 = vpop.eup %6553 }
0x1307   : > { %v4298_v38 = vsel %vm3452_vm5, %v6554_v1, 0.0 }
0x1308   : > { %v6556_v44 = vpop.eup %6555  ;;  %4299 = vadd.xlane.f32.xlu1 %v4298_v38  ;;  %v6453_v38 = vld [vmem:[#allocation7 + $0x160] sm:$0xff]  }
0x1309   : > { %v4301_v11 = vsel %vm3452_vm5, %v6556_v44, 0.0 }
0x130a   : > { %4302 = vadd.xlane.f32.xlu0 %v4301_v11  ;;  %v6475_v11 = vld [vmem:[#allocation7 + $0x1f8] sm:$0xff]  }
0x130b   : > { %6048 = vmatprep.subr.bf16.mxu0 %v6475_v11 }
0x130c   : > { %6049 = vmatpush3.bf16.msra.mxu0 %v6476_v52  ;;  %v8325_v52 = vld [vmem:[%s7448_s24 + $0x8] sm:$0xff] }
0x130d   : > { %6316 = vmatprep.subr.bf16.mxu0 %v8524_v62 }
0x1395   : > { %v4300_v51 = vpop.xlane.xlu1 %4299 }
0x1396   : > { %6557 = vrcp.f32 %v4300_v51 }
0x1397   : > { %v4303_v39 = vpop.xlane.xlu0 %4302 }
0x1398   : > { %6559 = vrcp.f32 %v4303_v39 }
0x13a0   : > { %v6558_v10 = vpop.eup %6557 }
0x13a1   : > { %v4306_v16 = vmul.f32 %v6558_v10, %v6554_v1  ;;  %v6452_v1 = vld [vmem:[#allocation7 + $0x118] sm:$0xff]  }
0x13a2   : > { %v6560_v40 = vpop.eup %6559 }
0x13a3   : > { %v4307_v4 = vmul.f32 %v6560_v40, %v6556_v44  ;;  %v6454_v44 = vld [vmem:[#allocation7 + $0x120] sm:$0xff]  }
0x13a5   : > { %v4308_v36 = vpack.c.bf16 %v4307_v4, %v4306_v16 }
0x13a7   : > { %6293 = vmatmul.mubr.msk.bf16.vlgmr.msra.gmra.mrb[80].mxu1 %vm3452_vm5, %v4308_v36 }
0x13a8   : > { %5969 = vmatpush3.bf16.msra.mxu1 %v6430_v35  ;;  %4907 = vmatprep.mubr.bf16.mxu1 %v3639_v24  ;;  %v6443_v24 = vld [vmem:[#allocation7 + $0x78] sm:$0xff]  }
0x13a9   : > { %5970 = vmatprep.subr.bf16.mxu1 %v6431_v54 }
0x13ac   : > { %5971 = vmatpush3.bf16.msra.mxu1 %v6432_v32 }
0x13ad   : > { %5972 = vmatprep.subr.bf16.mxu1 %v6433_v27 }
0x13b0   : > { %5973 = vmatpush3.bf16.msra.mxu1 %v6434_v47 }
0x13b1   : > { %5974 = vmatprep.subr.bf16.mxu1 %v6435_v33 }
0x13b4   : > { %5975 = vmatpush3.bf16.msra.mxu1 %v6436_v42  ;;  %v8578_v42 = vld [vmem:[#allocation16_spill] sm:$0xff] }
0x13b5   : > { %5976 = vmatprep.subr.bf16.mxu1 %v6437_v31  ;;  %v5209_v31 = vmul.f32 %v8578_v42, %v8578_v42 }
0x13b8   : > { %5977 = vmatpush3.bf16.msra.mxu1 %v6438_v37  ;;  %v8579_v37 = vld [vmem:[#allocation18_spill] sm:$0xff] }
0x13b9   : > { %5978 = vmatprep.subr.bf16.mxu1 %v6439_v20  ;;  %v5210_v20 = vmul.f32 %v8579_v37, %v8579_v37 }
0x13bc   : > { %5979 = vmatpush3.bf16.msra.mxu1 %v6440_v50  ;;  %v8580_v50 = vld [vmem:[#allocation17_spill] sm:$0xff] }
0x13bd   : > { %5980 = vmatprep.subr.bf16.mxu1 %v6441_v14  ;;  %v5211_v14 = vmul.f32 %v8580_v50, %v8580_v50 }
0x13c0   : > { %5981 = vmatpush3.bf16.msra.mxu1 %v6442_v12  ;;  %v6477_v12 = vld [vmem:[#allocation9] sm:$0xff]  }
0x13c1   : > { %5982 = vmatprep.subr.bf16.mxu1 %v6443_v24  ;;  %v6478_v24 = vld [vmem:[#allocation9 + $0x8] sm:$0xff]  }
0x13c4   : > { %5983 = vmatpush3.bf16.msra.mxu1 %v6444_v41 }
0x13c5   : > { %6012 = vmatprep.subr.bf16.mxu1 %v6445_v56 }
0x13c7   : > { %4908 = vmatmul.mubr.bf16.vlgmr.msra.gmra.mrb[84].mxu1 %v3520_v3  ;;  %v6457_v3 = vld [vmem:[#allocation7 + $0x170] sm:$0xff]  }
0x13c8   : > { %6013 = vmatpush3.bf16.msra.mxu1 %v6446_v57  ;;  %4989 = vmatprep.mubr.bf16.mxu1 %v4115_v29  ;;  %v6460_v29 = vld [vmem:[#allocation7 + $0x138] sm:$0xff]  }
0x13c9   : > { %6014 = vmatprep.subr.bf16.mxu1 %v6447_v53 }
0x13cc   : > { %6015 = vmatpush3.bf16.msra.mxu1 %v6448_v48 }
0x13cd   : > { %6016 = vmatprep.subr.bf16.mxu1 %v6449_v22 }
0x13d0   : > { %6017 = vmatpush3.bf16.msra.mxu1 %v6450_v0 }
0x13d1   : > { %6018 = vmatprep.subr.bf16.mxu1 %v6451_v43 }
0x13d4   : > { %6019 = vmatpush3.bf16.msra.mxu1 %v6452_v1 }
0x13d5   : > { %6020 = vmatprep.subr.bf16.mxu1 %v6453_v38 }
0x13d8   : > { %6021 = vmatpush3.bf16.msra.mxu1 %v6454_v44 }
0x13d9   : > { %6022 = vmatprep.subr.bf16.mxu1 %v6455_v59  ;;  %v5195_v59 = vmul.f32 %v8575_v5, %v8575_v5 }
0x13dc   : > { %6023 = vmatpush3.bf16.msra.mxu1 %v6456_v6 }
0x13dd   : > { %6024 = vmatprep.subr.bf16.mxu1 %v6457_v3  ;;  %v5196_v3 = vmul.f32 %v8576_v19, %v8576_v19 }
0x13e0   : > { %6025 = vmatpush3.bf16.msra.mxu1 %v6458_v49  ;;  %v8321_v49 = vld [vmem:[%s7448_s24] sm:$0xff] }
0x13e1   : > { %6026 = vmatprep.subr.bf16.mxu1 %v6459_v18  ;;  %v1231_v18 = vsel %vm1230_vm6, %v8321_v49, -1e+30 }
0x13e4   : > { %6027 = vmatpush3.bf16.msra.mxu1 %v6460_v29 }
0x13e5   : > { %6296 = vmatprep.subr.bf16.mxu1 %v8524_v62 }
0x13e7   : > { %4990 = vmatmul.mubr.bf16.vlgmr.msra.gmra.mrb[88].mxu1 %v3996_v13 }
0x13e8   : > { %6312 = vmatprep.mubr.msk.bf16.mxu1 %vm6696_vm0, %v8524_v62  ;;  %6297 = vmatpush3.bf16.msra.mxu1 %v6477_v12 }
0x13e9   : > { %6298 = vmatprep.subr.bf16.mxu1 %v8524_v62 }
0x13ec   : > { %6299 = vmatpush3.bf16.msra.mxu1 %v6478_v24 }
0x13ed   : > { %6300 = vmatprep.subr.bf16.mxu1 %v8524_v62 }
0x147a   : > { %v4346_v63 = vpop.f32.mrb[80].mxu1 }
0x147b   : > { %v6294_v9 = vpop.f32.mrb[81].mxu1 }
0x147c   : > { %v4349_v45 = vpop.f32.mrb[82].mxu1 }
0x147d   : > { %v4353_v61 = vpack.c.bf16 %v4349_v45, %v4346_v63  ;;  %v6295_v8 = vpop.f32.mrb[83].mxu1  ;;  %v1232_v63 = vsel %vm1230_vm6, %v8325_v52, -1e+30 }
0x147f   : > { %5030 = vmatprep.mubr.bf16.mxu0 %v4353_v61 }
0x1480   : > { %5031 = vmatmul.mubr.bf16.vlgmr.msra.gmra.mrb[84].mxu0 %v4234_v46 }
0x1481   : > { %6320 = vmatprep.mubr.msk.bf16.mxu0 %vm6696_vm0, %v8524_v62 }
0x149a   : > { %v5984_v15 = vpop.f32.mrb[84].mxu1 }
0x149b   : > { %v5985_v7 = vpop.f32.mrb[85].mxu1 }
0x149c   : > { %v5986_v13 = vadd.f32 %v5985_v7, %v5984_v15  ;;  %v5987_v58 = vpop.f32.mrb[86].mxu1 }
0x149d   : > { %v5988_v2 = vpop.f32.mrb[87].mxu1 }
0x149e   : > { %v4910_v60 = vadd.f32 %v8575_v5, %v5986_v13  ;;  %v5989_v23 = vadd.f32 %v5988_v2, %v5987_v58  ;;  %v6479_v2 = vld [vmem:[#allocation9 + $0x10] sm:$0xff]  }
0x149f   : > { %6301 = vmatpush3.bf16.msra.mxu1 %v6479_v2  ;;  %v5275_v2 = vld [vmem:[%s851_s22] sm:$0xff] }
0x14a0   : > { %v4913_v17 = vadd.f32 %v8576_v19, %v5989_v23  ;;  %v4951_v30 = vadd.f32 %v8265_v34, %v4910_v60  ;;  %v8577_v34 = vld [vmem:[#allocation15_spill] sm:$0xff]  ;;  %6302 = vmatprep.subr.bf16.mxu1 %v8524_v62 }
0x14a2   : > { %v4954_v26 = vadd.f32 %v8267_v55, %v4913_v17  ;;  %v5208_v55 = vmul.f32 %v8577_v34, %v8577_v34  ;;  %v6480_v17 = vld [vmem:[#allocation9 + $0x18] sm:$0xff]  }
0x14a3   : > { %6303 = vmatpush3.bf16.msra.mxu1 %v6480_v17 }
0x14a4   : > { %6304 = vmatprep.subr.bf16.mxu1 %v8524_v62 }
0x14ba   : > { %v6028_v51 = vpop.f32.mrb[88].mxu1 }
0x14bb   : > { %v6029_v28 = vpop.f32.mrb[89].mxu1 }
0x14bc   : > { %v6030_v25 = vadd.f32 %v6029_v28, %v6028_v51  ;;  %v6031_v46 = vpop.f32.mrb[90].mxu1  ;;  %v6481_v28 = vld [vmem:[#allocation9 + $0x20] sm:$0xff]  }
0x14bd   : > { %v6032_v39 = vpop.f32.mrb[91].mxu1  ;;  %6305 = vmatpush3.bf16.msra.mxu1 %v6481_v28 }
0x14be   : > { %v4992_v10 = vadd.f32 %v6030_v25, %v4951_v30  ;;  %v6033_v40 = vadd.f32 %v6032_v39, %v6031_v46  ;;  %6306 = vmatprep.subr.bf16.mxu1 %v8524_v62  ;;  %v6482_v25 = vld [vmem:[#allocation9 + $0x28] sm:$0xff]   ;;  %v6483_v39 = vld [vmem:[#allocation9 + $0x30] sm:$0xff]  }
0x14bf   : > { %v1229_v46 = vld [vmem:[%s846_s7 + $0x8] sm:$0xff] }
0x14c0   : > { %v4995_v16 = vadd.f32 %v6033_v40, %v4954_v26  ;;  %v1228_v26 = vld [vmem:[%s846_s7] sm:$0xff]  ;;  %vm1268_vm8 = vcmp.ne.s32.totalorder %v1229_v46, 4294967196  ;;  %s8583_s7 = sld [smem:[#allocation46_spill]] }
0x14c1   : > { %6307 = vmatpush3.bf16.msra.mxu1 %v6482_v25  ;;  %vm1267_vm7 = vcmp.ne.s32.totalorder %v1228_v26, 4294967196 }
0x14c2   : > { %6308 = vmatprep.subr.bf16.mxu1 %v8524_v62 }
0x14c5   : > { %6309 = vmatpush3.bf16.msra.mxu1 %v6483_v39 }
0x14c6   : > { %6310 = vmatprep.subr.bf16.mxu1 %v8524_v62  ;;  %s866_s3 = scalar_lea.vmem %s8583_s7, %s6948_s6 }
0x1553   : > { %v6050_v4 = vpop.f32.mrb[84].mxu0 }
0x1554   : > { %v6051_v35 = vpop.f32.mrb[85].mxu0 }
0x1555   : > { %v6052_v36 = vadd.f32 %v6051_v35, %v6050_v4  ;;  %v6053_v54 = vpop.f32.mrb[86].mxu0 }
0x1556   : > { %v6054_v32 = vpop.f32.mrb[87].mxu0 }
0x1557   : > { %v6055_v27 = vadd.f32 %v6054_v32, %v6053_v54  ;;  %v5033_v47 = vadd.f32 %v6052_v36, %v4992_v10  ;;  %v6484_v10 = vld [vmem:[#allocation9 + $0x38] sm:$0xff]  }
0x1558   : > { %6311 = vmatpush3.bf16.msra.mxu1 %v6484_v10 }
0x1559   : > { %5039 = vadd.xlane.f32.xlu1 %v5033_v47  ;;  %v5036_v33 = vadd.f32 %v6055_v27, %v4995_v16 }
0x155b   : > { %5041 = vadd.xlane.f32.xlu0 %v5036_v33 }
0x155d   : > { %5212 = vadd.xlane.f32.xlu1 %v5208_v55 }
0x155f   : > { %5214 = vadd.xlane.f32.xlu0 %v5209_v31 }
0x1561   : > { %5216 = vadd.xlane.f32.xlu1 %v5210_v20  ;;  %v8349_v20 = vsel %vm1267_vm7, 1.0, %v8524_v62 }
0x1563   : > { %5218 = vadd.xlane.f32.xlu0 %v5211_v14  ;;  %v5852_v14 = vld [vmem:[%s8423_s17] ss:$0 sm:$0xff] }
0x15e6   : > { %v5040_v41 = vpop.xlane.xlu1 %5039 }
0x15e7   : > { %v5044_v56 = vmul.f32 0.0078125, %v5040_v41 }
0x15e8   : > { %v5042_v57 = vpop.xlane.xlu0 %5041 }
0x15e9   : > { %v8307_v53 = vsub.f32 %v5033_v47, %v5044_v56  ;;  %v5045_v48 = vmul.f32 0.0078125, %v5042_v57 }
0x15ea   : > { %v5213_v22 = vpop.xlane.xlu1 %5212 }
0x15eb   : > { %v8309_v0 = vsub.f32 %v5036_v33, %v5045_v48  ;;  %6561 = vrsqrt.f32 %v5213_v22  ;;  %v5048_v43 = vmul.f32 %v8307_v53, %v8307_v53  ;;  %v1287_v48 = vsel %vm1277_vm9, %v8349_v20, 0.0 }
0x15ec   : > { %v5215_v1 = vpop.xlane.xlu0 %5214 }
0x15ed   : > { %6563 = vrsqrt.f32 %v5215_v1  ;;  %5050 = vadd.xlane.f32.xlu1 %v5048_v43  ;;  %v5049_v38 = vmul.f32 %v8309_v0, %v8309_v0 }
0x15ee   : > { %v5217_v44 = vpop.xlane.xlu1 %5216 }
0x15ef   : > { %5052 = vadd.xlane.f32.xlu0 %v5049_v38  ;;  %6565 = vrsqrt.f32 %v5217_v44  ;;  %v5853_v44 = vld [vmem:[%s8424_s18] ss:$0 sm:$0xff] }
0x15f0   : > { %v5219_v6 = vpop.xlane.xlu0 %5218 }
0x15f1   : > { %6567 = vrsqrt.f32 %v5219_v6  ;;  %5197 = vadd.xlane.f32.xlu1 %v5195_v59 }
0x15f3   : > { %5199 = vadd.xlane.f32.xlu0 %v5196_v3 }
0x15f5   : > { %v6562_v29 = vpop.eup %6561  ;;  %1233 = vmax.xlane.f32.xlu1 %v1231_v18 }
0x15f6   : > { %v5224_v11 = vmin.f32 %v6562_v29, 100000.0 }
0x15f7   : > { %v6564_v9 = vpop.eup %6563  ;;  %1235 = vmax.xlane.f32.xlu0 %v1232_v63 }
0x15f8   : > { %v5225_v45 = vmin.f32 %v6564_v9, 100000.0  ;;  %v5228_v8 = vmul.f32 %v8577_v34, %v5224_v11 }
0x15f9   : > { %v6566_v61 = vpop.eup %6565 }
0x15fa   : > { %v5229_v15 = vmul.f32 %v8578_v42, %v5225_v45  ;;  %v5226_v60 = vmin.f32 %v6566_v61, 100000.0 }
0x15fb   : > { %v6568_v7 = vpop.eup %6567 }
0x15fc   : > { %v5232_v13 = vpack.c.bf16 %v5229_v15, %v5228_v8  ;;  %v5227_v58 = vmin.f32 %v6568_v7, 100000.0  ;;  %v5230_v30 = vmul.f32 %v8579_v37, %v5226_v60 }
0x15fe   : > { %6317 = vmatpush3.bf16.xpose.msra.mxu0 %v5232_v13  ;;  %v5231_v23 = vmul.f32 %v8580_v50, %v5227_v58  ;;  %v8352_v50 = vsel %vm1268_vm8, 1.0, %v8524_v62 }
0x15ff   : > { %6318 = vmatprep.subr.bf16.mxu0 %v8524_v62  ;;  %v1288_v22 = vsel %vm1277_vm9, %v8352_v50, 0.0 }
0x1600   : > { %v5233_v51 = vpack.c.bf16 %v5231_v23, %v5230_v30  ;;  %v1289_v6 = vadd.f32 %v1288_v22, %v1287_v48  ;;  %v5276_v23 = vld [vmem:[%s851_s22 + $0x8] sm:$0xff]  ;;  %s874_s22 = scalar_lea.vmem %s8585_s8, %s8588_s28 }
0x1602   : > { %v1290_v8 = vrot.slane %v1289_v6, 4 }
0x1606   : > { %6319 = vmatpush3.bf16.xpose.msra.mxu0 %v5233_v51  ;;  %1254 = vperm.xlu1 %6372, %v1228_v26  }
0x160d   : > { %1257 = vperm.xlu0 %6371, %v1229_v46  }
0x167a   : > { %v5051_v40 = vpop.xlane.xlu1 %5050 }
0x167b   : > { %v5054_v16 = vmul.f32 0.0078125, %v5051_v40 }
0x167c   : > { %v5053_v4 = vpop.xlane.xlu0 %5052 }
0x167d   : > { %v5056_v35 = vadd.f32 1e-06, %v5054_v16  ;;  %v5055_v36 = vmul.f32 0.0078125, %v5053_v4 }
0x167e   : > { %v5198_v54 = vpop.xlane.xlu1 %5197 }
0x167f   : > { %6569 = vrsqrt.f32 %v5056_v35  ;;  %v5057_v32 = vadd.f32 1e-06, %v5055_v36 }
0x1680   : > { %6571 = vrsqrt.f32 %v5198_v54  ;;  %v5200_v27 = vpop.xlane.xlu0 %5199 }
0x1681   : > { %6573 = vrsqrt.f32 %v5057_v32 }
0x1682   : > { %6575 = vrsqrt.f32 %v5200_v27  ;;  %v8342_v47 = vpop.xlane.xlu1 %1233 }
0x1683   : > { %v1237_v33 = vsub.f32 %v1231_v18, %v8342_v47 }
0x1684   : > { %v8345_v34 = vpop.xlane.xlu0 %1235 }
0x1685   : > { %v1239_v55 = vmul.f32 1.442695, %v1237_v33  ;;  %v1238_v42 = vsub.f32 %v1232_v63, %v8345_v34 }
0x1686   : > { %v1255_v18 = vpop.permute.xlu1 %1254 }
0x1687   : > { %6577 = vpow2.f32 %v1239_v55  ;;  %v1241_v31 = vmul.f32 1.442695, %v1238_v42  ;;  %vm1259_vm10 = vcmp.eq.s32.totalorder %v7018_v21, %v1255_v18 }
0x1689   : > { %v6570_v37 = vpop.eup %6569  ;;  %6579 = vpow2.f32 %v1241_v31 }
0x168a   : > { %v6572_v12 = vpop.eup %6571  ;;  %v5060_v24 = vmul.f32 %v6570_v37, %v8307_v53 }
0x168b   : > { %v6574_v41 = vpop.eup %6573  ;;  %v5203_v56 = vmin.f32 %v6572_v12, 100000.0 }
0x168c   : > { %v6576_v57 = vpop.eup %6575  ;;  %v5061_v43 = vmul.f32 %v6574_v41, %v8309_v0  ;;  %v5069_v1 = vmul.f32 %v5852_v14, %v5060_v24  ;;  %v1258_v45 = vpop.permute.xlu0 %1257 }
0x168d   : > { %v5204_v38 = vmin.f32 %v6576_v57, 100000.0  ;;  %v5205_v53 = vmul.f32 %v8575_v5, %v5203_v56  ;;  %vm1260_vm11 = vcmp.eq.s32.totalorder %v7018_v21, %v1258_v45  ;;  %v1261_v5 = vsel %vm1259_vm10, %v8321_v49, 0.0 }
0x168e   : > { %v5070_v59 = vmul.f32 %v5852_v14, %v5061_v43  ;;  %v5078_v29 = vadd.f32 %v5853_v44, %v5069_v1  ;;  %v1262_v15 = vsel %vm1260_vm11, %v8325_v52, 0.0  ;;  %v5854_v14 = vld [vmem:[%s8426_s20] ss:$0 sm:$0xff] }
0x168f   : > { %v5206_v3 = vmul.f32 %v8576_v19, %v5204_v38  ;;  %v1291_v19 = vadd.f32 %v1290_v8, %v1289_v6 }
0x1690   : > { %v5079_v11 = vadd.f32 %v5853_v44, %v5070_v59 }
0x1691   : > { %v6578_v63 = vpop.eup %6577  ;;  %v5207_v9 = vpack.c.bf16 %v5206_v3, %v5205_v53  ;;  %v1292_v7 = vrot.slane %v1291_v19, 2 }
0x1692   : > { %1243 = vadd.xlane.f32.xlu1 %v6578_v63  ;;  %v5080_v0 = vpack.c.bf16 %v5079_v11, %v5078_v29 }
0x1693   : > { %v6580_v61 = vpop.eup %6579  ;;  %6321 = vmatmul.mubr.bf16.vlgmr.msra.gmra.mrb[88].mxu0 %v5207_v9  ;;  %v1293_v13 = vadd.f32 %v1292_v7, %v1291_v19 }
0x1694   : > { %1245 = vadd.xlane.f32.xlu0 %v6580_v61  ;;  %6313 = vmatmul.mubr.bf16.vlgmr.msra.gmra.mrb[92].mxu1 %v5080_v0 }
0x1695   : > { %v1294_v58 = vrot.slane %v1293_v13, 1 }
0x1696   : > { %1263 = vadd.xlane.f32.xlu1 %v1261_v5 }
0x1697   : > { %v1295_v60 = vadd.f32 %v1294_v58, %v1293_v13 }
0x1698   : > { %1265 = vadd.xlane.f32.xlu0 %v1262_v15 }
0x16a7   : > { %5282 = vperm.xlu1 %6372, %v5275_v2  }
0x16ab   : > { %1300 = vperm.xlu1 %6372, %v1295_v60  }
0x16ae   : > { %5287 = vperm.xlu0 %6371, %v5276_v23  }
0x171f   : > { %v1244_v17 = vpop.xlane.xlu1 %1243 }
0x1720   : > { %6581 = vlog2.f32 %v1244_v17 }
0x1721   : > { %v1246_v49 = vpop.xlane.xlu0 %1245 }
0x1722   : > { %6583 = vlog2.f32 %v1246_v49 }
0x1723   : > { %v1264_v25 = vpop.xlane.xlu1 %1263 }
0x1725   : > { %v1266_v10 = vpop.xlane.xlu0 %1265 }
0x1727   : > { %v5283_v31 = vpop.permute.xlu1 %5282 }
0x172a   : > { %v6582_v30 = vpop.eup %6581 }
0x172b   : > { %v1248_v52 = vmul.f32 0.6931472, %v6582_v30  ;;  %v1301_v18 = vpop.permute.xlu1 %1300 }
0x172c   : > { %v6584_v26 = vpop.eup %6583  ;;  %v1303_v29 = vsel %vm1297_vm13, %v1301_v18, 0.0 }
0x172d   : > { %v1250_v51 = vmul.f32 0.6931472, %v6584_v26  ;;  %v1251_v28 = vadd.f32 %v1248_v52, %v8342_v47  ;;  %v5288_v37 = vpop.permute.xlu0 %5287 }
0x172f   : > { %v1273_v46 = vsub.f32 %v1251_v28, %v1264_v25  ;;  %v1252_v39 = vadd.f32 %v1250_v51, %v8345_v34  ;;  %v5863_v34 = vsel %vm5277_vm12, 1.0, %v8524_v62 }
0x1731   : > { %v1275_v40 = vmul.f32 %v8349_v20, %v1273_v46  ;;  %v1274_v16 = vsub.f32 %v1252_v39, %v1266_v10  ;;  %v5290_v20 = vmax.f32 %v5283_v31, %v5863_v34 }
0x1733   : > { %v1276_v4 = vmul.f32 %v8352_v50, %v1274_v16  ;;  %v1278_v35 = vsel %vm1277_vm9, %v1275_v40, 0.0  ;;  %v5291_v50 = vmax.f32 %v5288_v37, %v5863_v34  ;;  %v5294_v24 = vsub.f32 1.0, %v5290_v20 }
0x1735   : > { %v1279_v36 = vsel %vm1277_vm9, %v1276_v4, 0.0  ;;  %v5295_v43 = vsub.f32 1.0, %v5291_v50 }
0x1736   : > { %v1280_v54 = vadd.f32 %v1279_v36, %v1278_v35 }
0x1738   : > { %v1281_v32 = vrot.slane %v1280_v54, 4 }
0x173a   : > { %v1282_v27 = vadd.f32 %v1281_v32, %v1280_v54 }
0x173c   : > { %v1283_v33 = vrot.slane %v1282_v27, 2 }
0x173e   : > { %v1284_v47 = vadd.f32 %v1283_v33, %v1282_v27 }
0x1740   : > { %v1285_v55 = vrot.slane %v1284_v47, 1 }
0x1742   : > { %v1286_v42 = vadd.f32 %v1285_v55, %v1284_v47 }
0x1744   : > { %1306 = vperm.xlu1 %6372, %v1286_v42  }
0x1766   : > { %v5268_v12 = vpop.f32.mrb[88].mxu0 }
0x1767   : > { %v5292_v41 = vsub.f32 1.0, %v5268_v12  ;;  %v6322_v56 = vpop.f32.mrb[89].mxu0  ;;  %v5186_v57 = vpop.f32.mrb[92].mxu1 }
0x1768   : > { %v5187_v62 = vadd.f32 %v5854_v14, %v5186_v57  ;;  %v5271_v48 = vpop.f32.mrb[90].mxu0  ;;  %v6314_v22 = vpop.f32.mrb[93].mxu1 }
0x1769   : > { %v5296_v1 = vmul.f32 %v5294_v24, %v5292_v41  ;;  %v5293_v38 = vsub.f32 1.0, %v5271_v48  ;;  %v6323_v44 = vpop.f32.mrb[91].mxu0  ;;  %v5189_v59 = vpop.f32.mrb[94].mxu1 }
0x176a   : > { %5193 = vst [vmem:[%s866_s3] sm:$0xff] %v5187_v62  ;;  %v5190_v6 = vadd.f32 %v5854_v14, %v5189_v59  ;;  %v6315_v53 = vpop.f32.mrb[95].mxu1 }
0x176b   : > { %5298 = vst.msk [vmem:[%s871_s30] sm:$0xff] %vm3452_vm5, %v5296_v1  ;;  %v5297_v3 = vmul.f32 %v5295_v43, %v5293_v38 }
0x176c   : > { %5194 = vst [vmem:[%s866_s3 + $0x8] sm:$0xff] %v5190_v6 }
0x176d   : > { %5299 = vst.msk [vmem:[%s871_s30 + $0x8] sm:$0xff] %vm3452_vm5, %v5297_v3 }
0x17c3   : > { %v1307_v11 = vpop.permute.xlu1 %1306 }
0x17c4   : > { %v1309_v63 = vsel %vm1296_vm14, %v1307_v11, %v1303_v29 }
0x17c5   : > { %1310 = vst [vmem:[%s874_s22] sm:$0x1] %v1309_v63 }
0x17c6 PF: > { %s8586_s5 = sld [smem:[#allocation12_spill]] }
0x17cc   : > { %s37_s5 = sadd.s32 1, %s8586_s5  }
0x17cd   : > { %p34_p5 = scmp.ge.s32.totalorder %s37_s5, 4  }
0x17cf   :  { %36 = sbr.rel (!%p34_p5) target bundleno = 15 (0xf), region = 192 }
0x17d6   :  { %5365 = vsyncpa [#allocation6], 1 }
0x17d7   :  { %5367 = vsyncpa [#allocation6 + $0x1], 1 }
0x17d8   :  { %5368 = vsyncpa [#allocation8], 1 }

</bundles_post_ra>
